<compile_context>
chip_gen: v5e
topology: v5e:2x2
jax: 0.10.0
libtpu: 0.0.40
codegen_flags: <defaults>
</compile_context>

<pallas_src>
import math

import jax
import jax.numpy as jnp
from jax.experimental import pallas as pl
from jax.experimental.pallas import tpu as pltpu

NEG_SLOPE = 0.01   # LeakyReLU slope used by the module
N_BLOCKS = 11      # gc2 .. gc12 are GC_Blocks
BF16 = jnp.bfloat16


# ---------------------------------------------------------------------------
# Kernel
# ---------------------------------------------------------------------------
def _gcn_kernel(x_ref,
                w1_ref, att1_ref, s1_ref, t1_ref,
                wb_ref, attb_ref, sb_ref, tb_ref,
                w13_ref, att13_ref, b13_ref,
                o_ref):
    """One batch element per grid step.

    Activations are kept in transposed layout (features, nodes_padded): the node
    axis (zero-padded to a lane multiple) lives on the 128-wide lane dimension.
    Weight / att operands arrive pre-transposed and pre-cast to bf16.
    """
    xT = x_ref[0]                                                # (F_in, Np) f32

    def gconv(yT, wT, attT):
        # original: out = att @ (y @ W)   ->   out^T = W^T @ y^T @ att^T
        s = jnp.dot(wT, yT.astype(BF16), preferred_element_type=jnp.float32)
        return jnp.dot(s.astype(BF16), attT, preferred_element_type=jnp.float32)

    def bn_act(yT, scale, shift):
        # Folded BatchNorm1d (conv bias already folded into `shift`) + LeakyReLU.
        yT = yT * scale + shift
        return jnp.where(yT >= 0, yT, NEG_SLOPE * yT)
        # TODO(synk): Dropout is the identity here (inference-mode forward).

    # gc1 re-associated: out = (att1 @ x) @ W1  ->  out^T = W1^T @ (x^T @ att1^T)
    s = jnp.dot(xT.astype(BF16), att1_ref[...], preferred_element_type=jnp.float32)
    y1 = jnp.dot(w1_ref[...], s.astype(BF16), preferred_element_type=jnp.float32)
    y1 = bn_act(y1, s1_ref[...], t1_ref[...])

    def gc_block(y_in, bi):
        h = y_in
        for j in range(2):
            h = gconv(h, wb_ref[bi, j], attb_ref[bi, j])
            h = bn_act(h, sb_ref[bi, j], tb_ref[bi, j])
        return h + y_in

    y2 = gc_block(y1, 0)
    y3 = gc_block(y2, 1)
    y4 = gc_block(y3, 2)
    y5 = gc_block(y4, 3)
    y6 = gc_block(y5, 4)
    y7 = gc_block(y6, 5)
    y8 = gc_block(y7 + y6, 6)
    y9 = gc_block(y8 + y5, 7)
    y10 = gc_block(y9 + y4, 8)
    y11 = gc_block(y10 + y3, 9)
    y12 = gc_block(y11 + y2, 10)

    # gc13 keeps the original association; its bias is explicit (no BN follows).
    y13 = gconv(y12 + y1, w13_ref[...], att13_ref[...]) + b13_ref[...]
    o_ref[0] = (y13 + xT).astype(o_ref.dtype)


# ---------------------------------------------------------------------------
# Wrapper: layout transform (transpose + lane padding), bias folding, bf16 cast
# ---------------------------------------------------------------------------
def _pad_last(a, target):
    pad = target - a.shape[-1]
    if pad == 0:
        return a
    return jnp.pad(a, [(0, 0)] * (a.ndim - 1) + [(0, pad)])


def _pad_last2(a, target):
    p0 = target - a.shape[-2]
    p1 = target - a.shape[-1]
    if p0 == 0 and p1 == 0:
        return a
    return jnp.pad(a, [(0, 0)] * (a.ndim - 2) + [(0, p0), (0, p1)])


def prepare_params(P, node_n, n_pad):
    """Transpose operands to (features, nodes), zero-pad the node axis to n_pad,
    fold conv biases into the folded-BN shift, and cast matmul operands to bf16."""
    swap = lambda a: jnp.swapaxes(a, -1, -2)
    f_in = P["w1"].shape[0]
    Q = {}
    Q["w1T"] = swap(P["w1"]).astype(BF16)                               # (H, F_in)
    Q["att1T"] = _pad_last2(swap(P["att1"]), n_pad).astype(BF16)        # (Np, Np)
    Q["s1T"] = _pad_last(swap(P["s1"]), n_pad)                          # (H, Np)
    Q["t1T"] = _pad_last(swap(P["s1"] * P["b1"] + P["t1"]), n_pad)      # bias folded
    Q["wbT"] = swap(P["wb"]).astype(BF16)                               # (11,2,H,H)
    Q["attbT"] = _pad_last2(swap(P["attb"]), n_pad).astype(BF16)        # (11,2,Np,Np)
    Q["sbT"] = _pad_last(swap(P["sb"]), n_pad)                          # (11,2,H,Np)
    Q["tbT"] = _pad_last(swap(P["sb"] * P["bb"] + P["tb"]), n_pad)      # bias folded
    Q["w13T"] = swap(P["w13"]).astype(BF16)                             # (F_in, H)
    Q["att13T"] = _pad_last2(swap(P["att13"]), n_pad).astype(BF16)      # (Np, Np)
    # gc13 has no BN after it in the forward -> keep its bias explicit,
    # pre-broadcast to the padded lane layout (zeros in padded lanes).
    b13 = jnp.broadcast_to(swap(P["b13"]), (f_in, node_n))
    Q["b13T"] = _pad_last(b13, n_pad)                                   # (F_in, Np)
    return Q


def gcn_forward(x, P):
    """x: (B, node_n, F_in) -> (B, node_n, F_in)  (inference-mode GCN forward)."""
    b, n, f_in = x.shape
    hidden = P["w1"].shape[1]
    n_pad = ((n + 127) // 128) * 128

    Q = prepare_params(P, n, n_pad)
    xT = _pad_last(jnp.swapaxes(x, 1, 2), n_pad)                        # (B, F_in, Np)

    cw = lambda i: (0, 0)
    c4 = lambda i: (0, 0, 0, 0)

    outT = pl.pallas_call(
        _gcn_kernel,
        out_shape=jax.ShapeDtypeStruct((b, f_in, n_pad), jnp.float32),
        grid=(b,),
        in_specs=[
            pl.BlockSpec((1, f_in, n_pad), lambda i: (i, 0, 0)),        # xT
            pl.BlockSpec((hidden, f_in), cw),                           # w1T
            pl.BlockSpec((n_pad, n_pad), cw),                           # att1T
            pl.BlockSpec((hidden, n_pad), cw),                          # s1T
            pl.BlockSpec((hidden, n_pad), cw),                          # t1T
            pl.BlockSpec((N_BLOCKS, 2, hidden, hidden), c4),            # wbT
            pl.BlockSpec((N_BLOCKS, 2, n_pad, n_pad), c4),              # attbT
            pl.BlockSpec((N_BLOCKS, 2, hidden, n_pad), c4),             # sbT
            pl.BlockSpec((N_BLOCKS, 2, hidden, n_pad), c4),             # tbT
            pl.BlockSpec((f_in, hidden), cw),                           # w13T
            pl.BlockSpec((n_pad, n_pad), cw),                           # att13T
            pl.BlockSpec((f_in, n_pad), cw),                            # b13T
        ],
        out_specs=pl.BlockSpec((1, f_in, n_pad), lambda i: (i, 0, 0)),
        compiler_params=pltpu.CompilerParams(
            dimension_semantics=("parallel",)),
    )(xT, Q["w1T"], Q["att1T"], Q["s1T"], Q["t1T"],
      Q["wbT"], Q["attbT"], Q["sbT"], Q["tbT"],
      Q["w13T"], Q["att13T"], Q["b13T"])

    return jnp.swapaxes(outT[:, :, :n], 1, 2)


# ---------------------------------------------------------------------------
# Pure-JAX reference (same numerics: bf16 dot operands, f32 accumulation,
# same gc1 association) in the original (B, N, F) layout.
# ---------------------------------------------------------------------------
def gcn_reference(x, P):
    def gconv(y, w, att, bias):
        s = jnp.einsum("bnf,fg->bng", y.astype(BF16), w.astype(BF16),
                       preferred_element_type=jnp.float32)
        out = jnp.einsum("nm,bmg->bng", att.astype(BF16), s.astype(BF16),
                         preferred_element_type=jnp.float32)
        return out + bias

    def bn_act(y, scale, shift):
        y = y * scale[None] + shift[None]
        return jnp.where(y >= 0, y, NEG_SLOPE * y)

    # gc1 re-associated exactly like the kernel: (att1 @ x) @ W1
    s = jnp.einsum("nm,bmf->bnf", P["att1"].astype(BF16), x.astype(BF16),
                   preferred_element_type=jnp.float32)
    y1 = jnp.einsum("bnf,fg->bng", s.astype(BF16), P["w1"].astype(BF16),
                    preferred_element_type=jnp.float32) + P["b1"]
    y1 = bn_act(y1, P["s1"], P["t1"])

    def block(y_in, bi):
        h = y_in
        for j in range(2):
            h = gconv(h, P["wb"][bi, j], P["attb"][bi, j], P["bb"][bi, j])
            h = bn_act(h, P["sb"][bi, j], P["tb"][bi, j])
        return h + y_in

    y2 = block(y1, 0)
    y3 = block(y2, 1)
    y4 = block(y3, 2)
    y5 = block(y4, 3)
    y6 = block(y5, 4)
    y7 = block(y6, 5)
    y8 = block(y7 + y6, 6)
    y9 = block(y8 + y5, 7)
    y10 = block(y9 + y4, 8)
    y11 = block(y10 + y3, 9)
    y12 = block(y11 + y2, 10)
    y13 = gconv(y12 + y1, P["w13"], P["att13"], P["b13"])
    return y13 + x


# ---------------------------------------------------------------------------
# Parameter init (mirrors PyTorch: uniform(-stdv, stdv); BN folded from stats)
# ---------------------------------------------------------------------------
def init_params(key, node_n, f_in, hidden, eps=1e-5):
    keys = jax.random.split(key, 11)

    def uni(k, shape, stdv):
        return jax.random.uniform(k, shape, dtype=jnp.float32,
                                  minval=-stdv, maxval=stdv)

    def folded_bn(k, batch_shape):
        shape = batch_shape + (node_n, hidden)
        k1, k2, k3, k4 = jax.random.split(k, 4)
        gamma = jax.random.uniform(k1, shape, dtype=jnp.float32, minval=0.8, maxval=1.2)
        beta = jax.random.uniform(k2, shape, dtype=jnp.float32, minval=-0.1, maxval=0.1)
        mean = jax.random.uniform(k3, shape, dtype=jnp.float32, minval=-0.1, maxval=0.1)
        var = jax.random.uniform(k4, shape, dtype=jnp.float32, minval=0.5, maxval=1.5)
        scale = gamma * jax.lax.rsqrt(var + eps)
        shift = beta - mean * scale
        return scale, shift

    P = {}
    sd = 1.0 / math.sqrt(hidden)                 # stdv = 1/sqrt(weight.size(1))
    P["w1"] = uni(keys[0], (f_in, hidden), sd)
    P["att1"] = uni(keys[1], (node_n, node_n), sd)
    P["b1"] = uni(keys[2], (1, hidden), sd)
    P["s1"], P["t1"] = folded_bn(keys[3], ())

    P["wb"] = uni(keys[4], (N_BLOCKS, 2, hidden, hidden), sd)
    P["attb"] = uni(keys[5], (N_BLOCKS, 2, node_n, node_n), sd)
    P["bb"] = uni(keys[6], (N_BLOCKS, 2, 1, hidden), sd)
    P["sb"], P["tb"] = folded_bn(keys[7], (N_BLOCKS, 2))

    sd13 = 1.0 / math.sqrt(f_in)
    P["w13"] = uni(keys[8], (hidden, f_in), sd13)
    P["att13"] = uni(keys[9], (node_n, node_n), sd13)
    P["b13"] = uni(keys[10], (1, f_in), sd13)
    return P


if __name__ == "__main__":
    # Small shapes consistent with the module: x is (batch, node_n, input_feature).
    BATCH, NODE_N, F_IN, HIDDEN = 2, 78, 16, 32

    key = jax.random.PRNGKey(0)
    kx, kp = jax.random.split(key)
    x = jax.random.normal(kx, (BATCH, NODE_N, F_IN), dtype=jnp.float32)
    params = init_params(kp, NODE_N, F_IN, HIDDEN)

    out = gcn_forward(x, params)
    out = jax.block_until_ready(out)

    ref = gcn_reference(x, params)
    assert out.shape == (BATCH, NODE_N, F_IN)
    max_diff = float(jnp.max(jnp.abs(out - ref)))
    assert jnp.allclose(out, ref, atol=1e-2, rtol=1e-2), (
        "mismatch vs reference, max abs diff = %e" % max_diff)

    print("KERNEL_OK")
</pallas_src>

<mosaic_0001>
module attributes {stable_mosaic.version = 11 : i64} {
  func.func @_gcn_kernel(%arg0: i32, %arg1: memref<1x16x128xf32, #tpu.memory_space<vmem>>, %arg2: memref<32x16xbf16, #tpu.memory_space<vmem>>, %arg3: memref<128x128xbf16, #tpu.memory_space<vmem>>, %arg4: memref<32x128xf32, #tpu.memory_space<vmem>>, %arg5: memref<32x128xf32, #tpu.memory_space<vmem>>, %arg6: memref<11x2x32x32xbf16, #tpu.memory_space<vmem>>, %arg7: memref<11x2x128x128xbf16, #tpu.memory_space<vmem>>, %arg8: memref<11x2x32x128xf32, #tpu.memory_space<vmem>>, %arg9: memref<11x2x32x128xf32, #tpu.memory_space<vmem>>, %arg10: memref<16x32xbf16, #tpu.memory_space<vmem>>, %arg11: memref<128x128xbf16, #tpu.memory_space<vmem>>, %arg12: memref<16x128xf32, #tpu.memory_space<vmem>>, %arg13: memref<1x16x128xf32, #tpu.memory_space<vmem>>) attributes {dimension_semantics = [#tpu.dimension_semantics<parallel>], iteration_bounds = array<i64: 2>, scalar_prefetch = 0 : i64, scratch_operands = 0 : i64, tpu.core_type = #tpu.core_type<tc>, window_params = [{transform_indices = @transform_0, window_bounds = array<i64: 1, 16, 128>}, {pipeline_mode = #tpu.pipeline_mode<synchronous>, transform_indices = @transform_1, window_bounds = array<i64: 32, 16>}, {pipeline_mode = #tpu.pipeline_mode<synchronous>, transform_indices = @transform_2, window_bounds = array<i64: 128, 128>}, {pipeline_mode = #tpu.pipeline_mode<synchronous>, transform_indices = @transform_3, window_bounds = array<i64: 32, 128>}, {pipeline_mode = #tpu.pipeline_mode<synchronous>, transform_indices = @transform_4, window_bounds = array<i64: 32, 128>}, {pipeline_mode = #tpu.pipeline_mode<synchronous>, transform_indices = @transform_5, window_bounds = array<i64: 11, 2, 32, 32>}, {pipeline_mode = #tpu.pipeline_mode<synchronous>, transform_indices = @transform_6, window_bounds = array<i64: 11, 2, 128, 128>}, {pipeline_mode = #tpu.pipeline_mode<synchronous>, transform_indices = @transform_7, window_bounds = array<i64: 11, 2, 32, 128>}, {pipeline_mode = #tpu.pipeline_mode<synchronous>, transform_indices = @transform_8, window_bounds = array<i64: 11, 2, 32, 128>}, {pipeline_mode = #tpu.pipeline_mode<synchronous>, transform_indices = @transform_9, window_bounds = array<i64: 16, 32>}, {pipeline_mode = #tpu.pipeline_mode<synchronous>, transform_indices = @transform_10, window_bounds = array<i64: 128, 128>}, {pipeline_mode = #tpu.pipeline_mode<synchronous>, transform_indices = @transform_11, window_bounds = array<i64: 16, 128>}, {transform_indices = @transform_12, window_bounds = array<i64: 1, 16, 128>}]} {
    %c0 = arith.constant 0 : index
    %c0_0 = arith.constant 0 : index
    %c0_1 = arith.constant 0 : index
    %0 = vector.load %arg1[%c0, %c0_0, %c0_1] : memref<1x16x128xf32, #tpu.memory_space<vmem>>, vector<1x16x128xf32>
    %1 = vector.shape_cast %0 : vector<1x16x128xf32> to vector<16x128xf32>
    %2 = arith.truncf %1 : vector<16x128xf32> to vector<16x128xbf16>
    %c0_2 = arith.constant 0 : index
    %c0_3 = arith.constant 0 : index
    %3 = vector.load %arg3[%c0_2, %c0_3] : memref<128x128xbf16, #tpu.memory_space<vmem>>, vector<128x128xbf16>
    %cst = arith.constant dense<0.000000e+00> : vector<16x128xf32>
    %4 = tpu.matmul %2, %3, %cst {dimension_numbers = #tpu.dot_dimension_numbers<[1], [0], [0], [1], [0, 0, 1, 1], [], []>} : vector<16x128xbf16>, vector<128x128xbf16>, vector<16x128xf32> -> vector<16x128xf32>
    %c0_4 = arith.constant 0 : index
    %c0_5 = arith.constant 0 : index
    %5 = vector.load %arg2[%c0_4, %c0_5] : memref<32x16xbf16, #tpu.memory_space<vmem>>, vector<32x16xbf16>
    %6 = arith.truncf %4 : vector<16x128xf32> to vector<16x128xbf16>
    %cst_6 = arith.constant dense<0.000000e+00> : vector<32x128xf32>
    %7 = tpu.matmul %5, %6, %cst_6 {dimension_numbers = #tpu.dot_dimension_numbers<[1], [0], [0], [1], [0, 0, 1, 1], [], []>} : vector<32x16xbf16>, vector<16x128xbf16>, vector<32x128xf32> -> vector<32x128xf32>
    %c0_7 = arith.constant 0 : index
    %c0_8 = arith.constant 0 : index
    %8 = vector.load %arg4[%c0_7, %c0_8] : memref<32x128xf32, #tpu.memory_space<vmem>>, vector<32x128xf32>
    %c0_9 = arith.constant 0 : index
    %c0_10 = arith.constant 0 : index
    %9 = vector.load %arg5[%c0_9, %c0_10] : memref<32x128xf32, #tpu.memory_space<vmem>>, vector<32x128xf32>
    %10 = arith.mulf %7, %8 : vector<32x128xf32>
    %11 = arith.addf %10, %9 : vector<32x128xf32>
    %cst_11 = arith.constant 0.000000e+00 : f32
    %12 = vector.broadcast %cst_11 : f32 to vector<32x128xf32>
    %13 = arith.cmpf oge, %11, %12 : vector<32x128xf32>
    %cst_12 = arith.constant 0.00999999977 : f32
    %14 = vector.broadcast %cst_12 : f32 to vector<32x128xf32>
    %15 = arith.mulf %14, %11 : vector<32x128xf32>
    %16 = arith.select %13, %11, %15 : vector<32x128xi1>, vector<32x128xf32>
    %c0_13 = arith.constant 0 : index
    %c0_14 = arith.constant 0 : index
    %c0_15 = arith.constant 0 : index
    %c0_16 = arith.constant 0 : index
    %17 = vector.load %arg6[%c0_13, %c0_14, %c0_15, %c0_16] : memref<11x2x32x32xbf16, #tpu.memory_space<vmem>>, vector<1x1x32x32xbf16>
    %18 = vector.shape_cast %17 : vector<1x1x32x32xbf16> to vector<32x32xbf16>
    %c0_17 = arith.constant 0 : index
    %c0_18 = arith.constant 0 : index
    %c0_19 = arith.constant 0 : index
    %c0_20 = arith.constant 0 : index
    %19 = vector.load %arg7[%c0_17, %c0_18, %c0_19, %c0_20] : memref<11x2x128x128xbf16, #tpu.memory_space<vmem>>, vector<1x1x128x128xbf16>
    %20 = vector.shape_cast %19 : vector<1x1x128x128xbf16> to vector<128x128xbf16>
    %21 = arith.truncf %16 : vector<32x128xf32> to vector<32x128xbf16>
    %cst_21 = arith.constant dense<0.000000e+00> : vector<32x128xf32>
    %22 = tpu.matmul %18, %21, %cst_21 {dimension_numbers = #tpu.dot_dimension_numbers<[1], [0], [0], [1], [0, 0, 1, 1], [], []>} : vector<32x32xbf16>, vector<32x128xbf16>, vector<32x128xf32> -> vector<32x128xf32>
    %23 = arith.truncf %22 : vector<32x128xf32> to vector<32x128xbf16>
    %cst_22 = arith.constant dense<0.000000e+00> : vector<32x128xf32>
    %24 = tpu.matmul %23, %20, %cst_22 {dimension_numbers = #tpu.dot_dimension_numbers<[1], [0], [0], [1], [0, 0, 1, 1], [], []>} : vector<32x128xbf16>, vector<128x128xbf16>, vector<32x128xf32> -> vector<32x128xf32>
    %c0_23 = arith.constant 0 : index
    %c0_24 = arith.constant 0 : index
    %c0_25 = arith.constant 0 : index
    %c0_26 = arith.constant 0 : index
    %25 = vector.load %arg8[%c0_23, %c0_24, %c0_25, %c0_26] : memref<11x2x32x128xf32, #tpu.memory_space<vmem>>, vector<1x1x32x128xf32>
    %26 = vector.shape_cast %25 : vector<1x1x32x128xf32> to vector<32x128xf32>
    %c0_27 = arith.constant 0 : index
    %c0_28 = arith.constant 0 : index
    %c0_29 = arith.constant 0 : index
    %c0_30 = arith.constant 0 : index
    %27 = vector.load %arg9[%c0_27, %c0_28, %c0_29, %c0_30] : memref<11x2x32x128xf32, #tpu.memory_space<vmem>>, vector<1x1x32x128xf32>
    %28 = vector.shape_cast %27 : vector<1x1x32x128xf32> to vector<32x128xf32>
    %29 = arith.mulf %24, %26 : vector<32x128xf32>
    %30 = arith.addf %29, %28 : vector<32x128xf32>
    %cst_31 = arith.constant 0.000000e+00 : f32
    %31 = vector.broadcast %cst_31 : f32 to vector<32x128xf32>
    %32 = arith.cmpf oge, %30, %31 : vector<32x128xf32>
    %cst_32 = arith.constant 0.00999999977 : f32
    %33 = vector.broadcast %cst_32 : f32 to vector<32x128xf32>
    %34 = arith.mulf %33, %30 : vector<32x128xf32>
    %35 = arith.select %32, %30, %34 : vector<32x128xi1>, vector<32x128xf32>
    %c0_33 = arith.constant 0 : index
    %c1 = arith.constant 1 : index
    %c0_34 = arith.constant 0 : index
    %c0_35 = arith.constant 0 : index
    %36 = vector.load %arg6[%c0_33, %c1, %c0_34, %c0_35] : memref<11x2x32x32xbf16, #tpu.memory_space<vmem>>, vector<1x1x32x32xbf16>
    %37 = vector.shape_cast %36 : vector<1x1x32x32xbf16> to vector<32x32xbf16>
    %c0_36 = arith.constant 0 : index
    %c1_37 = arith.constant 1 : index
    %c0_38 = arith.constant 0 : index
    %c0_39 = arith.constant 0 : index
    %38 = vector.load %arg7[%c0_36, %c1_37, %c0_38, %c0_39] : memref<11x2x128x128xbf16, #tpu.memory_space<vmem>>, vector<1x1x128x128xbf16>
    %39 = vector.shape_cast %38 : vector<1x1x128x128xbf16> to vector<128x128xbf16>
    %40 = arith.truncf %35 : vector<32x128xf32> to vector<32x128xbf16>
    %cst_40 = arith.constant dense<0.000000e+00> : vector<32x128xf32>
    %41 = tpu.matmul %37, %40, %cst_40 {dimension_numbers = #tpu.dot_dimension_numbers<[1], [0], [0], [1], [0, 0, 1, 1], [], []>} : vector<32x32xbf16>, vector<32x128xbf16>, vector<32x128xf32> -> vector<32x128xf32>
    %42 = arith.truncf %41 : vector<32x128xf32> to vector<32x128xbf16>
    %cst_41 = arith.constant dense<0.000000e+00> : vector<32x128xf32>
    %43 = tpu.matmul %42, %39, %cst_41 {dimension_numbers = #tpu.dot_dimension_numbers<[1], [0], [0], [1], [0, 0, 1, 1], [], []>} : vector<32x128xbf16>, vector<128x128xbf16>, vector<32x128xf32> -> vector<32x128xf32>
    %c0_42 = arith.constant 0 : index
    %c1_43 = arith.constant 1 : index
    %c0_44 = arith.constant 0 : index
    %c0_45 = arith.constant 0 : index
    %44 = vector.load %arg8[%c0_42, %c1_43, %c0_44, %c0_45] : memref<11x2x32x128xf32, #tpu.memory_space<vmem>>, vector<1x1x32x128xf32>
    %45 = vector.shape_cast %44 : vector<1x1x32x128xf32> to vector<32x128xf32>
    %c0_46 = arith.constant 0 : index
    %c1_47 = arith.constant 1 : index
    %c0_48 = arith.constant 0 : index
    %c0_49 = arith.constant 0 : index
    %46 = vector.load %arg9[%c0_46, %c1_47, %c0_48, %c0_49] : memref<11x2x32x128xf32, #tpu.memory_space<vmem>>, vector<1x1x32x128xf32>
    %47 = vector.shape_cast %46 : vector<1x1x32x128xf32> to vector<32x128xf32>
    %48 = arith.mulf %43, %45 : vector<32x128xf32>
    %49 = arith.addf %48, %47 : vector<32x128xf32>
    %cst_50 = arith.constant 0.000000e+00 : f32
    %50 = vector.broadcast %cst_50 : f32 to vector<32x128xf32>
    %51 = arith.cmpf oge, %49, %50 : vector<32x128xf32>
    %cst_51 = arith.constant 0.00999999977 : f32
    %52 = vector.broadcast %cst_51 : f32 to vector<32x128xf32>
    %53 = arith.mulf %52, %49 : vector<32x128xf32>
    %54 = arith.select %51, %49, %53 : vector<32x128xi1>, vector<32x128xf32>
    %55 = arith.addf %54, %16 : vector<32x128xf32>
    %c1_52 = arith.constant 1 : index
    %c0_53 = arith.constant 0 : index
    %c0_54 = arith.constant 0 : index
    %c0_55 = arith.constant 0 : index
    %56 = vector.load %arg6[%c1_52, %c0_53, %c0_54, %c0_55] : memref<11x2x32x32xbf16, #tpu.memory_space<vmem>>, vector<1x1x32x32xbf16>
    %57 = vector.shape_cast %56 : vector<1x1x32x32xbf16> to vector<32x32xbf16>
    %c1_56 = arith.constant 1 : index
    %c0_57 = arith.constant 0 : index
    %c0_58 = arith.constant 0 : index
    %c0_59 = arith.constant 0 : index
    %58 = vector.load %arg7[%c1_56, %c0_57, %c0_58, %c0_59] : memref<11x2x128x128xbf16, #tpu.memory_space<vmem>>, vector<1x1x128x128xbf16>
    %59 = vector.shape_cast %58 : vector<1x1x128x128xbf16> to vector<128x128xbf16>
    %60 = arith.truncf %55 : vector<32x128xf32> to vector<32x128xbf16>
    %cst_60 = arith.constant dense<0.000000e+00> : vector<32x128xf32>
    %61 = tpu.matmul %57, %60, %cst_60 {dimension_numbers = #tpu.dot_dimension_numbers<[1], [0], [0], [1], [0, 0, 1, 1], [], []>} : vector<32x32xbf16>, vector<32x128xbf16>, vector<32x128xf32> -> vector<32x128xf32>
    %62 = arith.truncf %61 : vector<32x128xf32> to vector<32x128xbf16>
    %cst_61 = arith.constant dense<0.000000e+00> : vector<32x128xf32>
    %63 = tpu.matmul %62, %59, %cst_61 {dimension_numbers = #tpu.dot_dimension_numbers<[1], [0], [0], [1], [0, 0, 1, 1], [], []>} : vector<32x128xbf16>, vector<128x128xbf16>, vector<32x128xf32> -> vector<32x128xf32>
    %c1_62 = arith.constant 1 : index
    %c0_63 = arith.constant 0 : index
    %c0_64 = arith.constant 0 : index
    %c0_65 = arith.constant 0 : index
    %64 = vector.load %arg8[%c1_62, %c0_63, %c0_64, %c0_65] : memref<11x2x32x128xf32, #tpu.memory_space<vmem>>, vector<1x1x32x128xf32>
    %65 = vector.shape_cast %64 : vector<1x1x32x128xf32> to vector<32x128xf32>
    %c1_66 = arith.constant 1 : index
    %c0_67 = arith.constant 0 : index
    %c0_68 = arith.constant 0 : index
    %c0_69 = arith.constant 0 : index
    %66 = vector.load %arg9[%c1_66, %c0_67, %c0_68, %c0_69] : memref<11x2x32x128xf32, #tpu.memory_space<vmem>>, vector<1x1x32x128xf32>
    %67 = vector.shape_cast %66 : vector<1x1x32x128xf32> to vector<32x128xf32>
    %68 = arith.mulf %63, %65 : vector<32x128xf32>
    %69 = arith.addf %68, %67 : vector<32x128xf32>
    %cst_70 = arith.constant 0.000000e+00 : f32
    %70 = vector.broadcast %cst_70 : f32 to vector<32x128xf32>
    %71 = arith.cmpf oge, %69, %70 : vector<32x128xf32>
    %cst_71 = arith.constant 0.00999999977 : f32
    %72 = vector.broadcast %cst_71 : f32 to vector<32x128xf32>
    %73 = arith.mulf %72, %69 : vector<32x128xf32>
    %74 = arith.select %71, %69, %73 : vector<32x128xi1>, vector<32x128xf32>
    %c1_72 = arith.constant 1 : index
    %c1_73 = arith.constant 1 : index
    %c0_74 = arith.constant 0 : index
    %c0_75 = arith.constant 0 : index
    %75 = vector.load %arg6[%c1_72, %c1_73, %c0_74, %c0_75] : memref<11x2x32x32xbf16, #tpu.memory_space<vmem>>, vector<1x1x32x32xbf16>
    %76 = vector.shape_cast %75 : vector<1x1x32x32xbf16> to vector<32x32xbf16>
    %c1_76 = arith.constant 1 : index
    %c1_77 = arith.constant 1 : index
    %c0_78 = arith.constant 0 : index
    %c0_79 = arith.constant 0 : index
    %77 = vector.load %arg7[%c1_76, %c1_77, %c0_78, %c0_79] : memref<11x2x128x128xbf16, #tpu.memory_space<vmem>>, vector<1x1x128x128xbf16>
    %78 = vector.shape_cast %77 : vector<1x1x128x128xbf16> to vector<128x128xbf16>
    %79 = arith.truncf %74 : vector<32x128xf32> to vector<32x128xbf16>
    %cst_80 = arith.constant dense<0.000000e+00> : vector<32x128xf32>
    %80 = tpu.matmul %76, %79, %cst_80 {dimension_numbers = #tpu.dot_dimension_numbers<[1], [0], [0], [1], [0, 0, 1, 1], [], []>} : vector<32x32xbf16>, vector<32x128xbf16>, vector<32x128xf32> -> vector<32x128xf32>
    %81 = arith.truncf %80 : vector<32x128xf32> to vector<32x128xbf16>
    %cst_81 = arith.constant dense<0.000000e+00> : vector<32x128xf32>
    %82 = tpu.matmul %81, %78, %cst_81 {dimension_numbers = #tpu.dot_dimension_numbers<[1], [0], [0], [1], [0, 0, 1, 1], [], []>} : vector<32x128xbf16>, vector<128x128xbf16>, vector<32x128xf32> -> vector<32x128xf32>
    %c1_82 = arith.constant 1 : index
    %c1_83 = arith.constant 1 : index
    %c0_84 = arith.constant 0 : index
    %c0_85 = arith.constant 0 : index
    %83 = vector.load %arg8[%c1_82, %c1_83, %c0_84, %c0_85] : memref<11x2x32x128xf32, #tpu.memory_space<vmem>>, vector<1x1x32x128xf32>
    %84 = vector.shape_cast %83 : vector<1x1x32x128xf32> to vector<32x128xf32>
    %c1_86 = arith.constant 1 : index
    %c1_87 = arith.constant 1 : index
    %c0_88 = arith.constant 0 : index
    %c0_89 = arith.constant 0 : index
    %85 = vector.load %arg9[%c1_86, %c1_87, %c0_88, %c0_89] : memref<11x2x32x128xf32, #tpu.memory_space<vmem>>, vector<1x1x32x128xf32>
    %86 = vector.shape_cast %85 : vector<1x1x32x128xf32> to vector<32x128xf32>
    %87 = arith.mulf %82, %84 : vector<32x128xf32>
    %88 = arith.addf %87, %86 : vector<32x128xf32>
    %cst_90 = arith.constant 0.000000e+00 : f32
    %89 = vector.broadcast %cst_90 : f32 to vector<32x128xf32>
    %90 = arith.cmpf oge, %88, %89 : vector<32x128xf32>
    %cst_91 = arith.constant 0.00999999977 : f32
    %91 = vector.broadcast %cst_91 : f32 to vector<32x128xf32>
    %92 = arith.mulf %91, %88 : vector<32x128xf32>
    %93 = arith.select %90, %88, %92 : vector<32x128xi1>, vector<32x128xf32>
    %94 = arith.addf %93, %55 : vector<32x128xf32>
    %c2 = arith.constant 2 : index
    %c0_92 = arith.constant 0 : index
    %c0_93 = arith.constant 0 : index
    %c0_94 = arith.constant 0 : index
    %95 = vector.load %arg6[%c2, %c0_92, %c0_93, %c0_94] : memref<11x2x32x32xbf16, #tpu.memory_space<vmem>>, vector<1x1x32x32xbf16>
    %96 = vector.shape_cast %95 : vector<1x1x32x32xbf16> to vector<32x32xbf16>
    %c2_95 = arith.constant 2 : index
    %c0_96 = arith.constant 0 : index
    %c0_97 = arith.constant 0 : index
    %c0_98 = arith.constant 0 : index
    %97 = vector.load %arg7[%c2_95, %c0_96, %c0_97, %c0_98] : memref<11x2x128x128xbf16, #tpu.memory_space<vmem>>, vector<1x1x128x128xbf16>
    %98 = vector.shape_cast %97 : vector<1x1x128x128xbf16> to vector<128x128xbf16>
    %99 = arith.truncf %94 : vector<32x128xf32> to vector<32x128xbf16>
    %cst_99 = arith.constant dense<0.000000e+00> : vector<32x128xf32>
    %100 = tpu.matmul %96, %99, %cst_99 {dimension_numbers = #tpu.dot_dimension_numbers<[1], [0], [0], [1], [0, 0, 1, 1], [], []>} : vector<32x32xbf16>, vector<32x128xbf16>, vector<32x128xf32> -> vector<32x128xf32>
    %101 = arith.truncf %100 : vector<32x128xf32> to vector<32x128xbf16>
    %cst_100 = arith.constant dense<0.000000e+00> : vector<32x128xf32>
    %102 = tpu.matmul %101, %98, %cst_100 {dimension_numbers = #tpu.dot_dimension_numbers<[1], [0], [0], [1], [0, 0, 1, 1], [], []>} : vector<32x128xbf16>, vector<128x128xbf16>, vector<32x128xf32> -> vector<32x128xf32>
    %c2_101 = arith.constant 2 : index
    %c0_102 = arith.constant 0 : index
    %c0_103 = arith.constant 0 : index
    %c0_104 = arith.constant 0 : index
    %103 = vector.load %arg8[%c2_101, %c0_102, %c0_103, %c0_104] : memref<11x2x32x128xf32, #tpu.memory_space<vmem>>, vector<1x1x32x128xf32>
    %104 = vector.shape_cast %103 : vector<1x1x32x128xf32> to vector<32x128xf32>
    %c2_105 = arith.constant 2 : index
    %c0_106 = arith.constant 0 : index
    %c0_107 = arith.constant 0 : index
    %c0_108 = arith.constant 0 : index
    %105 = vector.load %arg9[%c2_105, %c0_106, %c0_107, %c0_108] : memref<11x2x32x128xf32, #tpu.memory_space<vmem>>, vector<1x1x32x128xf32>
    %106 = vector.shape_cast %105 : vector<1x1x32x128xf32> to vector<32x128xf32>
    %107 = arith.mulf %102, %104 : vector<32x128xf32>
    %108 = arith.addf %107, %106 : vector<32x128xf32>
    %cst_109 = arith.constant 0.000000e+00 : f32
    %109 = vector.broadcast %cst_109 : f32 to vector<32x128xf32>
    %110 = arith.cmpf oge, %108, %109 : vector<32x128xf32>
    %cst_110 = arith.constant 0.00999999977 : f32
    %111 = vector.broadcast %cst_110 : f32 to vector<32x128xf32>
    %112 = arith.mulf %111, %108 : vector<32x128xf32>
    %113 = arith.select %110, %108, %112 : vector<32x128xi1>, vector<32x128xf32>
    %c2_111 = arith.constant 2 : index
    %c1_112 = arith.constant 1 : index
    %c0_113 = arith.constant 0 : index
    %c0_114 = arith.constant 0 : index
    %114 = vector.load %arg6[%c2_111, %c1_112, %c0_113, %c0_114] : memref<11x2x32x32xbf16, #tpu.memory_space<vmem>>, vector<1x1x32x32xbf16>
    %115 = vector.shape_cast %114 : vector<1x1x32x32xbf16> to vector<32x32xbf16>
    %c2_115 = arith.constant 2 : index
    %c1_116 = arith.constant 1 : index
    %c0_117 = arith.constant 0 : index
    %c0_118 = arith.constant 0 : index
    %116 = vector.load %arg7[%c2_115, %c1_116, %c0_117, %c0_118] : memref<11x2x128x128xbf16, #tpu.memory_space<vmem>>, vector<1x1x128x128xbf16>
    %117 = vector.shape_cast %116 : vector<1x1x128x128xbf16> to vector<128x128xbf16>
    %118 = arith.truncf %113 : vector<32x128xf32> to vector<32x128xbf16>
    %cst_119 = arith.constant dense<0.000000e+00> : vector<32x128xf32>
    %119 = tpu.matmul %115, %118, %cst_119 {dimension_numbers = #tpu.dot_dimension_numbers<[1], [0], [0], [1], [0, 0, 1, 1], [], []>} : vector<32x32xbf16>, vector<32x128xbf16>, vector<32x128xf32> -> vector<32x128xf32>
    %120 = arith.truncf %119 : vector<32x128xf32> to vector<32x128xbf16>
    %cst_120 = arith.constant dense<0.000000e+00> : vector<32x128xf32>
    %121 = tpu.matmul %120, %117, %cst_120 {dimension_numbers = #tpu.dot_dimension_numbers<[1], [0], [0], [1], [0, 0, 1, 1], [], []>} : vector<32x128xbf16>, vector<128x128xbf16>, vector<32x128xf32> -> vector<32x128xf32>
    %c2_121 = arith.constant 2 : index
    %c1_122 = arith.constant 1 : index
    %c0_123 = arith.constant 0 : index
    %c0_124 = arith.constant 0 : index
    %122 = vector.load %arg8[%c2_121, %c1_122, %c0_123, %c0_124] : memref<11x2x32x128xf32, #tpu.memory_space<vmem>>, vector<1x1x32x128xf32>
    %123 = vector.shape_cast %122 : vector<1x1x32x128xf32> to vector<32x128xf32>
    %c2_125 = arith.constant 2 : index
    %c1_126 = arith.constant 1 : index
    %c0_127 = arith.constant 0 : index
    %c0_128 = arith.constant 0 : index
    %124 = vector.load %arg9[%c2_125, %c1_126, %c0_127, %c0_128] : memref<11x2x32x128xf32, #tpu.memory_space<vmem>>, vector<1x1x32x128xf32>
    %125 = vector.shape_cast %124 : vector<1x1x32x128xf32> to vector<32x128xf32>
    %126 = arith.mulf %121, %123 : vector<32x128xf32>
    %127 = arith.addf %126, %125 : vector<32x128xf32>
    %cst_129 = arith.constant 0.000000e+00 : f32
    %128 = vector.broadcast %cst_129 : f32 to vector<32x128xf32>
    %129 = arith.cmpf oge, %127, %128 : vector<32x128xf32>
    %cst_130 = arith.constant 0.00999999977 : f32
    %130 = vector.broadcast %cst_130 : f32 to vector<32x128xf32>
    %131 = arith.mulf %130, %127 : vector<32x128xf32>
    %132 = arith.select %129, %127, %131 : vector<32x128xi1>, vector<32x128xf32>
    %133 = arith.addf %132, %94 : vector<32x128xf32>
    %c3 = arith.constant 3 : index
    %c0_131 = arith.constant 0 : index
    %c0_132 = arith.constant 0 : index
    %c0_133 = arith.constant 0 : index
    %134 = vector.load %arg6[%c3, %c0_131, %c0_132, %c0_133] : memref<11x2x32x32xbf16, #tpu.memory_space<vmem>>, vector<1x1x32x32xbf16>
    %135 = vector.shape_cast %134 : vector<1x1x32x32xbf16> to vector<32x32xbf16>
    %c3_134 = arith.constant 3 : index
    %c0_135 = arith.constant 0 : index
    %c0_136 = arith.constant 0 : index
    %c0_137 = arith.constant 0 : index
    %136 = vector.load %arg7[%c3_134, %c0_135, %c0_136, %c0_137] : memref<11x2x128x128xbf16, #tpu.memory_space<vmem>>, vector<1x1x128x128xbf16>
    %137 = vector.shape_cast %136 : vector<1x1x128x128xbf16> to vector<128x128xbf16>
    %138 = arith.truncf %133 : vector<32x128xf32> to vector<32x128xbf16>
    %cst_138 = arith.constant dense<0.000000e+00> : vector<32x128xf32>
    %139 = tpu.matmul %135, %138, %cst_138 {dimension_numbers = #tpu.dot_dimension_numbers<[1], [0], [0], [1], [0, 0, 1, 1], [], []>} : vector<32x32xbf16>, vector<32x128xbf16>, vector<32x128xf32> -> vector<32x128xf32>
    %140 = arith.truncf %139 : vector<32x128xf32> to vector<32x128xbf16>
    %cst_139 = arith.constant dense<0.000000e+00> : vector<32x128xf32>
    %141 = tpu.matmul %140, %137, %cst_139 {dimension_numbers = #tpu.dot_dimension_numbers<[1], [0], [0], [1], [0, 0, 1, 1], [], []>} : vector<32x128xbf16>, vector<128x128xbf16>, vector<32x128xf32> -> vector<32x128xf32>
    %c3_140 = arith.constant 3 : index
    %c0_141 = arith.constant 0 : index
    %c0_142 = arith.constant 0 : index
    %c0_143 = arith.constant 0 : index
    %142 = vector.load %arg8[%c3_140, %c0_141, %c0_142, %c0_143] : memref<11x2x32x128xf32, #tpu.memory_space<vmem>>, vector<1x1x32x128xf32>
    %143 = vector.shape_cast %142 : vector<1x1x32x128xf32> to vector<32x128xf32>
    %c3_144 = arith.constant 3 : index
    %c0_145 = arith.constant 0 : index
    %c0_146 = arith.constant 0 : index
    %c0_147 = arith.constant 0 : index
    %144 = vector.load %arg9[%c3_144, %c0_145, %c0_146, %c0_147] : memref<11x2x32x128xf32, #tpu.memory_space<vmem>>, vector<1x1x32x128xf32>
    %145 = vector.shape_cast %144 : vector<1x1x32x128xf32> to vector<32x128xf32>
    %146 = arith.mulf %141, %143 : vector<32x128xf32>
    %147 = arith.addf %146, %145 : vector<32x128xf32>
    %cst_148 = arith.constant 0.000000e+00 : f32
    %148 = vector.broadcast %cst_148 : f32 to vector<32x128xf32>
    %149 = arith.cmpf oge, %147, %148 : vector<32x128xf32>
    %cst_149 = arith.constant 0.00999999977 : f32
    %150 = vector.broadcast %cst_149 : f32 to vector<32x128xf32>
    %151 = arith.mulf %150, %147 : vector<32x128xf32>
    %152 = arith.select %149, %147, %151 : vector<32x128xi1>, vector<32x128xf32>
    %c3_150 = arith.constant 3 : index
    %c1_151 = arith.constant 1 : index
    %c0_152 = arith.constant 0 : index
    %c0_153 = arith.constant 0 : index
    %153 = vector.load %arg6[%c3_150, %c1_151, %c0_152, %c0_153] : memref<11x2x32x32xbf16, #tpu.memory_space<vmem>>, vector<1x1x32x32xbf16>
    %154 = vector.shape_cast %153 : vector<1x1x32x32xbf16> to vector<32x32xbf16>
    %c3_154 = arith.constant 3 : index
    %c1_155 = arith.constant 1 : index
    %c0_156 = arith.constant 0 : index
    %c0_157 = arith.constant 0 : index
    %155 = vector.load %arg7[%c3_154, %c1_155, %c0_156, %c0_157] : memref<11x2x128x128xbf16, #tpu.memory_space<vmem>>, vector<1x1x128x128xbf16>
    %156 = vector.shape_cast %155 : vector<1x1x128x128xbf16> to vector<128x128xbf16>
    %157 = arith.truncf %152 : vector<32x128xf32> to vector<32x128xbf16>
    %cst_158 = arith.constant dense<0.000000e+00> : vector<32x128xf32>
    %158 = tpu.matmul %154, %157, %cst_158 {dimension_numbers = #tpu.dot_dimension_numbers<[1], [0], [0], [1], [0, 0, 1, 1], [], []>} : vector<32x32xbf16>, vector<32x128xbf16>, vector<32x128xf32> -> vector<32x128xf32>
    %159 = arith.truncf %158 : vector<32x128xf32> to vector<32x128xbf16>
    %cst_159 = arith.constant dense<0.000000e+00> : vector<32x128xf32>
    %160 = tpu.matmul %159, %156, %cst_159 {dimension_numbers = #tpu.dot_dimension_numbers<[1], [0], [0], [1], [0, 0, 1, 1], [], []>} : vector<32x128xbf16>, vector<128x128xbf16>, vector<32x128xf32> -> vector<32x128xf32>
    %c3_160 = arith.constant 3 : index
    %c1_161 = arith.constant 1 : index
    %c0_162 = arith.constant 0 : index
    %c0_163 = arith.constant 0 : index
    %161 = vector.load %arg8[%c3_160, %c1_161, %c0_162, %c0_163] : memref<11x2x32x128xf32, #tpu.memory_space<vmem>>, vector<1x1x32x128xf32>
    %162 = vector.shape_cast %161 : vector<1x1x32x128xf32> to vector<32x128xf32>
    %c3_164 = arith.constant 3 : index
    %c1_165 = arith.constant 1 : index
    %c0_166 = arith.constant 0 : index
    %c0_167 = arith.constant 0 : index
    %163 = vector.load %arg9[%c3_164, %c1_165, %c0_166, %c0_167] : memref<11x2x32x128xf32, #tpu.memory_space<vmem>>, vector<1x1x32x128xf32>
    %164 = vector.shape_cast %163 : vector<1x1x32x128xf32> to vector<32x128xf32>
    %165 = arith.mulf %160, %162 : vector<32x128xf32>
    %166 = arith.addf %165, %164 : vector<32x128xf32>
    %cst_168 = arith.constant 0.000000e+00 : f32
    %167 = vector.broadcast %cst_168 : f32 to vector<32x128xf32>
    %168 = arith.cmpf oge, %166, %167 : vector<32x128xf32>
    %cst_169 = arith.constant 0.00999999977 : f32
    %169 = vector.broadcast %cst_169 : f32 to vector<32x128xf32>
    %170 = arith.mulf %169, %166 : vector<32x128xf32>
    %171 = arith.select %168, %166, %170 : vector<32x128xi1>, vector<32x128xf32>
    %172 = arith.addf %171, %133 : vector<32x128xf32>
    %c4 = arith.constant 4 : index
    %c0_170 = arith.constant 0 : index
    %c0_171 = arith.constant 0 : index
    %c0_172 = arith.constant 0 : index
    %173 = vector.load %arg6[%c4, %c0_170, %c0_171, %c0_172] : memref<11x2x32x32xbf16, #tpu.memory_space<vmem>>, vector<1x1x32x32xbf16>
    %174 = vector.shape_cast %173 : vector<1x1x32x32xbf16> to vector<32x32xbf16>
    %c4_173 = arith.constant 4 : index
    %c0_174 = arith.constant 0 : index
    %c0_175 = arith.constant 0 : index
    %c0_176 = arith.constant 0 : index
    %175 = vector.load %arg7[%c4_173, %c0_174, %c0_175, %c0_176] : memref<11x2x128x128xbf16, #tpu.memory_space<vmem>>, vector<1x1x128x128xbf16>
    %176 = vector.shape_cast %175 : vector<1x1x128x128xbf16> to vector<128x128xbf16>
    %177 = arith.truncf %172 : vector<32x128xf32> to vector<32x128xbf16>
    %cst_177 = arith.constant dense<0.000000e+00> : vector<32x128xf32>
    %178 = tpu.matmul %174, %177, %cst_177 {dimension_numbers = #tpu.dot_dimension_numbers<[1], [0], [0], [1], [0, 0, 1, 1], [], []>} : vector<32x32xbf16>, vector<32x128xbf16>, vector<32x128xf32> -> vector<32x128xf32>
    %179 = arith.truncf %178 : vector<32x128xf32> to vector<32x128xbf16>
    %cst_178 = arith.constant dense<0.000000e+00> : vector<32x128xf32>
    %180 = tpu.matmul %179, %176, %cst_178 {dimension_numbers = #tpu.dot_dimension_numbers<[1], [0], [0], [1], [0, 0, 1, 1], [], []>} : vector<32x128xbf16>, vector<128x128xbf16>, vector<32x128xf32> -> vector<32x128xf32>
    %c4_179 = arith.constant 4 : index
    %c0_180 = arith.constant 0 : index
    %c0_181 = arith.constant 0 : index
    %c0_182 = arith.constant 0 : index
    %181 = vector.load %arg8[%c4_179, %c0_180, %c0_181, %c0_182] : memref<11x2x32x128xf32, #tpu.memory_space<vmem>>, vector<1x1x32x128xf32>
    %182 = vector.shape_cast %181 : vector<1x1x32x128xf32> to vector<32x128xf32>
    %c4_183 = arith.constant 4 : index
    %c0_184 = arith.constant 0 : index
    %c0_185 = arith.constant 0 : index
    %c0_186 = arith.constant 0 : index
    %183 = vector.load %arg9[%c4_183, %c0_184, %c0_185, %c0_186] : memref<11x2x32x128xf32, #tpu.memory_space<vmem>>, vector<1x1x32x128xf32>
    %184 = vector.shape_cast %183 : vector<1x1x32x128xf32> to vector<32x128xf32>
    %185 = arith.mulf %180, %182 : vector<32x128xf32>
    %186 = arith.addf %185, %184 : vector<32x128xf32>
    %cst_187 = arith.constant 0.000000e+00 : f32
    %187 = vector.broadcast %cst_187 : f32 to vector<32x128xf32>
    %188 = arith.cmpf oge, %186, %187 : vector<32x128xf32>
    %cst_188 = arith.constant 0.00999999977 : f32
    %189 = vector.broadcast %cst_188 : f32 to vector<32x128xf32>
    %190 = arith.mulf %189, %186 : vector<32x128xf32>
    %191 = arith.select %188, %186, %190 : vector<32x128xi1>, vector<32x128xf32>
    %c4_189 = arith.constant 4 : index
    %c1_190 = arith.constant 1 : index
    %c0_191 = arith.constant 0 : index
    %c0_192 = arith.constant 0 : index
    %192 = vector.load %arg6[%c4_189, %c1_190, %c0_191, %c0_192] : memref<11x2x32x32xbf16, #tpu.memory_space<vmem>>, vector<1x1x32x32xbf16>
    %193 = vector.shape_cast %192 : vector<1x1x32x32xbf16> to vector<32x32xbf16>
    %c4_193 = arith.constant 4 : index
    %c1_194 = arith.constant 1 : index
    %c0_195 = arith.constant 0 : index
    %c0_196 = arith.constant 0 : index
    %194 = vector.load %arg7[%c4_193, %c1_194, %c0_195, %c0_196] : memref<11x2x128x128xbf16, #tpu.memory_space<vmem>>, vector<1x1x128x128xbf16>
    %195 = vector.shape_cast %194 : vector<1x1x128x128xbf16> to vector<128x128xbf16>
    %196 = arith.truncf %191 : vector<32x128xf32> to vector<32x128xbf16>
    %cst_197 = arith.constant dense<0.000000e+00> : vector<32x128xf32>
    %197 = tpu.matmul %193, %196, %cst_197 {dimension_numbers = #tpu.dot_dimension_numbers<[1], [0], [0], [1], [0, 0, 1, 1], [], []>} : vector<32x32xbf16>, vector<32x128xbf16>, vector<32x128xf32> -> vector<32x128xf32>
    %198 = arith.truncf %197 : vector<32x128xf32> to vector<32x128xbf16>
    %cst_198 = arith.constant dense<0.000000e+00> : vector<32x128xf32>
    %199 = tpu.matmul %198, %195, %cst_198 {dimension_numbers = #tpu.dot_dimension_numbers<[1], [0], [0], [1], [0, 0, 1, 1], [], []>} : vector<32x128xbf16>, vector<128x128xbf16>, vector<32x128xf32> -> vector<32x128xf32>
    %c4_199 = arith.constant 4 : index
    %c1_200 = arith.constant 1 : index
    %c0_201 = arith.constant 0 : index
    %c0_202 = arith.constant 0 : index
    %200 = vector.load %arg8[%c4_199, %c1_200, %c0_201, %c0_202] : memref<11x2x32x128xf32, #tpu.memory_space<vmem>>, vector<1x1x32x128xf32>
    %201 = vector.shape_cast %200 : vector<1x1x32x128xf32> to vector<32x128xf32>
    %c4_203 = arith.constant 4 : index
    %c1_204 = arith.constant 1 : index
    %c0_205 = arith.constant 0 : index
    %c0_206 = arith.constant 0 : index
    %202 = vector.load %arg9[%c4_203, %c1_204, %c0_205, %c0_206] : memref<11x2x32x128xf32, #tpu.memory_space<vmem>>, vector<1x1x32x128xf32>
    %203 = vector.shape_cast %202 : vector<1x1x32x128xf32> to vector<32x128xf32>
    %204 = arith.mulf %199, %201 : vector<32x128xf32>
    %205 = arith.addf %204, %203 : vector<32x128xf32>
    %cst_207 = arith.constant 0.000000e+00 : f32
    %206 = vector.broadcast %cst_207 : f32 to vector<32x128xf32>
    %207 = arith.cmpf oge, %205, %206 : vector<32x128xf32>
    %cst_208 = arith.constant 0.00999999977 : f32
    %208 = vector.broadcast %cst_208 : f32 to vector<32x128xf32>
    %209 = arith.mulf %208, %205 : vector<32x128xf32>
    %210 = arith.select %207, %205, %209 : vector<32x128xi1>, vector<32x128xf32>
    %211 = arith.addf %210, %172 : vector<32x128xf32>
    %c5 = arith.constant 5 : index
    %c0_209 = arith.constant 0 : index
    %c0_210 = arith.constant 0 : index
    %c0_211 = arith.constant 0 : index
    %212 = vector.load %arg6[%c5, %c0_209, %c0_210, %c0_211] : memref<11x2x32x32xbf16, #tpu.memory_space<vmem>>, vector<1x1x32x32xbf16>
    %213 = vector.shape_cast %212 : vector<1x1x32x32xbf16> to vector<32x32xbf16>
    %c5_212 = arith.constant 5 : index
    %c0_213 = arith.constant 0 : index
    %c0_214 = arith.constant 0 : index
    %c0_215 = arith.constant 0 : index
    %214 = vector.load %arg7[%c5_212, %c0_213, %c0_214, %c0_215] : memref<11x2x128x128xbf16, #tpu.memory_space<vmem>>, vector<1x1x128x128xbf16>
    %215 = vector.shape_cast %214 : vector<1x1x128x128xbf16> to vector<128x128xbf16>
    %216 = arith.truncf %211 : vector<32x128xf32> to vector<32x128xbf16>
    %cst_216 = arith.constant dense<0.000000e+00> : vector<32x128xf32>
    %217 = tpu.matmul %213, %216, %cst_216 {dimension_numbers = #tpu.dot_dimension_numbers<[1], [0], [0], [1], [0, 0, 1, 1], [], []>} : vector<32x32xbf16>, vector<32x128xbf16>, vector<32x128xf32> -> vector<32x128xf32>
    %218 = arith.truncf %217 : vector<32x128xf32> to vector<32x128xbf16>
    %cst_217 = arith.constant dense<0.000000e+00> : vector<32x128xf32>
    %219 = tpu.matmul %218, %215, %cst_217 {dimension_numbers = #tpu.dot_dimension_numbers<[1], [0], [0], [1], [0, 0, 1, 1], [], []>} : vector<32x128xbf16>, vector<128x128xbf16>, vector<32x128xf32> -> vector<32x128xf32>
    %c5_218 = arith.constant 5 : index
    %c0_219 = arith.constant 0 : index
    %c0_220 = arith.constant 0 : index
    %c0_221 = arith.constant 0 : index
    %220 = vector.load %arg8[%c5_218, %c0_219, %c0_220, %c0_221] : memref<11x2x32x128xf32, #tpu.memory_space<vmem>>, vector<1x1x32x128xf32>
    %221 = vector.shape_cast %220 : vector<1x1x32x128xf32> to vector<32x128xf32>
    %c5_222 = arith.constant 5 : index
    %c0_223 = arith.constant 0 : index
    %c0_224 = arith.constant 0 : index
    %c0_225 = arith.constant 0 : index
    %222 = vector.load %arg9[%c5_222, %c0_223, %c0_224, %c0_225] : memref<11x2x32x128xf32, #tpu.memory_space<vmem>>, vector<1x1x32x128xf32>
    %223 = vector.shape_cast %222 : vector<1x1x32x128xf32> to vector<32x128xf32>
    %224 = arith.mulf %219, %221 : vector<32x128xf32>
    %225 = arith.addf %224, %223 : vector<32x128xf32>
    %cst_226 = arith.constant 0.000000e+00 : f32
    %226 = vector.broadcast %cst_226 : f32 to vector<32x128xf32>
    %227 = arith.cmpf oge, %225, %226 : vector<32x128xf32>
    %cst_227 = arith.constant 0.00999999977 : f32
    %228 = vector.broadcast %cst_227 : f32 to vector<32x128xf32>
    %229 = arith.mulf %228, %225 : vector<32x128xf32>
    %230 = arith.select %227, %225, %229 : vector<32x128xi1>, vector<32x128xf32>
    %c5_228 = arith.constant 5 : index
    %c1_229 = arith.constant 1 : index
    %c0_230 = arith.constant 0 : index
    %c0_231 = arith.constant 0 : index
    %231 = vector.load %arg6[%c5_228, %c1_229, %c0_230, %c0_231] : memref<11x2x32x32xbf16, #tpu.memory_space<vmem>>, vector<1x1x32x32xbf16>
    %232 = vector.shape_cast %231 : vector<1x1x32x32xbf16> to vector<32x32xbf16>
    %c5_232 = arith.constant 5 : index
    %c1_233 = arith.constant 1 : index
    %c0_234 = arith.constant 0 : index
    %c0_235 = arith.constant 0 : index
    %233 = vector.load %arg7[%c5_232, %c1_233, %c0_234, %c0_235] : memref<11x2x128x128xbf16, #tpu.memory_space<vmem>>, vector<1x1x128x128xbf16>
    %234 = vector.shape_cast %233 : vector<1x1x128x128xbf16> to vector<128x128xbf16>
    %235 = arith.truncf %230 : vector<32x128xf32> to vector<32x128xbf16>
    %cst_236 = arith.constant dense<0.000000e+00> : vector<32x128xf32>
    %236 = tpu.matmul %232, %235, %cst_236 {dimension_numbers = #tpu.dot_dimension_numbers<[1], [0], [0], [1], [0, 0, 1, 1], [], []>} : vector<32x32xbf16>, vector<32x128xbf16>, vector<32x128xf32> -> vector<32x128xf32>
    %237 = arith.truncf %236 : vector<32x128xf32> to vector<32x128xbf16>
    %cst_237 = arith.constant dense<0.000000e+00> : vector<32x128xf32>
    %238 = tpu.matmul %237, %234, %cst_237 {dimension_numbers = #tpu.dot_dimension_numbers<[1], [0], [0], [1], [0, 0, 1, 1], [], []>} : vector<32x128xbf16>, vector<128x128xbf16>, vector<32x128xf32> -> vector<32x128xf32>
    %c5_238 = arith.constant 5 : index
    %c1_239 = arith.constant 1 : index
    %c0_240 = arith.constant 0 : index
    %c0_241 = arith.constant 0 : index
    %239 = vector.load %arg8[%c5_238, %c1_239, %c0_240, %c0_241] : memref<11x2x32x128xf32, #tpu.memory_space<vmem>>, vector<1x1x32x128xf32>
    %240 = vector.shape_cast %239 : vector<1x1x32x128xf32> to vector<32x128xf32>
    %c5_242 = arith.constant 5 : index
    %c1_243 = arith.constant 1 : index
    %c0_244 = arith.constant 0 : index
    %c0_245 = arith.constant 0 : index
    %241 = vector.load %arg9[%c5_242, %c1_243, %c0_244, %c0_245] : memref<11x2x32x128xf32, #tpu.memory_space<vmem>>, vector<1x1x32x128xf32>
    %242 = vector.shape_cast %241 : vector<1x1x32x128xf32> to vector<32x128xf32>
    %243 = arith.mulf %238, %240 : vector<32x128xf32>
    %244 = arith.addf %243, %242 : vector<32x128xf32>
    %cst_246 = arith.constant 0.000000e+00 : f32
    %245 = vector.broadcast %cst_246 : f32 to vector<32x128xf32>
    %246 = arith.cmpf oge, %244, %245 : vector<32x128xf32>
    %cst_247 = arith.constant 0.00999999977 : f32
    %247 = vector.broadcast %cst_247 : f32 to vector<32x128xf32>
    %248 = arith.mulf %247, %244 : vector<32x128xf32>
    %249 = arith.select %246, %244, %248 : vector<32x128xi1>, vector<32x128xf32>
    %250 = arith.addf %249, %211 : vector<32x128xf32>
    %251 = arith.addf %250, %211 : vector<32x128xf32>
    %c6 = arith.constant 6 : index
    %c0_248 = arith.constant 0 : index
    %c0_249 = arith.constant 0 : index
    %c0_250 = arith.constant 0 : index
    %252 = vector.load %arg6[%c6, %c0_248, %c0_249, %c0_250] : memref<11x2x32x32xbf16, #tpu.memory_space<vmem>>, vector<1x1x32x32xbf16>
    %253 = vector.shape_cast %252 : vector<1x1x32x32xbf16> to vector<32x32xbf16>
    %c6_251 = arith.constant 6 : index
    %c0_252 = arith.constant 0 : index
    %c0_253 = arith.constant 0 : index
    %c0_254 = arith.constant 0 : index
    %254 = vector.load %arg7[%c6_251, %c0_252, %c0_253, %c0_254] : memref<11x2x128x128xbf16, #tpu.memory_space<vmem>>, vector<1x1x128x128xbf16>
    %255 = vector.shape_cast %254 : vector<1x1x128x128xbf16> to vector<128x128xbf16>
    %256 = arith.truncf %251 : vector<32x128xf32> to vector<32x128xbf16>
    %cst_255 = arith.constant dense<0.000000e+00> : vector<32x128xf32>
    %257 = tpu.matmul %253, %256, %cst_255 {dimension_numbers = #tpu.dot_dimension_numbers<[1], [0], [0], [1], [0, 0, 1, 1], [], []>} : vector<32x32xbf16>, vector<32x128xbf16>, vector<32x128xf32> -> vector<32x128xf32>
    %258 = arith.truncf %257 : vector<32x128xf32> to vector<32x128xbf16>
    %cst_256 = arith.constant dense<0.000000e+00> : vector<32x128xf32>
    %259 = tpu.matmul %258, %255, %cst_256 {dimension_numbers = #tpu.dot_dimension_numbers<[1], [0], [0], [1], [0, 0, 1, 1], [], []>} : vector<32x128xbf16>, vector<128x128xbf16>, vector<32x128xf32> -> vector<32x128xf32>
    %c6_257 = arith.constant 6 : index
    %c0_258 = arith.constant 0 : index
    %c0_259 = arith.constant 0 : index
    %c0_260 = arith.constant 0 : index
    %260 = vector.load %arg8[%c6_257, %c0_258, %c0_259, %c0_260] : memref<11x2x32x128xf32, #tpu.memory_space<vmem>>, vector<1x1x32x128xf32>
    %261 = vector.shape_cast %260 : vector<1x1x32x128xf32> to vector<32x128xf32>
    %c6_261 = arith.constant 6 : index
    %c0_262 = arith.constant 0 : index
    %c0_263 = arith.constant 0 : index
    %c0_264 = arith.constant 0 : index
    %262 = vector.load %arg9[%c6_261, %c0_262, %c0_263, %c0_264] : memref<11x2x32x128xf32, #tpu.memory_space<vmem>>, vector<1x1x32x128xf32>
    %263 = vector.shape_cast %262 : vector<1x1x32x128xf32> to vector<32x128xf32>
    %264 = arith.mulf %259, %261 : vector<32x128xf32>
    %265 = arith.addf %264, %263 : vector<32x128xf32>
    %cst_265 = arith.constant 0.000000e+00 : f32
    %266 = vector.broadcast %cst_265 : f32 to vector<32x128xf32>
    %267 = arith.cmpf oge, %265, %266 : vector<32x128xf32>
    %cst_266 = arith.constant 0.00999999977 : f32
    %268 = vector.broadcast %cst_266 : f32 to vector<32x128xf32>
    %269 = arith.mulf %268, %265 : vector<32x128xf32>
    %270 = arith.select %267, %265, %269 : vector<32x128xi1>, vector<32x128xf32>
    %c6_267 = arith.constant 6 : index
    %c1_268 = arith.constant 1 : index
    %c0_269 = arith.constant 0 : index
    %c0_270 = arith.constant 0 : index
    %271 = vector.load %arg6[%c6_267, %c1_268, %c0_269, %c0_270] : memref<11x2x32x32xbf16, #tpu.memory_space<vmem>>, vector<1x1x32x32xbf16>
    %272 = vector.shape_cast %271 : vector<1x1x32x32xbf16> to vector<32x32xbf16>
    %c6_271 = arith.constant 6 : index
    %c1_272 = arith.constant 1 : index
    %c0_273 = arith.constant 0 : index
    %c0_274 = arith.constant 0 : index
    %273 = vector.load %arg7[%c6_271, %c1_272, %c0_273, %c0_274] : memref<11x2x128x128xbf16, #tpu.memory_space<vmem>>, vector<1x1x128x128xbf16>
    %274 = vector.shape_cast %273 : vector<1x1x128x128xbf16> to vector<128x128xbf16>
    %275 = arith.truncf %270 : vector<32x128xf32> to vector<32x128xbf16>
    %cst_275 = arith.constant dense<0.000000e+00> : vector<32x128xf32>
    %276 = tpu.matmul %272, %275, %cst_275 {dimension_numbers = #tpu.dot_dimension_numbers<[1], [0], [0], [1], [0, 0, 1, 1], [], []>} : vector<32x32xbf16>, vector<32x128xbf16>, vector<32x128xf32> -> vector<32x128xf32>
    %277 = arith.truncf %276 : vector<32x128xf32> to vector<32x128xbf16>
    %cst_276 = arith.constant dense<0.000000e+00> : vector<32x128xf32>
    %278 = tpu.matmul %277, %274, %cst_276 {dimension_numbers = #tpu.dot_dimension_numbers<[1], [0], [0], [1], [0, 0, 1, 1], [], []>} : vector<32x128xbf16>, vector<128x128xbf16>, vector<32x128xf32> -> vector<32x128xf32>
    %c6_277 = arith.constant 6 : index
    %c1_278 = arith.constant 1 : index
    %c0_279 = arith.constant 0 : index
    %c0_280 = arith.constant 0 : index
    %279 = vector.load %arg8[%c6_277, %c1_278, %c0_279, %c0_280] : memref<11x2x32x128xf32, #tpu.memory_space<vmem>>, vector<1x1x32x128xf32>
    %280 = vector.shape_cast %279 : vector<1x1x32x128xf32> to vector<32x128xf32>
    %c6_281 = arith.constant 6 : index
    %c1_282 = arith.constant 1 : index
    %c0_283 = arith.constant 0 : index
    %c0_284 = arith.constant 0 : index
    %281 = vector.load %arg9[%c6_281, %c1_282, %c0_283, %c0_284] : memref<11x2x32x128xf32, #tpu.memory_space<vmem>>, vector<1x1x32x128xf32>
    %282 = vector.shape_cast %281 : vector<1x1x32x128xf32> to vector<32x128xf32>
    %283 = arith.mulf %278, %280 : vector<32x128xf32>
    %284 = arith.addf %283, %282 : vector<32x128xf32>
    %cst_285 = arith.constant 0.000000e+00 : f32
    %285 = vector.broadcast %cst_285 : f32 to vector<32x128xf32>
    %286 = arith.cmpf oge, %284, %285 : vector<32x128xf32>
    %cst_286 = arith.constant 0.00999999977 : f32
    %287 = vector.broadcast %cst_286 : f32 to vector<32x128xf32>
    %288 = arith.mulf %287, %284 : vector<32x128xf32>
    %289 = arith.select %286, %284, %288 : vector<32x128xi1>, vector<32x128xf32>
    %290 = arith.addf %289, %251 : vector<32x128xf32>
    %291 = arith.addf %290, %172 : vector<32x128xf32>
    %c7 = arith.constant 7 : index
    %c0_287 = arith.constant 0 : index
    %c0_288 = arith.constant 0 : index
    %c0_289 = arith.constant 0 : index
    %292 = vector.load %arg6[%c7, %c0_287, %c0_288, %c0_289] : memref<11x2x32x32xbf16, #tpu.memory_space<vmem>>, vector<1x1x32x32xbf16>
    %293 = vector.shape_cast %292 : vector<1x1x32x32xbf16> to vector<32x32xbf16>
    %c7_290 = arith.constant 7 : index
    %c0_291 = arith.constant 0 : index
    %c0_292 = arith.constant 0 : index
    %c0_293 = arith.constant 0 : index
    %294 = vector.load %arg7[%c7_290, %c0_291, %c0_292, %c0_293] : memref<11x2x128x128xbf16, #tpu.memory_space<vmem>>, vector<1x1x128x128xbf16>
    %295 = vector.shape_cast %294 : vector<1x1x128x128xbf16> to vector<128x128xbf16>
    %296 = arith.truncf %291 : vector<32x128xf32> to vector<32x128xbf16>
    %cst_294 = arith.constant dense<0.000000e+00> : vector<32x128xf32>
    %297 = tpu.matmul %293, %296, %cst_294 {dimension_numbers = #tpu.dot_dimension_numbers<[1], [0], [0], [1], [0, 0, 1, 1], [], []>} : vector<32x32xbf16>, vector<32x128xbf16>, vector<32x128xf32> -> vector<32x128xf32>
    %298 = arith.truncf %297 : vector<32x128xf32> to vector<32x128xbf16>
    %cst_295 = arith.constant dense<0.000000e+00> : vector<32x128xf32>
    %299 = tpu.matmul %298, %295, %cst_295 {dimension_numbers = #tpu.dot_dimension_numbers<[1], [0], [0], [1], [0, 0, 1, 1], [], []>} : vector<32x128xbf16>, vector<128x128xbf16>, vector<32x128xf32> -> vector<32x128xf32>
    %c7_296 = arith.constant 7 : index
    %c0_297 = arith.constant 0 : index
    %c0_298 = arith.constant 0 : index
    %c0_299 = arith.constant 0 : index
    %300 = vector.load %arg8[%c7_296, %c0_297, %c0_298, %c0_299] : memref<11x2x32x128xf32, #tpu.memory_space<vmem>>, vector<1x1x32x128xf32>
    %301 = vector.shape_cast %300 : vector<1x1x32x128xf32> to vector<32x128xf32>
    %c7_300 = arith.constant 7 : index
    %c0_301 = arith.constant 0 : index
    %c0_302 = arith.constant 0 : index
    %c0_303 = arith.constant 0 : index
    %302 = vector.load %arg9[%c7_300, %c0_301, %c0_302, %c0_303] : memref<11x2x32x128xf32, #tpu.memory_space<vmem>>, vector<1x1x32x128xf32>
    %303 = vector.shape_cast %302 : vector<1x1x32x128xf32> to vector<32x128xf32>
    %304 = arith.mulf %299, %301 : vector<32x128xf32>
    %305 = arith.addf %304, %303 : vector<32x128xf32>
    %cst_304 = arith.constant 0.000000e+00 : f32
    %306 = vector.broadcast %cst_304 : f32 to vector<32x128xf32>
    %307 = arith.cmpf oge, %305, %306 : vector<32x128xf32>
    %cst_305 = arith.constant 0.00999999977 : f32
    %308 = vector.broadcast %cst_305 : f32 to vector<32x128xf32>
    %309 = arith.mulf %308, %305 : vector<32x128xf32>
    %310 = arith.select %307, %305, %309 : vector<32x128xi1>, vector<32x128xf32>
    %c7_306 = arith.constant 7 : index
    %c1_307 = arith.constant 1 : index
    %c0_308 = arith.constant 0 : index
    %c0_309 = arith.constant 0 : index
    %311 = vector.load %arg6[%c7_306, %c1_307, %c0_308, %c0_309] : memref<11x2x32x32xbf16, #tpu.memory_space<vmem>>, vector<1x1x32x32xbf16>
    %312 = vector.shape_cast %311 : vector<1x1x32x32xbf16> to vector<32x32xbf16>
    %c7_310 = arith.constant 7 : index
    %c1_311 = arith.constant 1 : index
    %c0_312 = arith.constant 0 : index
    %c0_313 = arith.constant 0 : index
    %313 = vector.load %arg7[%c7_310, %c1_311, %c0_312, %c0_313] : memref<11x2x128x128xbf16, #tpu.memory_space<vmem>>, vector<1x1x128x128xbf16>
    %314 = vector.shape_cast %313 : vector<1x1x128x128xbf16> to vector<128x128xbf16>
    %315 = arith.truncf %310 : vector<32x128xf32> to vector<32x128xbf16>
    %cst_314 = arith.constant dense<0.000000e+00> : vector<32x128xf32>
    %316 = tpu.matmul %312, %315, %cst_314 {dimension_numbers = #tpu.dot_dimension_numbers<[1], [0], [0], [1], [0, 0, 1, 1], [], []>} : vector<32x32xbf16>, vector<32x128xbf16>, vector<32x128xf32> -> vector<32x128xf32>
    %317 = arith.truncf %316 : vector<32x128xf32> to vector<32x128xbf16>
    %cst_315 = arith.constant dense<0.000000e+00> : vector<32x128xf32>
    %318 = tpu.matmul %317, %314, %cst_315 {dimension_numbers = #tpu.dot_dimension_numbers<[1], [0], [0], [1], [0, 0, 1, 1], [], []>} : vector<32x128xbf16>, vector<128x128xbf16>, vector<32x128xf32> -> vector<32x128xf32>
    %c7_316 = arith.constant 7 : index
    %c1_317 = arith.constant 1 : index
    %c0_318 = arith.constant 0 : index
    %c0_319 = arith.constant 0 : index
    %319 = vector.load %arg8[%c7_316, %c1_317, %c0_318, %c0_319] : memref<11x2x32x128xf32, #tpu.memory_space<vmem>>, vector<1x1x32x128xf32>
    %320 = vector.shape_cast %319 : vector<1x1x32x128xf32> to vector<32x128xf32>
    %c7_320 = arith.constant 7 : index
    %c1_321 = arith.constant 1 : index
    %c0_322 = arith.constant 0 : index
    %c0_323 = arith.constant 0 : index
    %321 = vector.load %arg9[%c7_320, %c1_321, %c0_322, %c0_323] : memref<11x2x32x128xf32, #tpu.memory_space<vmem>>, vector<1x1x32x128xf32>
    %322 = vector.shape_cast %321 : vector<1x1x32x128xf32> to vector<32x128xf32>
    %323 = arith.mulf %318, %320 : vector<32x128xf32>
    %324 = arith.addf %323, %322 : vector<32x128xf32>
    %cst_324 = arith.constant 0.000000e+00 : f32
    %325 = vector.broadcast %cst_324 : f32 to vector<32x128xf32>
    %326 = arith.cmpf oge, %324, %325 : vector<32x128xf32>
    %cst_325 = arith.constant 0.00999999977 : f32
    %327 = vector.broadcast %cst_325 : f32 to vector<32x128xf32>
    %328 = arith.mulf %327, %324 : vector<32x128xf32>
    %329 = arith.select %326, %324, %328 : vector<32x128xi1>, vector<32x128xf32>
    %330 = arith.addf %329, %291 : vector<32x128xf32>
    %331 = arith.addf %330, %133 : vector<32x128xf32>
    %c8 = arith.constant 8 : index
    %c0_326 = arith.constant 0 : index
    %c0_327 = arith.constant 0 : index
    %c0_328 = arith.constant 0 : index
    %332 = vector.load %arg6[%c8, %c0_326, %c0_327, %c0_328] : memref<11x2x32x32xbf16, #tpu.memory_space<vmem>>, vector<1x1x32x32xbf16>
    %333 = vector.shape_cast %332 : vector<1x1x32x32xbf16> to vector<32x32xbf16>
    %c8_329 = arith.constant 8 : index
    %c0_330 = arith.constant 0 : index
    %c0_331 = arith.constant 0 : index
    %c0_332 = arith.constant 0 : index
    %334 = vector.load %arg7[%c8_329, %c0_330, %c0_331, %c0_332] : memref<11x2x128x128xbf16, #tpu.memory_space<vmem>>, vector<1x1x128x128xbf16>
    %335 = vector.shape_cast %334 : vector<1x1x128x128xbf16> to vector<128x128xbf16>
    %336 = arith.truncf %331 : vector<32x128xf32> to vector<32x128xbf16>
    %cst_333 = arith.constant dense<0.000000e+00> : vector<32x128xf32>
    %337 = tpu.matmul %333, %336, %cst_333 {dimension_numbers = #tpu.dot_dimension_numbers<[1], [0], [0], [1], [0, 0, 1, 1], [], []>} : vector<32x32xbf16>, vector<32x128xbf16>, vector<32x128xf32> -> vector<32x128xf32>
    %338 = arith.truncf %337 : vector<32x128xf32> to vector<32x128xbf16>
    %cst_334 = arith.constant dense<0.000000e+00> : vector<32x128xf32>
    %339 = tpu.matmul %338, %335, %cst_334 {dimension_numbers = #tpu.dot_dimension_numbers<[1], [0], [0], [1], [0, 0, 1, 1], [], []>} : vector<32x128xbf16>, vector<128x128xbf16>, vector<32x128xf32> -> vector<32x128xf32>
    %c8_335 = arith.constant 8 : index
    %c0_336 = arith.constant 0 : index
    %c0_337 = arith.constant 0 : index
    %c0_338 = arith.constant 0 : index
    %340 = vector.load %arg8[%c8_335, %c0_336, %c0_337, %c0_338] : memref<11x2x32x128xf32, #tpu.memory_space<vmem>>, vector<1x1x32x128xf32>
    %341 = vector.shape_cast %340 : vector<1x1x32x128xf32> to vector<32x128xf32>
    %c8_339 = arith.constant 8 : index
    %c0_340 = arith.constant 0 : index
    %c0_341 = arith.constant 0 : index
    %c0_342 = arith.constant 0 : index
    %342 = vector.load %arg9[%c8_339, %c0_340, %c0_341, %c0_342] : memref<11x2x32x128xf32, #tpu.memory_space<vmem>>, vector<1x1x32x128xf32>
    %343 = vector.shape_cast %342 : vector<1x1x32x128xf32> to vector<32x128xf32>
    %344 = arith.mulf %339, %341 : vector<32x128xf32>
    %345 = arith.addf %344, %343 : vector<32x128xf32>
    %cst_343 = arith.constant 0.000000e+00 : f32
    %346 = vector.broadcast %cst_343 : f32 to vector<32x128xf32>
    %347 = arith.cmpf oge, %345, %346 : vector<32x128xf32>
    %cst_344 = arith.constant 0.00999999977 : f32
    %348 = vector.broadcast %cst_344 : f32 to vector<32x128xf32>
    %349 = arith.mulf %348, %345 : vector<32x128xf32>
    %350 = arith.select %347, %345, %349 : vector<32x128xi1>, vector<32x128xf32>
    %c8_345 = arith.constant 8 : index
    %c1_346 = arith.constant 1 : index
    %c0_347 = arith.constant 0 : index
    %c0_348 = arith.constant 0 : index
    %351 = vector.load %arg6[%c8_345, %c1_346, %c0_347, %c0_348] : memref<11x2x32x32xbf16, #tpu.memory_space<vmem>>, vector<1x1x32x32xbf16>
    %352 = vector.shape_cast %351 : vector<1x1x32x32xbf16> to vector<32x32xbf16>
    %c8_349 = arith.constant 8 : index
    %c1_350 = arith.constant 1 : index
    %c0_351 = arith.constant 0 : index
    %c0_352 = arith.constant 0 : index
    %353 = vector.load %arg7[%c8_349, %c1_350, %c0_351, %c0_352] : memref<11x2x128x128xbf16, #tpu.memory_space<vmem>>, vector<1x1x128x128xbf16>
    %354 = vector.shape_cast %353 : vector<1x1x128x128xbf16> to vector<128x128xbf16>
    %355 = arith.truncf %350 : vector<32x128xf32> to vector<32x128xbf16>
    %cst_353 = arith.constant dense<0.000000e+00> : vector<32x128xf32>
    %356 = tpu.matmul %352, %355, %cst_353 {dimension_numbers = #tpu.dot_dimension_numbers<[1], [0], [0], [1], [0, 0, 1, 1], [], []>} : vector<32x32xbf16>, vector<32x128xbf16>, vector<32x128xf32> -> vector<32x128xf32>
    %357 = arith.truncf %356 : vector<32x128xf32> to vector<32x128xbf16>
    %cst_354 = arith.constant dense<0.000000e+00> : vector<32x128xf32>
    %358 = tpu.matmul %357, %354, %cst_354 {dimension_numbers = #tpu.dot_dimension_numbers<[1], [0], [0], [1], [0, 0, 1, 1], [], []>} : vector<32x128xbf16>, vector<128x128xbf16>, vector<32x128xf32> -> vector<32x128xf32>
    %c8_355 = arith.constant 8 : index
    %c1_356 = arith.constant 1 : index
    %c0_357 = arith.constant 0 : index
    %c0_358 = arith.constant 0 : index
    %359 = vector.load %arg8[%c8_355, %c1_356, %c0_357, %c0_358] : memref<11x2x32x128xf32, #tpu.memory_space<vmem>>, vector<1x1x32x128xf32>
    %360 = vector.shape_cast %359 : vector<1x1x32x128xf32> to vector<32x128xf32>
    %c8_359 = arith.constant 8 : index
    %c1_360 = arith.constant 1 : index
    %c0_361 = arith.constant 0 : index
    %c0_362 = arith.constant 0 : index
    %361 = vector.load %arg9[%c8_359, %c1_360, %c0_361, %c0_362] : memref<11x2x32x128xf32, #tpu.memory_space<vmem>>, vector<1x1x32x128xf32>
    %362 = vector.shape_cast %361 : vector<1x1x32x128xf32> to vector<32x128xf32>
    %363 = arith.mulf %358, %360 : vector<32x128xf32>
    %364 = arith.addf %363, %362 : vector<32x128xf32>
    %cst_363 = arith.constant 0.000000e+00 : f32
    %365 = vector.broadcast %cst_363 : f32 to vector<32x128xf32>
    %366 = arith.cmpf oge, %364, %365 : vector<32x128xf32>
    %cst_364 = arith.constant 0.00999999977 : f32
    %367 = vector.broadcast %cst_364 : f32 to vector<32x128xf32>
    %368 = arith.mulf %367, %364 : vector<32x128xf32>
    %369 = arith.select %366, %364, %368 : vector<32x128xi1>, vector<32x128xf32>
    %370 = arith.addf %369, %331 : vector<32x128xf32>
    %371 = arith.addf %370, %94 : vector<32x128xf32>
    %c9 = arith.constant 9 : index
    %c0_365 = arith.constant 0 : index
    %c0_366 = arith.constant 0 : index
    %c0_367 = arith.constant 0 : index
    %372 = vector.load %arg6[%c9, %c0_365, %c0_366, %c0_367] : memref<11x2x32x32xbf16, #tpu.memory_space<vmem>>, vector<1x1x32x32xbf16>
    %373 = vector.shape_cast %372 : vector<1x1x32x32xbf16> to vector<32x32xbf16>
    %c9_368 = arith.constant 9 : index
    %c0_369 = arith.constant 0 : index
    %c0_370 = arith.constant 0 : index
    %c0_371 = arith.constant 0 : index
    %374 = vector.load %arg7[%c9_368, %c0_369, %c0_370, %c0_371] : memref<11x2x128x128xbf16, #tpu.memory_space<vmem>>, vector<1x1x128x128xbf16>
    %375 = vector.shape_cast %374 : vector<1x1x128x128xbf16> to vector<128x128xbf16>
    %376 = arith.truncf %371 : vector<32x128xf32> to vector<32x128xbf16>
    %cst_372 = arith.constant dense<0.000000e+00> : vector<32x128xf32>
    %377 = tpu.matmul %373, %376, %cst_372 {dimension_numbers = #tpu.dot_dimension_numbers<[1], [0], [0], [1], [0, 0, 1, 1], [], []>} : vector<32x32xbf16>, vector<32x128xbf16>, vector<32x128xf32> -> vector<32x128xf32>
    %378 = arith.truncf %377 : vector<32x128xf32> to vector<32x128xbf16>
    %cst_373 = arith.constant dense<0.000000e+00> : vector<32x128xf32>
    %379 = tpu.matmul %378, %375, %cst_373 {dimension_numbers = #tpu.dot_dimension_numbers<[1], [0], [0], [1], [0, 0, 1, 1], [], []>} : vector<32x128xbf16>, vector<128x128xbf16>, vector<32x128xf32> -> vector<32x128xf32>
    %c9_374 = arith.constant 9 : index
    %c0_375 = arith.constant 0 : index
    %c0_376 = arith.constant 0 : index
    %c0_377 = arith.constant 0 : index
    %380 = vector.load %arg8[%c9_374, %c0_375, %c0_376, %c0_377] : memref<11x2x32x128xf32, #tpu.memory_space<vmem>>, vector<1x1x32x128xf32>
    %381 = vector.shape_cast %380 : vector<1x1x32x128xf32> to vector<32x128xf32>
    %c9_378 = arith.constant 9 : index
    %c0_379 = arith.constant 0 : index
    %c0_380 = arith.constant 0 : index
    %c0_381 = arith.constant 0 : index
    %382 = vector.load %arg9[%c9_378, %c0_379, %c0_380, %c0_381] : memref<11x2x32x128xf32, #tpu.memory_space<vmem>>, vector<1x1x32x128xf32>
    %383 = vector.shape_cast %382 : vector<1x1x32x128xf32> to vector<32x128xf32>
    %384 = arith.mulf %379, %381 : vector<32x128xf32>
    %385 = arith.addf %384, %383 : vector<32x128xf32>
    %cst_382 = arith.constant 0.000000e+00 : f32
    %386 = vector.broadcast %cst_382 : f32 to vector<32x128xf32>
    %387 = arith.cmpf oge, %385, %386 : vector<32x128xf32>
    %cst_383 = arith.constant 0.00999999977 : f32
    %388 = vector.broadcast %cst_383 : f32 to vector<32x128xf32>
    %389 = arith.mulf %388, %385 : vector<32x128xf32>
    %390 = arith.select %387, %385, %389 : vector<32x128xi1>, vector<32x128xf32>
    %c9_384 = arith.constant 9 : index
    %c1_385 = arith.constant 1 : index
    %c0_386 = arith.constant 0 : index
    %c0_387 = arith.constant 0 : index
    %391 = vector.load %arg6[%c9_384, %c1_385, %c0_386, %c0_387] : memref<11x2x32x32xbf16, #tpu.memory_space<vmem>>, vector<1x1x32x32xbf16>
    %392 = vector.shape_cast %391 : vector<1x1x32x32xbf16> to vector<32x32xbf16>
    %c9_388 = arith.constant 9 : index
    %c1_389 = arith.constant 1 : index
    %c0_390 = arith.constant 0 : index
    %c0_391 = arith.constant 0 : index
    %393 = vector.load %arg7[%c9_388, %c1_389, %c0_390, %c0_391] : memref<11x2x128x128xbf16, #tpu.memory_space<vmem>>, vector<1x1x128x128xbf16>
    %394 = vector.shape_cast %393 : vector<1x1x128x128xbf16> to vector<128x128xbf16>
    %395 = arith.truncf %390 : vector<32x128xf32> to vector<32x128xbf16>
    %cst_392 = arith.constant dense<0.000000e+00> : vector<32x128xf32>
    %396 = tpu.matmul %392, %395, %cst_392 {dimension_numbers = #tpu.dot_dimension_numbers<[1], [0], [0], [1], [0, 0, 1, 1], [], []>} : vector<32x32xbf16>, vector<32x128xbf16>, vector<32x128xf32> -> vector<32x128xf32>
    %397 = arith.truncf %396 : vector<32x128xf32> to vector<32x128xbf16>
    %cst_393 = arith.constant dense<0.000000e+00> : vector<32x128xf32>
    %398 = tpu.matmul %397, %394, %cst_393 {dimension_numbers = #tpu.dot_dimension_numbers<[1], [0], [0], [1], [0, 0, 1, 1], [], []>} : vector<32x128xbf16>, vector<128x128xbf16>, vector<32x128xf32> -> vector<32x128xf32>
    %c9_394 = arith.constant 9 : index
    %c1_395 = arith.constant 1 : index
    %c0_396 = arith.constant 0 : index
    %c0_397 = arith.constant 0 : index
    %399 = vector.load %arg8[%c9_394, %c1_395, %c0_396, %c0_397] : memref<11x2x32x128xf32, #tpu.memory_space<vmem>>, vector<1x1x32x128xf32>
    %400 = vector.shape_cast %399 : vector<1x1x32x128xf32> to vector<32x128xf32>
    %c9_398 = arith.constant 9 : index
    %c1_399 = arith.constant 1 : index
    %c0_400 = arith.constant 0 : index
    %c0_401 = arith.constant 0 : index
    %401 = vector.load %arg9[%c9_398, %c1_399, %c0_400, %c0_401] : memref<11x2x32x128xf32, #tpu.memory_space<vmem>>, vector<1x1x32x128xf32>
    %402 = vector.shape_cast %401 : vector<1x1x32x128xf32> to vector<32x128xf32>
    %403 = arith.mulf %398, %400 : vector<32x128xf32>
    %404 = arith.addf %403, %402 : vector<32x128xf32>
    %cst_402 = arith.constant 0.000000e+00 : f32
    %405 = vector.broadcast %cst_402 : f32 to vector<32x128xf32>
    %406 = arith.cmpf oge, %404, %405 : vector<32x128xf32>
    %cst_403 = arith.constant 0.00999999977 : f32
    %407 = vector.broadcast %cst_403 : f32 to vector<32x128xf32>
    %408 = arith.mulf %407, %404 : vector<32x128xf32>
    %409 = arith.select %406, %404, %408 : vector<32x128xi1>, vector<32x128xf32>
    %410 = arith.addf %409, %371 : vector<32x128xf32>
    %411 = arith.addf %410, %55 : vector<32x128xf32>
    %c10 = arith.constant 10 : index
    %c0_404 = arith.constant 0 : index
    %c0_405 = arith.constant 0 : index
    %c0_406 = arith.constant 0 : index
    %412 = vector.load %arg6[%c10, %c0_404, %c0_405, %c0_406] : memref<11x2x32x32xbf16, #tpu.memory_space<vmem>>, vector<1x1x32x32xbf16>
    %413 = vector.shape_cast %412 : vector<1x1x32x32xbf16> to vector<32x32xbf16>
    %c10_407 = arith.constant 10 : index
    %c0_408 = arith.constant 0 : index
    %c0_409 = arith.constant 0 : index
    %c0_410 = arith.constant 0 : index
    %414 = vector.load %arg7[%c10_407, %c0_408, %c0_409, %c0_410] : memref<11x2x128x128xbf16, #tpu.memory_space<vmem>>, vector<1x1x128x128xbf16>
    %415 = vector.shape_cast %414 : vector<1x1x128x128xbf16> to vector<128x128xbf16>
    %416 = arith.truncf %411 : vector<32x128xf32> to vector<32x128xbf16>
    %cst_411 = arith.constant dense<0.000000e+00> : vector<32x128xf32>
    %417 = tpu.matmul %413, %416, %cst_411 {dimension_numbers = #tpu.dot_dimension_numbers<[1], [0], [0], [1], [0, 0, 1, 1], [], []>} : vector<32x32xbf16>, vector<32x128xbf16>, vector<32x128xf32> -> vector<32x128xf32>
    %418 = arith.truncf %417 : vector<32x128xf32> to vector<32x128xbf16>
    %cst_412 = arith.constant dense<0.000000e+00> : vector<32x128xf32>
    %419 = tpu.matmul %418, %415, %cst_412 {dimension_numbers = #tpu.dot_dimension_numbers<[1], [0], [0], [1], [0, 0, 1, 1], [], []>} : vector<32x128xbf16>, vector<128x128xbf16>, vector<32x128xf32> -> vector<32x128xf32>
    %c10_413 = arith.constant 10 : index
    %c0_414 = arith.constant 0 : index
    %c0_415 = arith.constant 0 : index
    %c0_416 = arith.constant 0 : index
    %420 = vector.load %arg8[%c10_413, %c0_414, %c0_415, %c0_416] : memref<11x2x32x128xf32, #tpu.memory_space<vmem>>, vector<1x1x32x128xf32>
    %421 = vector.shape_cast %420 : vector<1x1x32x128xf32> to vector<32x128xf32>
    %c10_417 = arith.constant 10 : index
    %c0_418 = arith.constant 0 : index
    %c0_419 = arith.constant 0 : index
    %c0_420 = arith.constant 0 : index
    %422 = vector.load %arg9[%c10_417, %c0_418, %c0_419, %c0_420] : memref<11x2x32x128xf32, #tpu.memory_space<vmem>>, vector<1x1x32x128xf32>
    %423 = vector.shape_cast %422 : vector<1x1x32x128xf32> to vector<32x128xf32>
    %424 = arith.mulf %419, %421 : vector<32x128xf32>
    %425 = arith.addf %424, %423 : vector<32x128xf32>
    %cst_421 = arith.constant 0.000000e+00 : f32
    %426 = vector.broadcast %cst_421 : f32 to vector<32x128xf32>
    %427 = arith.cmpf oge, %425, %426 : vector<32x128xf32>
    %cst_422 = arith.constant 0.00999999977 : f32
    %428 = vector.broadcast %cst_422 : f32 to vector<32x128xf32>
    %429 = arith.mulf %428, %425 : vector<32x128xf32>
    %430 = arith.select %427, %425, %429 : vector<32x128xi1>, vector<32x128xf32>
    %c10_423 = arith.constant 10 : index
    %c1_424 = arith.constant 1 : index
    %c0_425 = arith.constant 0 : index
    %c0_426 = arith.constant 0 : index
    %431 = vector.load %arg6[%c10_423, %c1_424, %c0_425, %c0_426] : memref<11x2x32x32xbf16, #tpu.memory_space<vmem>>, vector<1x1x32x32xbf16>
    %432 = vector.shape_cast %431 : vector<1x1x32x32xbf16> to vector<32x32xbf16>
    %c10_427 = arith.constant 10 : index
    %c1_428 = arith.constant 1 : index
    %c0_429 = arith.constant 0 : index
    %c0_430 = arith.constant 0 : index
    %433 = vector.load %arg7[%c10_427, %c1_428, %c0_429, %c0_430] : memref<11x2x128x128xbf16, #tpu.memory_space<vmem>>, vector<1x1x128x128xbf16>
    %434 = vector.shape_cast %433 : vector<1x1x128x128xbf16> to vector<128x128xbf16>
    %435 = arith.truncf %430 : vector<32x128xf32> to vector<32x128xbf16>
    %cst_431 = arith.constant dense<0.000000e+00> : vector<32x128xf32>
    %436 = tpu.matmul %432, %435, %cst_431 {dimension_numbers = #tpu.dot_dimension_numbers<[1], [0], [0], [1], [0, 0, 1, 1], [], []>} : vector<32x32xbf16>, vector<32x128xbf16>, vector<32x128xf32> -> vector<32x128xf32>
    %437 = arith.truncf %436 : vector<32x128xf32> to vector<32x128xbf16>
    %cst_432 = arith.constant dense<0.000000e+00> : vector<32x128xf32>
    %438 = tpu.matmul %437, %434, %cst_432 {dimension_numbers = #tpu.dot_dimension_numbers<[1], [0], [0], [1], [0, 0, 1, 1], [], []>} : vector<32x128xbf16>, vector<128x128xbf16>, vector<32x128xf32> -> vector<32x128xf32>
    %c10_433 = arith.constant 10 : index
    %c1_434 = arith.constant 1 : index
    %c0_435 = arith.constant 0 : index
    %c0_436 = arith.constant 0 : index
    %439 = vector.load %arg8[%c10_433, %c1_434, %c0_435, %c0_436] : memref<11x2x32x128xf32, #tpu.memory_space<vmem>>, vector<1x1x32x128xf32>
    %440 = vector.shape_cast %439 : vector<1x1x32x128xf32> to vector<32x128xf32>
    %c10_437 = arith.constant 10 : index
    %c1_438 = arith.constant 1 : index
    %c0_439 = arith.constant 0 : index
    %c0_440 = arith.constant 0 : index
    %441 = vector.load %arg9[%c10_437, %c1_438, %c0_439, %c0_440] : memref<11x2x32x128xf32, #tpu.memory_space<vmem>>, vector<1x1x32x128xf32>
    %442 = vector.shape_cast %441 : vector<1x1x32x128xf32> to vector<32x128xf32>
    %443 = arith.mulf %438, %440 : vector<32x128xf32>
    %444 = arith.addf %443, %442 : vector<32x128xf32>
    %cst_441 = arith.constant 0.000000e+00 : f32
    %445 = vector.broadcast %cst_441 : f32 to vector<32x128xf32>
    %446 = arith.cmpf oge, %444, %445 : vector<32x128xf32>
    %cst_442 = arith.constant 0.00999999977 : f32
    %447 = vector.broadcast %cst_442 : f32 to vector<32x128xf32>
    %448 = arith.mulf %447, %444 : vector<32x128xf32>
    %449 = arith.select %446, %444, %448 : vector<32x128xi1>, vector<32x128xf32>
    %450 = arith.addf %449, %411 : vector<32x128xf32>
    %451 = arith.addf %450, %16 : vector<32x128xf32>
    %c0_443 = arith.constant 0 : index
    %c0_444 = arith.constant 0 : index
    %452 = vector.load %arg10[%c0_443, %c0_444] : memref<16x32xbf16, #tpu.memory_space<vmem>>, vector<16x32xbf16>
    %c0_445 = arith.constant 0 : index
    %c0_446 = arith.constant 0 : index
    %453 = vector.load %arg11[%c0_445, %c0_446] : memref<128x128xbf16, #tpu.memory_space<vmem>>, vector<128x128xbf16>
    %454 = arith.truncf %451 : vector<32x128xf32> to vector<32x128xbf16>
    %cst_447 = arith.constant dense<0.000000e+00> : vector<16x128xf32>
    %455 = tpu.matmul %452, %454, %cst_447 {dimension_numbers = #tpu.dot_dimension_numbers<[1], [0], [0], [1], [0, 0, 1, 1], [], []>} : vector<16x32xbf16>, vector<32x128xbf16>, vector<16x128xf32> -> vector<16x128xf32>
    %456 = arith.truncf %455 : vector<16x128xf32> to vector<16x128xbf16>
    %cst_448 = arith.constant dense<0.000000e+00> : vector<16x128xf32>
    %457 = tpu.matmul %456, %453, %cst_448 {dimension_numbers = #tpu.dot_dimension_numbers<[1], [0], [0], [1], [0, 0, 1, 1], [], []>} : vector<16x128xbf16>, vector<128x128xbf16>, vector<16x128xf32> -> vector<16x128xf32>
    %c0_449 = arith.constant 0 : index
    %c0_450 = arith.constant 0 : index
    %458 = vector.load %arg12[%c0_449, %c0_450] : memref<16x128xf32, #tpu.memory_space<vmem>>, vector<16x128xf32>
    %459 = arith.addf %457, %458 : vector<16x128xf32>
    %460 = arith.addf %459, %1 : vector<16x128xf32>
    %c0_451 = arith.constant 0 : index
    %c0_452 = arith.constant 0 : index
    %c0_453 = arith.constant 0 : index
    %461 = vector.load %arg13[%c0_451, %c0_452, %c0_453] : memref<1x16x128xf32, #tpu.memory_space<vmem>>, vector<1x16x128xf32>
    %462 = vector.shape_cast %461 : vector<1x16x128xf32> to vector<16x128xf32>
    %463 = vector.shape_cast %460 : vector<16x128xf32> to vector<1x16x128xf32>
    tpu.vector_store %arg13[%c0_451, %c0_452, %c0_453], %463 {strides = array<i32>} : memref<1x16x128xf32, #tpu.memory_space<vmem>>, vector<1x16x128xf32>,
    return
  }
  func.func @transform_0(%arg0: i32) -> (i32, i32, i32) {
    %c0_i32 = arith.constant 0 : i32
    %c0_i32_0 = arith.constant 0 : i32
    %c0_i32_1 = arith.constant 0 : i32
    return %arg0, %c0_i32, %c0_i32_0 : i32, i32, i32
  }
  func.func @transform_1(%arg0: i32) -> (i32, i32) {
    %c0_i32 = arith.constant 0 : i32
    %c0_i32_0 = arith.constant 0 : i32
    %c0_i32_1 = arith.constant 0 : i32
    return %c0_i32, %c0_i32_0 : i32, i32
  }
  func.func @transform_2(%arg0: i32) -> (i32, i32) {
    %c0_i32 = arith.constant 0 : i32
    %c0_i32_0 = arith.constant 0 : i32
    %c0_i32_1 = arith.constant 0 : i32
    return %c0_i32, %c0_i32_0 : i32, i32
  }
  func.func @transform_3(%arg0: i32) -> (i32, i32) {
    %c0_i32 = arith.constant 0 : i32
    %c0_i32_0 = arith.constant 0 : i32
    %c0_i32_1 = arith.constant 0 : i32
    return %c0_i32, %c0_i32_0 : i32, i32
  }
  func.func @transform_4(%arg0: i32) -> (i32, i32) {
    %c0_i32 = arith.constant 0 : i32
    %c0_i32_0 = arith.constant 0 : i32
    %c0_i32_1 = arith.constant 0 : i32
    return %c0_i32, %c0_i32_0 : i32, i32
  }
  func.func @transform_5(%arg0: i32) -> (i32, i32, i32, i32) {
    %c0_i32 = arith.constant 0 : i32
    %c0_i32_0 = arith.constant 0 : i32
    %c0_i32_1 = arith.constant 0 : i32
    %c0_i32_2 = arith.constant 0 : i32
    %c0_i32_3 = arith.constant 0 : i32
    return %c0_i32, %c0_i32_0, %c0_i32_1, %c0_i32_2 : i32, i32, i32, i32
  }
  func.func @transform_6(%arg0: i32) -> (i32, i32, i32, i32) {
    %c0_i32 = arith.constant 0 : i32
    %c0_i32_0 = arith.constant 0 : i32
    %c0_i32_1 = arith.constant 0 : i32
    %c0_i32_2 = arith.constant 0 : i32
    %c0_i32_3 = arith.constant 0 : i32
    return %c0_i32, %c0_i32_0, %c0_i32_1, %c0_i32_2 : i32, i32, i32, i32
  }
  func.func @transform_7(%arg0: i32) -> (i32, i32, i32, i32) {
    %c0_i32 = arith.constant 0 : i32
    %c0_i32_0 = arith.constant 0 : i32
    %c0_i32_1 = arith.constant 0 : i32
    %c0_i32_2 = arith.constant 0 : i32
    %c0_i32_3 = arith.constant 0 : i32
    return %c0_i32, %c0_i32_0, %c0_i32_1, %c0_i32_2 : i32, i32, i32, i32
  }
  func.func @transform_8(%arg0: i32) -> (i32, i32, i32, i32) {
    %c0_i32 = arith.constant 0 : i32
    %c0_i32_0 = arith.constant 0 : i32
    %c0_i32_1 = arith.constant 0 : i32
    %c0_i32_2 = arith.constant 0 : i32
    %c0_i32_3 = arith.constant 0 : i32
    return %c0_i32, %c0_i32_0, %c0_i32_1, %c0_i32_2 : i32, i32, i32, i32
  }
  func.func @transform_9(%arg0: i32) -> (i32, i32) {
    %c0_i32 = arith.constant 0 : i32
    %c0_i32_0 = arith.constant 0 : i32
    %c0_i32_1 = arith.constant 0 : i32
    return %c0_i32, %c0_i32_0 : i32, i32
  }
  func.func @transform_10(%arg0: i32) -> (i32, i32) {
    %c0_i32 = arith.constant 0 : i32
    %c0_i32_0 = arith.constant 0 : i32
    %c0_i32_1 = arith.constant 0 : i32
    return %c0_i32, %c0_i32_0 : i32, i32
  }
  func.func @transform_11(%arg0: i32) -> (i32, i32) {
    %c0_i32 = arith.constant 0 : i32
    %c0_i32_0 = arith.constant 0 : i32
    %c0_i32_1 = arith.constant 0 : i32
    return %c0_i32, %c0_i32_0 : i32, i32
  }
  func.func @transform_12(%arg0: i32) -> (i32, i32, i32) {
    %c0_i32 = arith.constant 0 : i32
    %c0_i32_0 = arith.constant 0 : i32
    %c0_i32_1 = arith.constant 0 : i32
    return %arg0, %c0_i32, %c0_i32_0 : i32, i32, i32
  }
}

</mosaic_0001>

<bundles_post_ra>
// kernel: tpu_custom_call.1
= control target key start
LH: loop header
LB: loop body
LE: loop exit
PB: predicated region body
PF: predicated region fallthrough
CT: control target
= control target key end

     0   :  { %s6868_s0 = inlined_call_operand.hbm [shape: f32[2,16,128], index: 0, kind: input, shape index: {}]   ;;  %s6869_s1 = inlined_call_operand.vmem [shape: bf16[32,16], index: 1, kind: input, shape index: {}]   ;;  %s6870_s2 = inlined_call_operand.hbm [shape: bf16[128,128], index: 2, kind: input, shape index: {}]   ;;  %s6871_s3 = inlined_call_operand.hbm [shape: f32[32,128], index: 3, kind: input, shape index: {}]   ;;  %s6872_s4 = inlined_call_operand.hbm [shape: f32[32,128], index: 4, kind: input, shape index: {}]   ;;  %s6873_s5 = inlined_call_operand.hbm [shape: bf16[11,2,32,32], index: 5, kind: input, shape index: {}]   ;;  %s6874_s6 = inlined_call_operand.hbm [shape: bf16[11,2,128,128], index: 6, kind: input, shape index: {}]   ;;  %s6875_s7 = inlined_call_operand.hbm [shape: f32[11,2,32,128], index: 7, kind: input, shape index: {}]   ;;  %s6876_s8 = inlined_call_operand.hbm [shape: f32[11,2,32,128], index: 8, kind: input, shape index: {}]   ;;  %s6877_s9 = inlined_call_operand.vmem [shape: bf16[16,32], index: 9, kind: input, shape index: {}]   ;;  %s6878_s10 = inlined_call_operand.hbm [shape: bf16[128,128], index: 10, kind: input, shape index: {}]   ;;  %s6879_s11 = inlined_call_operand.vmem [shape: f32[16,128], index: 11, kind: input, shape index: {}]   ;;  %s6880_s12 = inlined_call_operand.hbm [shape: f32[2,16,128], index: 12, kind: output, shape index: {}]  }
   0x1   :  { %6885 = sst [smem:[#allocation24_spill]] %s6870_s2 }
   0x2   :  { %6886 = sst [smem:[#allocation25_spill]] %s6871_s3 }
   0x3   :  { %6887 = sst [smem:[#allocation26_spill]] %s6872_s4 }
   0x4   :  { %6888 = sst [smem:[#allocation27_spill]] %s6873_s5 }
   0x5   :  { %6889 = sst [smem:[#allocation28_spill]] %s6874_s6 }
   0x6   :  { %6890 = sst [smem:[#allocation29_spill]] %s6879_s11 }
   0x7   :  { %6891 = sst [smem:[#allocation30_spill]] %s6880_s12 }
   0x8   :  { %17 = vsyncpa [#allocation3], 0 }
   0x9   :  { %19 = vsyncpa [#allocation3 + $0x1], 0 }
   0xa   :  { %20 = vsyncpa [#allocation6], 0 }
   0xb   :  { %21 = vsyncpa [#allocation9], 0 }
   0xc   :  { %22 = vsyncpa [#allocation12], 0 }
   0xd   :  { %23 = vsyncpa [#allocation15], 0 }
   0xe   :  { %24 = vsyncpa [#allocation4], 0 }
   0xf   :  { %26 = vsyncpa [#allocation4 + $0x1], 0  ;;  %s6376_s21 = smov 0   ;;  %s6378_s22 = smov 0  }
  0x10   :  { %s6380_s23 = smov 0   ;;  %s6382_s24 = smov 0  }
  0x11 LB: > { %s6892_s2 = sld [smem:[#allocation24_spill]]  ;;  %s6400_s28 = sadd.s32 4294967295, %s6295_s24   ;;  %s6295_s24 = sphi %s6382_s24, %s6912_s24   ;;  %s6291_s23 = sphi %s6380_s23, %s6911_s23   ;;  %s6287_s22 = sphi %s6378_s22, %s6910_s22   ;;  %s6283_s21 = sphi %s6376_s21, %s6909_s21  }
  0x12   : > { %p4535_p0 = scmp.ge.s32.totalorder %s6295_s24, 1  ;;  %p53_p1 = scmp.eq.s32.totalorder %s6400_s28, 0 }
  0x13   : > { %p320_p2 = scmp.lt.s32.totalorder %s6295_s24, 3  ;;  %s6297_s30 = smov [#allocation5]  }
  0x14   : > { %s336_s13 = sshll.u32 %s6297_s30, 4  ;;  %s6895_s4 = sld [smem:[#allocation26_spill]]  ;;  %s337_s13 = int_to_ptr.vmem [resolvable:$true] %s336_s13 }
  0x15   : > { %p6405_p3 = pnand %p4535_p0, %p320_p2  ;;  %s6298_s18 = smov 64  }
  0x16   : > { %s6299_s19 = smov 4   ;;  %s6300_s20 = smov [#allocation8]  }
  0x17   : > { %s334_s27 = sshll.u32 %s6892_s2, 4  ;;  %p5844_p4 = pneg %p6405_p3  ;;  %s335_s27 = int_to_ptr.hbm [resolvable:$true] %s334_s27 }
  0x18   : > { %s364_s25 = sshll.u32 %s6300_s20, 4  ;;  %s6896_s6 = sld [smem:[#allocation28_spill]]  ;;  %s365_s25 = int_to_ptr.vmem [resolvable:$true] %s364_s25 }
  0x19   : > { %p6414_p6 = pnand %p5844_p4, %p53_p1  ;;  %s6883_s15 = smov 128  }
  0x1a   : > { %s362_s17 = sshll.u32 %s6895_s4, 4  ;;  %s6884_s16 = smov 8   ;;  %s363_s17 = int_to_ptr.hbm [resolvable:$true] %s362_s17 }
  0x1b   : > { %5847 = dma.hbm_to_vmem [thread:$0]  (!%p6414_p6), %s335_s27, 1024, %s337_s13, [#allocation6], %s6298_s18, %s6298_s18, %s6299_s19  }
  0x1c   : > { %5853 = dma.hbm_to_vmem [thread:$0]  (!%p6414_p6), %s363_s17, 512, %s365_s25, [#allocation9], %s6883_s15, %s6883_s15, %s6884_s16  }
  0x1d   : > { %s418_s27 = sshll.u32 %s6876_s8, 4  ;;  %s6303_s13 = smov [#allocation11]   ;;  %s419_s27 = int_to_ptr.hbm [resolvable:$true] %s418_s27 }
  0x1e   : > { %s390_s2 = sshll.u32 %s6896_s6, 4  ;;  %s392_s20 = sshll.u32 %s6303_s13, 4  ;;  %s391_s2 = int_to_ptr.hbm [resolvable:$true] %s390_s2  ;;  %s393_s20 = int_to_ptr.vmem [resolvable:$true] %s392_s20 }
  0x1f   : > { %5859 = dma.hbm_to_vmem [thread:$0]  (!%p6414_p6), %s391_s2, 22528, %s393_s20, [#allocation12], %s6298_s18, %s6298_s18, %s6299_s19  }
  0x20   : > { %s6304_s26 = smov [#allocation14]   ;;  %s6897_s3 = sld [smem:[#allocation25_spill]] }
  0x21   : > { %s420_s30 = sshll.u32 %s6304_s26, 4  ;;  %s6898_s5 = sld [smem:[#allocation27_spill]]  ;;  %s421_s30 = int_to_ptr.vmem [resolvable:$true] %s420_s30 }
  0x22   : > { %5865 = dma.hbm_to_vmem [thread:$0]  (!%p6414_p6), %s419_s27, 11264, %s421_s30, [#allocation15], %s6883_s15, %s6883_s15, %s6884_s16  }
  0x23   : > { %s6305_s13 = smov [#allocation7]   ;;  %s6306_s6 = smov [#allocation10]  }
  0x24   : > { %s350_s2 = sshll.u32 %s6305_s13, 4  ;;  %s378_s11 = sshll.u32 %s6306_s6, 4  ;;  %s351_s2 = int_to_ptr.vmem [resolvable:$true] %s350_s2  ;;  %s379_s11 = int_to_ptr.vmem [resolvable:$true] %s378_s11 }
  0x25   : > { %s404_s26 = sshll.u32 %s6875_s7, 4  ;;  %s435_s4 = sshll.u32 %s6878_s10, 4  ;;  %s405_s26 = int_to_ptr.hbm [resolvable:$true] %s404_s26  ;;  %s436_s4 = int_to_ptr.hbm [resolvable:$true] %s435_s4 }
  0x26   : > { %s348_s17 = sshll.u32 %s6897_s3, 4  ;;  %s6307_s12 = smov [#allocation13]   ;;  %s349_s17 = int_to_ptr.hbm [resolvable:$true] %s348_s17 }
  0x27   : > { %s376_s25 = sshll.u32 %s6898_s5, 4  ;;  %s406_s13 = sshll.u32 %s6307_s12, 4  ;;  %s377_s25 = int_to_ptr.hbm [resolvable:$true] %s376_s25  ;;  %s407_s13 = int_to_ptr.vmem [resolvable:$true] %s406_s13 }
  0x28   : > { %5850 = dma.hbm_to_vmem [thread:$0]  (!%p6414_p6), %s349_s17, 512, %s351_s2, [#allocation6], %s6883_s15, %s6883_s15, %s6884_s16  }
  0x29   : > { %5856 = dma.hbm_to_vmem [thread:$0]  (!%p6414_p6), %s377_s25, 5632, %s379_s11, [#allocation9], %s6298_s18, %s6298_s18, %s6299_s19  }
  0x2a   : > { %5862 = dma.hbm_to_vmem [thread:$0]  (!%p6414_p6), %s405_s26, 11264, %s407_s13, [#allocation12], %s6883_s15, %s6883_s15, %s6884_s16  }
  0x2b   : > { %s6308_s25 = smov [#allocation16]   ;;  %s4534_s6 = sadd.s32 4294967294, %s6295_s24  }
  0x2c   : > { %s437_s2 = sshll.u32 %s6308_s25, 4  ;;  %s6481_s11 = sadd.s32 1, %s6295_s24   ;;  %s438_s2 = int_to_ptr.vmem [resolvable:$true] %s437_s2 }
  0x2d   : > { %5868 = dma.hbm_to_vmem [thread:$0]  (!%p6414_p6), %s436_s4, 1024, %s438_s2, [#allocation15], %s6298_s18, %s6298_s18, %s6299_s19  }
  0x2e   : > { %s36_s20 = ssub.s32 %s6295_s24, %s6481_s11  ;;  %s39_s27 = sadd.s32 1, %s6291_s23 }
  0x2f   : > { %p37_p7 = scmp.eq.s32.totalorder %s36_s20, 0  ;;  %p46_p8 = scmp.ne.s32.totalorder %s6291_s23, %s6287_s22 }
  0x30   : > { %p47_p9 = scmp.eq.s32.totalorder %s6295_s24, 0  ;;  %p52_p10 = scmp.ne.s32.totalorder %s6287_s22, %s6283_s21 }
  0x31   : > { %s6492_s26 = scalar_select %p37_p7, %s6291_s23, %s39_s27  }
  0x32   : > { %p6494_p11 = por %p47_p9, %p46_p8  ;;  %p6500_p12 = por %p53_p1, %p52_p10 }
  0x33   : > { %p307_p13 = scmp.eq.s32.totalorder %s6400_s28, 1  ;;  %p313_p0 = scmp.eq.s32.totalorder %s4534_s6, 1 }
  0x34   : > { %p5885_p2 = scmp.lt.s32.totalorder %s6295_s24, 2  ;;  %s454_s19 = sand.u32 1, %s6291_s23  }
  0x35   : > { %p6507_p4 = por %p307_p13, %p46_p8  ;;  %p6511_p6 = por %p313_p0, %p52_p10 }
  0x36   : > { %s4545_s4 = sshll.u32 %s454_s19, 4  ;;  %s5567_s12 = sshll.u32 %s6295_s24, 4 }
  0x37   : > { %s463_s2 = scalar_lea.hbm %s6868_s0, %s5567_s12  ;;  %s458_s20 = scalar_lea.vmem [#allocation2], %s4545_s4 }
  0x38   : > { %s466_s27 = sshll.u32 %s458_s20, 4  ;;  %s464_s15 = sshll.u32 %s463_s2, 4  ;;  %s467_s27 = int_to_ptr.vmem [resolvable:$true] %s466_s27  ;;  %s465_s15 = int_to_ptr.hbm [resolvable:$true] %s464_s15 }
  0x39   : > { %p6521_p7 = pnand %p5885_p2, %p6494_p11  ;;  %s455_s16 = scalar_lea.sflag [#allocation3], %s454_s19 }
  0x3a   : > { %s6183_s3 = sshra.s32 %s465_s15, 4  ;;  %s6190_s13 = scalar_lea.hbm %s6868_s0, 32  ;;  %s6184_s3 = int_to_ptr.hbm [resolvable:$true] %s6183_s3 }
  0x3b   : > { %s6185_s5 = scalar_lea.hbm %s6184_s3, 16  ;;  %p6187_p9 = pneg %p6521_p7 }
  0x3c   : > { %p6186_p8 = scmp.ne.s32.totalorder %s6184_s3, %s6185_s5  ;;  %p6191_p11 = scmp.lt.s32.totalorder %s6184_s3, %s6868_s0 }
  0x3d   : > { %p6192_p0 = scmp.lt.s32.totalorder %s6190_s13, %s6185_s5 }
  0x3e   : > { %p6188_p10 = pnand %p6187_p9, %p6186_p8 }
  0x3f   : > { %p6193_p2 = por %p6192_p0, %p6191_p11 }
  0x40   : > { %p6189_p13 = pneg %p6188_p10 }
  0x42   : > { %p6194_p5 = pnand %p6193_p2, %p6189_p13 }
  0x44   : > { %6197 = shalt.err (!%p6194_p5)
}
  0x45   : > { %s6904_s19 = smov 8   ;;  %s6905_s2 = smov 128  }
  0x46   : > { %5872 = dma.hbm_to_vmem [thread:$0]  (!%p6521_p7), %s465_s15, 256, %s467_s27, %s455_s16, %s6905_s2, %s6905_s2, %s6904_s19  }
  0x47   : > { %478 = sbr.rel (%p6405_p3) target bundleno = 7522 (0x1d62), region = 68  ;;  %s6541_s20 = sand.u32 (!%p6405_p3), 1, %s6287_s22  }
  0x48   : > { %s4549_s3 = sshll.u32 (!%p6405_p3), %s6541_s20, 4  ;;  %s481_s5 = scalar_lea.sflag (!%p6405_p3), [#allocation3], %s6541_s20 }
  0x49   : > { %s6547_s4 = scalar_lea.vmem (!%p6405_p3), [#allocation2], %s4549_s3 }
  0x4c   : > { %6258 = dma.done.wait (%p6500_p12), %s481_s5, 256  }
  0x4d   : > { %6260 = vsyncadd (%p6500_p12), %s481_s5, 4294967040 }
  0x4e   : > { %6262 = dma.done.wait (%p53_p1), [#allocation6], 1536  }
  0x4f   : > { %6264 = vsyncadd (%p53_p1), [#allocation6], 4294965760 }
  0x50   : > { %6266 = dma.done.wait (%p53_p1), [#allocation9], 6144  }
  0x51   : > { %6268 = vsyncadd (%p53_p1), [#allocation9], 4294961152 }
  0x52   : > { %6270 = dma.done.wait (%p53_p1), [#allocation12], 33792  }
  0x53   : > { %6272 = vsyncadd (%p53_p1), [#allocation12], 4294933504 }
  0x54   : > { %6274 = dma.done.wait (%p53_p1), [#allocation15], 12288  }
  0x55   : > { %6276 = vsyncadd (%p53_p1), [#allocation15], 4294955008  ;;  %v5575_v0 = vld [vmem:[#allocation5 + $0x38] sm:$0xff]  ;;  %v5574_v1 = vld [vmem:[#allocation5 + $0x30] sm:$0xff]  ;;  %vm663_vm0 = vcmask 130048   ;;  %vm749_vm5 = vcmask 261120  }
  0x56   : > { %634 = vmatpush.bf16.msra.mxu0 %v5575_v0  ;;  %v5573_v2 = vld [vmem:[#allocation5 + $0x28] sm:$0xff]  ;;  %v5572_v3 = vld [vmem:[#allocation5 + $0x20] sm:$0xff]  ;;  %v5571_v4 = vld [vmem:[#allocation5 + $0x18] sm:$0xff]  ;;  %s6906_s25 = sld [smem:[#allocation29_spill]]  ;;  %s5807_s14 = sshll.u32 %s6400_s28, 4 }
  0x57   : > { %v5570_v5 = vld [vmem:[#allocation5 + $0x10] sm:$0xff]  ;;  %v5569_v6 = vld [vmem:[#allocation5 + $0x8] sm:$0xff]  ;;  %v5568_v7 = vld [vmem:[#allocation5] sm:$0xff]  ;;  %s6907_s5 = sld [smem:[#allocation30_spill]]  ;;  %s565_s15 = scalar_lea.vmem [#allocation17], %s4549_s3 }
  0x58   : > { %v567_v8 = vld [vmem:[%s6547_s4] sm:$0xff]  ;;  %v568_v9 = vld [vmem:[%s6547_s4 + $0x8] sm:$0xff]  ;;  %s4382_s16 = sshll.u32 %s565_s15, 4  ;;  %s4370_s28 = scalar_lea.sflag [#allocation4], %s6541_s20  ;;  %s4383_s16 = int_to_ptr.vmem [resolvable:$true] %s4382_s16 }
  0x59   : > { %v569_v10 = vpack.c.bf16 %v568_v9, %v567_v8  ;;  %v5576_v14 = vld [vmem:[%s6869_s1] sm:$0xff]  ;;  %v5577_v15 = vld [vmem:[%s6869_s1 + $0x8] sm:$0xff]  ;;  %v691_v19 = vld [vmem:[#allocation7 + $0x10] sm:$0xff] }
  0x5a   : > { %635 = vmatpush.bf16.msra.mxu0 %v5574_v1  ;;  %v690_v20 = vld [vmem:[#allocation7 + $0x8] sm:$0xff]  ;;  %v689_v22 = vld [vmem:[#allocation7] sm:$0xff]  ;;  %v695_v23 = vld [vmem:[#allocation8 + $0x10] sm:$0xff] }
  0x5b   : > { %v694_v25 = vld [vmem:[#allocation8 + $0x8] sm:$0xff]  ;;  %v692_v26 = vld [vmem:[#allocation7 + $0x18] sm:$0xff]  ;;  %v693_v29 = vld [vmem:[#allocation8] sm:$0xff] }
  0x5c   : > { %v696_v31 = vld [vmem:[#allocation8 + $0x18] sm:$0xff]  ;;  %v5586_v38 = vld [vmem:[#allocation11 + $0x30] sm:$0xff]  ;;  %v5585_v44 = vld [vmem:[#allocation11 + $0x28] sm:$0xff] }
  0x5d   : > { %v5587_v34 = vld [vmem:[#allocation11 + $0x38] sm:$0xff]  ;;  %v5584_v48 = vld [vmem:[#allocation11 + $0x20] sm:$0xff]  ;;  %v5579_v52 = vld [vmem:[#allocation10 + $0x8] sm:$0xff]  ;;  %s4381_s29 = scalar_lea.hbm %s6907_s5, %s5807_s14  ;;  %s6233_s19 = scalar_lea.hbm %s6907_s5, 32 }
  0x5e   : > { %636 = vmatpush.bf16.msra.mxu0 %v5573_v2  ;;  %825 = vmatpush.bf16.msra.mxu3 %v5587_v34  ;;  %v5578_v50 = vld [vmem:[#allocation10] sm:$0xff]  ;;  %v5583_v51 = vld [vmem:[#allocation11 + $0x18] sm:$0xff]  ;;  %v5582_v53 = vld [vmem:[#allocation11 + $0x10] sm:$0xff]  ;;  %s4384_s6 = sshll.u32 %s4381_s29, 4  ;;  %s4385_s6 = int_to_ptr.hbm [resolvable:$true] %s4384_s6 }
  0x5f   : > { %v5581_v54 = vld [vmem:[#allocation11 + $0x8] sm:$0xff]  ;;  %v5580_v55 = vld [vmem:[#allocation11] sm:$0xff]  ;;  %v846_v1 = vld [vmem:[#allocation13 + $0x10] sm:$0xff]  ;;  %s6227_s12 = sshra.s32 %s4385_s6, 4  ;;  %s6228_s12 = int_to_ptr.hbm [resolvable:$true] %s6227_s12 }
  0x60   : > { %v845_v2 = vld [vmem:[#allocation13 + $0x8] sm:$0xff]  ;;  %v847_v8 = vld [vmem:[#allocation13 + $0x18] sm:$0xff]  ;;  %s6229_s13 = scalar_lea.hbm %s6228_s12, 16  ;;  %p6234_p12 = scmp.lt.s32.totalorder %s6228_s12, %s6907_s5 }
  0x61   : > { %v5589_v34 = vld [vmem:[#allocation10 + $0x18] sm:$0xff]  ;;  %p6230_p1 = scmp.ne.s32.totalorder %s6228_s12, %s6229_s13  ;;  %p6235_p7 = scmp.lt.s32.totalorder %s6233_s19, %s6229_s13 }
  0x62   : > { %637 = vmatpush.bf16.msra.mxu0 %v5572_v3  ;;  %826 = vmatpush.bf16.msra.mxu3 %v5586_v38 }
  0x63   : > { %p6231_p3 = pnand %p6230_p1, %p6507_p4  ;;  %p6236_p8 = por %p6235_p7, %p6234_p12 }
  0x65   : > { %p6232_p5 = pneg %p6231_p3 }
  0x66   : > { %638 = vmatpush.bf16.msra.mxu0 %v5571_v4  ;;  %827 = vmatpush.bf16.msra.mxu3 %v5585_v44  ;;  %v844_v4 = vld [vmem:[#allocation13] sm:$0xff] }
  0x67   : > { %p6237_p9 = pnand %p6236_p8, %p6232_p5 }
  0x6a   : > { %639 = vmatpush.bf16.msra.mxu0 %v5570_v5  ;;  %828 = vmatpush.bf16.msra.mxu3 %v5584_v48  ;;  %v850_v5 = vld [vmem:[#allocation14 + $0x10] sm:$0xff] }
  0x6e   : > { %640 = vmatpush.bf16.msra.mxu0 %v5569_v6  ;;  %829 = vmatpush.bf16.msra.mxu3 %v5583_v51  ;;  %v1002_v51 = vld [vmem:[#allocation13 + $0x28] sm:$0xff] }
  0x72   : > { %641 = vmatpush.bf16.msra.mxu0 %v5568_v7  ;;  %830 = vmatpush.bf16.msra.mxu3 %v5582_v53  ;;  %v849_v7 = vld [vmem:[#allocation14 + $0x8] sm:$0xff] }
  0x75   : > { %642 = vmatmul.bf16.vlgmr.msra.gmra.mxu0 %v569_v10 }
  0x76   : > { %831 = vmatpush.bf16.msra.mxu3 %v5581_v54  ;;  %v1001_v54 = vld [vmem:[#allocation13 + $0x20] sm:$0xff] }
  0x7a   : > { %832 = vmatpush.bf16.msra.mxu3 %v5580_v55  ;;  %v1008_v55 = vld [vmem:[#allocation14 + $0x30] sm:$0xff] }
  0xf2   : > { %v643_v11 = vpop.f32.mrf.mxu0 }
  0xfa   : > { %v645_v12 = vpop.f32.mrf.mxu0 }
  0xfb   : > { %v652_v13 = vpack.c.bf16 %v645_v12, %v643_v11  ;;  %v848_v11 = vld [vmem:[#allocation14] sm:$0xff] }
  0xfd   : > { %677 = vmatpush.bf16.msra.mxu1 %v652_v13  ;;  %v851_v13 = vld [vmem:[#allocation14 + $0x18] sm:$0xff] }
 0x100   : > { %4599 = vmatmul.msk.bf16.vlgmr.msra.gmra.mxu1 %vm663_vm0, %v5576_v14 }
 0x110   : > { %4600 = vmatmul.msk.bf16.gmra.mxu1 %vm663_vm0, %v5577_v15 }
 0x17d   : > { %v679_v16 = vpop.f32.mrf.mxu1 }
 0x17e   : > { %v697_v27 = vmul.f32 %v689_v22, %v679_v16  ;;  %v5597_v16 = vld [vmem:[#allocation11 + $0x78] sm:$0xff] }
 0x180   : > { %v701_v35 = vadd.f32 %v697_v27, %v693_v29 }
 0x182   : > { %v709_v41 = vmul.f32 0.01, %v701_v35  ;;  %vm705_vm4 = vcmp.ge.f32.partialorder %v701_v35, 0.0 }
 0x184   : > { %v6585_v47 = vsel %vm705_vm4, %v701_v35, %v709_v41  ;;  %v5592_v35 = vld [vmem:[#allocation11 + $0x50] sm:$0xff] }
 0x185   : > { %v681_v17 = vpop.f32.mrf.mxu1 }
 0x186   : > { %v698_v24 = vmul.f32 %v690_v20, %v681_v17  ;;  %v5596_v20 = vld [vmem:[#allocation11 + $0x70] sm:$0xff] }
 0x188   : > { %v702_v32 = vadd.f32 %v698_v24, %v694_v25 }
 0x18a   : > { %v710_v40 = vmul.f32 0.01, %v702_v32  ;;  %vm706_vm3 = vcmp.ge.f32.partialorder %v702_v32, 0.0 }
 0x18c   : > { %v6583_v46 = vsel %vm706_vm3, %v702_v32, %v710_v40  ;;  %v5588_v32 = vld [vmem:[#allocation10 + $0x10] sm:$0xff] }
 0x18d   : > { %v684_v18 = vpop.f32.mrf.mxu1  ;;  %v737_v49 = vpack.c.bf16 %v6583_v46, %v6585_v47 }
 0x18e   : > { %v699_v21 = vmul.f32 %v691_v19, %v684_v18 }
 0x190   : > { %v703_v28 = vadd.f32 %v699_v21, %v695_v23 }
 0x192   : > { %v711_v37 = vmul.f32 0.01, %v703_v28  ;;  %vm707_vm1 = vcmp.ge.f32.partialorder %v703_v28, 0.0 }
 0x194   : > { %v6577_v42 = vsel %vm707_vm1, %v703_v28, %v711_v37  ;;  %v5590_v37 = vld [vmem:[#allocation11 + $0x40] sm:$0xff] }
 0x195   : > { %v686_v30 = vpop.f32.mrf.mxu1 }
 0x196   : > { %v700_v33 = vmul.f32 %v692_v26, %v686_v30  ;;  %v5595_v26 = vld [vmem:[#allocation11 + $0x68] sm:$0xff]  ;;  %v5594_v30 = vld [vmem:[#allocation11 + $0x60] sm:$0xff] }
 0x198   : > { %v704_v36 = vadd.f32 %v700_v33, %v696_v31  ;;  %v5593_v33 = vld [vmem:[#allocation11 + $0x58] sm:$0xff] }
 0x19a   : > { %vm708_vm2 = vcmp.ge.f32.partialorder %v704_v36, 0.0  ;;  %v712_v39 = vmul.f32 0.01, %v704_v36 }
 0x19c   : > { %v6579_v43 = vsel %vm708_vm2, %v704_v36, %v712_v39  ;;  %v5591_v36 = vld [vmem:[#allocation11 + $0x48] sm:$0xff] }
 0x19d   : > { %v738_v45 = vpack.c.bf16 %v6579_v43, %v6577_v42 }
 0x19f   : > { %762 = vmatpush.bf16.msra.mxu2 %v738_v45 }
 0x1a3   : > { %763 = vmatpush.bf16.msra.mxu2 %v737_v49 }
 0x1a6   : > { %4609 = vmatmul.msk.bf16.vlgmr.msra.gmra.mxu2 %vm749_vm5, %v5578_v50  ;;  %v1003_v50 = vld [vmem:[#allocation13 + $0x30] sm:$0xff] }
 0x1a7   : > { %981 = vmatpush.bf16.msrb.mxu2 %v5597_v16  ;;  %v5605_v16 = vld [vmem:[#allocation11 + $0xa8] sm:$0xff] }
 0x1ab   : > { %982 = vmatpush.bf16.msrb.mxu2 %v5596_v20  ;;  %v5604_v20 = vld [vmem:[#allocation11 + $0xa0] sm:$0xff] }
 0x1af   : > { %983 = vmatpush.bf16.msrb.mxu2 %v5595_v26  ;;  %v5601_v26 = vld [vmem:[#allocation11 + $0x88] sm:$0xff] }
 0x1b3   : > { %984 = vmatpush.bf16.msrb.mxu2 %v5594_v30 }
 0x1b6   : > { %4610 = vmatmul.msk.bf16.gmra.mxu2 %vm749_vm5, %v5579_v52 }
 0x1b7   : > { %985 = vmatpush.bf16.msrb.mxu2 %v5593_v33 }
 0x1bb   : > { %986 = vmatpush.bf16.msrb.mxu2 %v5592_v35 }
 0x1bf   : > { %987 = vmatpush.bf16.msrb.mxu2 %v5591_v36 }
 0x1c3   : > { %988 = vmatpush.bf16.msrb.mxu2 %v5590_v37  ;;  %v1165_v37 = vld [vmem:[#allocation13 + $0x50] sm:$0xff] }
 0x229   : > { %v765_v56 = vpop.f32.mrf.mxu2 }
 0x231   : > { %v767_v57 = vpop.f32.mrf.mxu2 }
 0x232   : > { %v775_v58 = vpack.c.bf16 %v767_v57, %v765_v56  ;;  %v1007_v57 = vld [vmem:[#allocation14 + $0x28] sm:$0xff] }
 0x234   : > { %833 = vmatmul.bf16.vlgmr.msra.gmra.mxu3 %v775_v58 }
 0x239   : > { %v770_v59 = vpop.f32.mrf.mxu2 }
 0x241   : > { %v772_v60 = vpop.f32.mrf.mxu2 }
 0x242   : > { %v776_v61 = vpack.c.bf16 %v772_v60, %v770_v59  ;;  %v1006_v60 = vld [vmem:[#allocation14 + $0x20] sm:$0xff] }
 0x244   : > { %838 = vmatmul.bf16.gmra.mxu3 %v776_v61  ;;  %v1004_v61 = vld [vmem:[#allocation13 + $0x38] sm:$0xff] }
 0x2b7   : > { %v834_v62 = vpop.f32.mrf.mxu3 }
 0x2b8   : > { %v852_v9 = vmul.f32 %v844_v4, %v834_v62 }
 0x2ba   : > { %v856_v17 = vadd.f32 %v852_v9, %v848_v11 }
 0x2bc   : > { %v864_v25 = vmul.f32 0.01, %v856_v17  ;;  %vm860_vm9 = vcmp.ge.f32.partialorder %v856_v17, 0.0 }
 0x2be   : > { %v868_v29 = vsel %vm860_vm9, %v856_v17, %v864_v25  ;;  %v5602_v25 = vld [vmem:[#allocation11 + $0x90] sm:$0xff] }
 0x2bf   : > { %v836_v63 = vpop.f32.mrf.mxu3 }
 0x2c0   : > { %v853_v6 = vmul.f32 %v845_v2, %v836_v63 }
 0x2c2   : > { %v857_v14 = vadd.f32 %v853_v6, %v849_v7  ;;  %v5607_v6 = vld [vmem:[#allocation11 + $0xb8] sm:$0xff] }
 0x2c3   : > { %1143 = vmatpush.bf16.msrb.mxu3 %v5607_v6  ;;  %v5614_v6 = vld [vmem:[#allocation11 + $0xe0] sm:$0xff] }
 0x2c4   : > { %v865_v22 = vmul.f32 0.01, %v857_v14  ;;  %vm861_vm8 = vcmp.ge.f32.partialorder %v857_v14, 0.0 }
 0x2c6   : > { %v869_v28 = vsel %vm861_vm8, %v857_v14, %v865_v22  ;;  %v5598_v22 = vld [vmem:[#allocation10 + $0x20] sm:$0xff] }
 0x2c7   : > { %v839_v0 = vpop.f32.mrf.mxu3  ;;  %v894_v31 = vpack.c.bf16 %v869_v28, %v868_v29 }
 0x2c8   : > { %v854_v3 = vmul.f32 %v846_v1, %v839_v0  ;;  %v1009_v0 = vld [vmem:[#allocation14 + $0x38] sm:$0xff] }
 0x2ca   : > { %v858_v10 = vadd.f32 %v854_v3, %v850_v5 }
 0x2cc   : > { %v866_v19 = vmul.f32 0.01, %v858_v10  ;;  %vm862_vm6 = vcmp.ge.f32.partialorder %v858_v10, 0.0 }
 0x2ce   : > { %v870_v23 = vsel %vm862_vm6, %v858_v10, %v866_v19  ;;  %v5606_v10 = vld [vmem:[#allocation11 + $0xb0] sm:$0xff] }
 0x2cf   : > { %v841_v12 = vpop.f32.mrf.mxu3  ;;  %1144 = vmatpush.bf16.msrb.mxu3 %v5606_v10  ;;  %v5609_v10 = vld [vmem:[#allocation10 + $0x38] sm:$0xff] }
 0x2d0   : > { %v855_v15 = vmul.f32 %v847_v8, %v841_v12 }
 0x2d2   : > { %v859_v18 = vadd.f32 %v855_v15, %v851_v13 }
 0x2d3   : > { %1145 = vmatpush.bf16.msrb.mxu3 %v5605_v16 }
 0x2d4   : > { %vm863_vm7 = vcmp.ge.f32.partialorder %v859_v18, 0.0  ;;  %v867_v21 = vmul.f32 0.01, %v859_v18 }
 0x2d6   : > { %v871_v24 = vsel %vm863_vm7, %v859_v18, %v867_v21 }
 0x2d7   : > { %v895_v27 = vpack.c.bf16 %v871_v24, %v870_v23  ;;  %1146 = vmatpush.bf16.msrb.mxu3 %v5604_v20  ;;  %v5603_v23 = vld [vmem:[#allocation11 + $0x98] sm:$0xff]  ;;  %v5599_v24 = vld [vmem:[#allocation10 + $0x28] sm:$0xff] }
 0x2d9   : > { %918 = vmatpush.bf16.msrb.mxu1 %v895_v27  ;;  %v5600_v27 = vld [vmem:[#allocation11 + $0x80] sm:$0xff] }
 0x2db   : > { %1147 = vmatpush.bf16.msrb.mxu3 %v5603_v23 }
 0x2dd   : > { %919 = vmatpush.bf16.msrb.mxu1 %v894_v31 }
 0x2df   : > { %1148 = vmatpush.bf16.msrb.mxu3 %v5602_v25 }
 0x2e0   : > { %4651 = vmatmul.msk.bf16.vlgmr.msrb.gmra.mxu1 %vm749_vm5, %v5588_v32 }
 0x2e3   : > { %1149 = vmatpush.bf16.msrb.mxu3 %v5601_v26  ;;  %v1323_v26 = vld [vmem:[#allocation13 + $0x70] sm:$0xff] }
 0x2e7   : > { %1150 = vmatpush.bf16.msrb.mxu3 %v5600_v27  ;;  %v1322_v27 = vld [vmem:[#allocation13 + $0x68] sm:$0xff] }
 0x2f0   : > { %4652 = vmatmul.msk.bf16.gmra.mxu1 %vm749_vm5, %v5589_v34 }
 0x35d   : > { %v921_v38 = vpop.f32.mrf.mxu1 }
 0x365   : > { %v923_v39 = vpop.f32.mrf.mxu1 }
 0x366   : > { %v931_v40 = vpack.c.bf16 %v923_v39, %v921_v38  ;;  %v1164_v38 = vld [vmem:[#allocation13 + $0x48] sm:$0xff] }
 0x368   : > { %989 = vmatmul.bf16.vlgmr.msrb.gmra.mxu2 %v931_v40  ;;  %v1163_v40 = vld [vmem:[#allocation13 + $0x40] sm:$0xff] }
 0x36d   : > { %v926_v41 = vpop.f32.mrf.mxu1 }
 0x375   : > { %v928_v44 = vpop.f32.mrf.mxu1 }
 0x376   : > { %v932_v45 = vpack.c.bf16 %v928_v44, %v926_v41  ;;  %v1170_v41 = vld [vmem:[#allocation14 + $0x50] sm:$0xff] }
 0x378   : > { %994 = vmatmul.bf16.gmra.mxu2 %v932_v45  ;;  %v1169_v45 = vld [vmem:[#allocation14 + $0x48] sm:$0xff] }
 0x3eb   : > { %v990_v48 = vpop.f32.mrf.mxu2 }
 0x3ec   : > { %v1010_v58 = vmul.f32 %v1001_v54, %v990_v48  ;;  %v1166_v48 = vld [vmem:[#allocation13 + $0x58] sm:$0xff] }
 0x3ee   : > { %v1014_v1 = vadd.f32 %v1010_v58, %v1006_v60  ;;  %v5616_v60 = vld [vmem:[#allocation11 + $0xf0] sm:$0xff] }
 0x3f0   : > { %v1022_v7 = vmul.f32 0.01, %v1014_v1  ;;  %vm1018_vm13 = vcmp.ge.f32.partialorder %v1014_v1, 0.0 }
 0x3f2   : > { %v1026_v15 = vsel %vm1018_vm13, %v1014_v1, %v1022_v7 }
 0x3f3   : > { %v992_v49 = vpop.f32.mrf.mxu2  ;;  %v6605_v19 = vadd.f32 %v1026_v15, %v6585_v47  ;;  %v5610_v15 = vld [vmem:[#allocation11 + $0xc0] sm:$0xff] }
 0x3f4   : > { %v1011_v56 = vmul.f32 %v1002_v51, %v992_v49  ;;  %v1168_v51 = vld [vmem:[#allocation14 + $0x40] sm:$0xff] }
 0x3f6   : > { %v1015_v62 = vadd.f32 %v1011_v56, %v1007_v57  ;;  %v5617_v56 = vld [vmem:[#allocation11 + $0xf8] sm:$0xff] }
 0x3f7   : > { %1301 = vmatpush.bf16.msra.mxu2 %v5617_v56 }
 0x3f8   : > { %v1023_v4 = vmul.f32 0.01, %v1015_v62  ;;  %vm1019_vm11 = vcmp.ge.f32.partialorder %v1015_v62, 0.0 }
 0x3fa   : > { %v1027_v12 = vsel %vm1019_vm11, %v1015_v62, %v1023_v4 }
 0x3fb   : > { %v995_v52 = vpop.f32.mrf.mxu2  ;;  %v6602_v18 = vadd.f32 %v1027_v12, %v6583_v46  ;;  %1302 = vmatpush.bf16.msra.mxu2 %v5616_v60  ;;  %v5611_v12 = vld [vmem:[#allocation11 + $0xc8] sm:$0xff] }
 0x3fc   : > { %v1012_v53 = vmul.f32 %v1003_v50, %v995_v52  ;;  %v5625_v60 = vld [vmem:[#allocation11 + $0x128] sm:$0xff] }
 0x3fd   : > { %v1056_v21 = vpack.c.bf16 %v6602_v18, %v6605_v19 }
 0x3fe   : > { %v1016_v59 = vadd.f32 %v1012_v53, %v1008_v55  ;;  %v1171_v53 = vld [vmem:[#allocation14 + $0x58] sm:$0xff] }
 0x400   : > { %v1024_v2 = vmul.f32 0.01, %v1016_v59  ;;  %vm1020_vm10 = vcmp.ge.f32.partialorder %v1016_v59, 0.0 }
 0x402   : > { %v1028_v9 = vsel %vm1020_vm10, %v1016_v59, %v1024_v2  ;;  %v5615_v2 = vld [vmem:[#allocation11 + $0xe8] sm:$0xff] }
 0x403   : > { %v997_v63 = vpop.f32.mrf.mxu2  ;;  %v6594_v13 = vadd.f32 %v1028_v9, %v6577_v42  ;;  %1303 = vmatpush.bf16.msra.mxu2 %v5615_v2  ;;  %v5613_v9 = vld [vmem:[#allocation11 + $0xd8] sm:$0xff]  ;;  %v5618_v2 = vld [vmem:[#allocation10 + $0x40] sm:$0xff] }
 0x404   : > { %v1013_v3 = vmul.f32 %v1004_v61, %v997_v63 }
 0x406   : > { %v1017_v5 = vadd.f32 %v1013_v3, %v1009_v0 }
 0x407   : > { %1304 = vmatpush.bf16.msra.mxu2 %v5614_v6  ;;  %v5621_v6 = vld [vmem:[#allocation11 + $0x108] sm:$0xff] }
 0x408   : > { %vm1021_vm12 = vcmp.ge.f32.partialorder %v1017_v5, 0.0  ;;  %v1025_v8 = vmul.f32 0.01, %v1017_v5 }
 0x40a   : > { %v1029_v11 = vsel %vm1021_vm12, %v1017_v5, %v1025_v8  ;;  %v5608_v8 = vld [vmem:[#allocation10 + $0x30] sm:$0xff] }
 0x40b   : > { %v6597_v14 = vadd.f32 %v1029_v11, %v6579_v43  ;;  %1305 = vmatpush.bf16.msra.mxu2 %v5613_v9  ;;  %v5612_v11 = vld [vmem:[#allocation11 + $0xd0] sm:$0xff] }
 0x40d   : > { %v1057_v17 = vpack.c.bf16 %v6597_v14, %v6594_v13 }
 0x40f   : > { %1080 = vmatpush.bf16.msrb.mxu0 %v1057_v17  ;;  %1306 = vmatpush.bf16.msra.mxu2 %v5612_v11 }
 0x413   : > { %1081 = vmatpush.bf16.msrb.mxu0 %v1056_v21  ;;  %1307 = vmatpush.bf16.msra.mxu2 %v5611_v12 }
 0x416   : > { %4693 = vmatmul.msk.bf16.vlgmr.msrb.gmra.mxu0 %vm749_vm5, %v5598_v22 }
 0x417   : > { %1308 = vmatpush.bf16.msra.mxu2 %v5610_v15 }
 0x426   : > { %4694 = vmatmul.msk.bf16.gmra.mxu0 %vm749_vm5, %v5599_v24 }
 0x493   : > { %v1083_v28 = vpop.f32.mrf.mxu0 }
 0x49b   : > { %v1085_v29 = vpop.f32.mrf.mxu0 }
 0x49c   : > { %v1093_v30 = vpack.c.bf16 %v1085_v29, %v1083_v28 }
 0x49e   : > { %1151 = vmatmul.bf16.vlgmr.msrb.gmra.mxu3 %v1093_v30  ;;  %v1321_v30 = vld [vmem:[#allocation13 + $0x60] sm:$0xff] }
 0x4a3   : > { %v1088_v31 = vpop.f32.mrf.mxu0 }
 0x4ab   : > { %v1090_v32 = vpop.f32.mrf.mxu0 }
 0x4ac   : > { %v1094_v33 = vpack.c.bf16 %v1090_v32, %v1088_v31  ;;  %v1328_v31 = vld [vmem:[#allocation14 + $0x70] sm:$0xff] }
 0x4ae   : > { %1156 = vmatmul.bf16.gmra.mxu3 %v1094_v33  ;;  %v1327_v33 = vld [vmem:[#allocation14 + $0x68] sm:$0xff] }
 0x521   : > { %v1152_v34 = vpop.f32.mrf.mxu3 }
 0x522   : > { %v1172_v49 = vmul.f32 %v1163_v40, %v1152_v34  ;;  %v1329_v40 = vld [vmem:[#allocation14 + $0x78] sm:$0xff] }
 0x524   : > { %v1176_v57 = vadd.f32 %v1172_v49, %v1168_v51 }
 0x526   : > { %v1184_v63 = vmul.f32 0.01, %v1176_v57  ;;  %vm1180_vm1 = vcmp.ge.f32.partialorder %v1176_v57, 0.0 }
 0x528   : > { %v1188_v5 = vsel %vm1180_vm1, %v1176_v57, %v1184_v63 }
 0x529   : > { %v1154_v35 = vpop.f32.mrf.mxu3 }
 0x52a   : > { %v1173_v44 = vmul.f32 %v1164_v38, %v1154_v35 }
 0x52c   : > { %v1177_v54 = vadd.f32 %v1173_v44, %v1169_v45 }
 0x52e   : > { %v1185_v61 = vmul.f32 0.01, %v1177_v54  ;;  %vm1181_vm0 = vcmp.ge.f32.partialorder %v1177_v54, 0.0 }
 0x530   : > { %v1189_v4 = vsel %vm1181_vm0, %v1177_v54, %v1185_v61  ;;  %v5626_v54 = vld [vmem:[#allocation11 + $0x130] sm:$0xff] }
 0x531   : > { %v1157_v36 = vpop.f32.mrf.mxu3  ;;  %v1214_v7 = vpack.c.bf16 %v1189_v4, %v1188_v5  ;;  %v5619_v4 = vld [vmem:[#allocation10 + $0x48] sm:$0xff]  ;;  %v5622_v5 = vld [vmem:[#allocation11 + $0x110] sm:$0xff] }
 0x532   : > { %v1174_v39 = vmul.f32 %v1165_v37, %v1157_v36  ;;  %v1326_v36 = vld [vmem:[#allocation14 + $0x60] sm:$0xff]  ;;  %v1324_v37 = vld [vmem:[#allocation13 + $0x78] sm:$0xff] }
 0x534   : > { %v1178_v50 = vadd.f32 %v1174_v39, %v1170_v41 }
 0x536   : > { %v1186_v58 = vmul.f32 0.01, %v1178_v50  ;;  %vm1182_vm14 = vcmp.ge.f32.partialorder %v1178_v50, 0.0 }
 0x538   : > { %v1190_v0 = vsel %vm1182_vm14, %v1178_v50, %v1186_v58  ;;  %v5627_v50 = vld [vmem:[#allocation11 + $0x138] sm:$0xff] }
 0x539   : > { %v1159_v52 = vpop.f32.mrf.mxu3  ;;  %1463 = vmatpush.bf16.msra.mxu3 %v5627_v50  ;;  %v5635_v50 = vld [vmem:[#allocation11 + $0x168] sm:$0xff] }
 0x53a   : > { %v1175_v55 = vmul.f32 %v1166_v48, %v1159_v52 }
 0x53c   : > { %v1179_v59 = vadd.f32 %v1175_v55, %v1171_v53 }
 0x53d   : > { %1464 = vmatpush.bf16.msra.mxu3 %v5626_v54  ;;  %v5634_v54 = vld [vmem:[#allocation11 + $0x160] sm:$0xff] }
 0x53e   : > { %vm1183_vm15 = vcmp.ge.f32.partialorder %v1179_v59, 0.0  ;;  %v1187_v62 = vmul.f32 0.01, %v1179_v59 }
 0x540   : > { %v1191_v1 = vsel %vm1183_vm15, %v1179_v59, %v1187_v62 }
 0x541   : > { %v1215_v3 = vpack.c.bf16 %v1191_v1, %v1190_v0  ;;  %1465 = vmatpush.bf16.msra.mxu3 %v5625_v60  ;;  %v5624_v0 = vld [vmem:[#allocation11 + $0x120] sm:$0xff]  ;;  %v5629_v60 = vld [vmem:[#allocation10 + $0x58] sm:$0xff] }
 0x543   : > { %1238 = vmatpush.bf16.msra.mxu1 %v1215_v3  ;;  %v5623_v3 = vld [vmem:[#allocation11 + $0x118] sm:$0xff] }
 0x545   : > { %1466 = vmatpush.bf16.msra.mxu3 %v5624_v0  ;;  %v5631_v0 = vld [vmem:[#allocation11 + $0x148] sm:$0xff] }
 0x547   : > { %1239 = vmatpush.bf16.msra.mxu1 %v1214_v7  ;;  %v5620_v7 = vld [vmem:[#allocation11 + $0x100] sm:$0xff] }
 0x549   : > { %1467 = vmatpush.bf16.msra.mxu3 %v5623_v3 }
 0x54a   : > { %4735 = vmatmul.msk.bf16.vlgmr.msra.gmra.mxu1 %vm749_vm5, %v5608_v8 }
 0x54d   : > { %1468 = vmatpush.bf16.msra.mxu3 %v5622_v5 }
 0x551   : > { %1469 = vmatpush.bf16.msra.mxu3 %v5621_v6 }
 0x555   : > { %1470 = vmatpush.bf16.msra.mxu3 %v5620_v7 }
 0x55a   : > { %4736 = vmatmul.msk.bf16.gmra.mxu1 %vm749_vm5, %v5609_v10 }
 0x5c7   : > { %v1241_v16 = vpop.f32.mrf.mxu1 }
 0x5cf   : > { %v1243_v17 = vpop.f32.mrf.mxu1 }
 0x5d0   : > { %v1251_v20 = vpack.c.bf16 %v1243_v17, %v1241_v16 }
 0x5d2   : > { %1309 = vmatmul.bf16.vlgmr.msra.gmra.mxu2 %v1251_v20 }
 0x5d7   : > { %v1246_v21 = vpop.f32.mrf.mxu1 }
 0x5df   : > { %v1248_v22 = vpop.f32.mrf.mxu1 }
 0x5e0   : > { %v1252_v23 = vpack.c.bf16 %v1248_v22, %v1246_v21  ;;  %v1485_v21 = vld [vmem:[#allocation13 + $0x90] sm:$0xff]  ;;  %v1484_v22 = vld [vmem:[#allocation13 + $0x88] sm:$0xff] }
 0x5e2   : > { %1314 = vmatmul.bf16.gmra.mxu2 %v1252_v23 }
 0x655   : > { %v1310_v24 = vpop.f32.mrf.mxu2 }
 0x656   : > { %v1330_v34 = vmul.f32 %v1321_v30, %v1310_v24  ;;  %v1483_v24 = vld [vmem:[#allocation13 + $0x80] sm:$0xff] }
 0x658   : > { %v1334_v41 = vadd.f32 %v1330_v34, %v1326_v36  ;;  %v5637_v36 = vld [vmem:[#allocation11 + $0x178] sm:$0xff] }
 0x659   : > { %1621 = vmatpush.bf16.msrb.mxu2 %v5637_v36 }
 0x65a   : > { %v1342_v51 = vmul.f32 0.01, %v1334_v41  ;;  %vm1338_vm6 = vcmp.ge.f32.partialorder %v1334_v41, 0.0 }
 0x65c   : > { %v1346_v59 = vsel %vm1338_vm6, %v1334_v41, %v1342_v51 }
 0x65d   : > { %v1312_v25 = vpop.f32.mrf.mxu2  ;;  %v6625_v63 = vadd.f32 %v1346_v59, %v6605_v19  ;;  %v5633_v59 = vld [vmem:[#allocation11 + $0x158] sm:$0xff] }
 0x65e   : > { %v1331_v32 = vmul.f32 %v1322_v27, %v1312_v25  ;;  %v1490_v25 = vld [vmem:[#allocation14 + $0x90] sm:$0xff]  ;;  %v1489_v27 = vld [vmem:[#allocation14 + $0x88] sm:$0xff] }
 0x660   : > { %v1335_v38 = vadd.f32 %v1331_v32, %v1327_v33  ;;  %v1491_v33 = vld [vmem:[#allocation14 + $0x98] sm:$0xff] }
 0x662   : > { %v1343_v48 = vmul.f32 0.01, %v1335_v38  ;;  %vm1339_vm3 = vcmp.ge.f32.partialorder %v1335_v38, 0.0 }
 0x664   : > { %v1347_v55 = vsel %vm1339_vm3, %v1335_v38, %v1343_v48 }
 0x665   : > { %v1315_v28 = vpop.f32.mrf.mxu2  ;;  %v6622_v62 = vadd.f32 %v1347_v55, %v6602_v18 }
 0x666   : > { %v1332_v29 = vmul.f32 %v1323_v26, %v1315_v28  ;;  %v1486_v28 = vld [vmem:[#allocation13 + $0x98] sm:$0xff] }
 0x667   : > { %v1376_v1 = vpack.c.bf16 %v6622_v62, %v6625_v63 }
 0x668   : > { %v1336_v35 = vadd.f32 %v1332_v29, %v1328_v31  ;;  %v1488_v31 = vld [vmem:[#allocation14 + $0x80] sm:$0xff] }
 0x66a   : > { %v1344_v44 = vmul.f32 0.01, %v1336_v35  ;;  %vm1340_vm2 = vcmp.ge.f32.partialorder %v1336_v35, 0.0 }
 0x66c   : > { %v1348_v52 = vsel %vm1340_vm2, %v1336_v35, %v1344_v44 }
 0x66d   : > { %v1317_v39 = vpop.f32.mrf.mxu2  ;;  %v6614_v57 = vadd.f32 %v1348_v52, %v6594_v13 }
 0x66e   : > { %v1333_v45 = vmul.f32 %v1324_v37, %v1317_v39 }
 0x670   : > { %v1337_v49 = vadd.f32 %v1333_v45, %v1329_v40  ;;  %v5636_v40 = vld [vmem:[#allocation11 + $0x170] sm:$0xff] }
 0x671   : > { %1622 = vmatpush.bf16.msrb.mxu2 %v5636_v40 }
 0x672   : > { %vm1341_vm4 = vcmp.ge.f32.partialorder %v1337_v49, 0.0  ;;  %v1345_v53 = vmul.f32 0.01, %v1337_v49 }
 0x674   : > { %v1349_v56 = vsel %vm1341_vm4, %v1337_v49, %v1345_v53 }
 0x675   : > { %v6617_v58 = vadd.f32 %v1349_v56, %v6597_v14  ;;  %1623 = vmatpush.bf16.msrb.mxu2 %v5635_v50  ;;  %v5628_v56 = vld [vmem:[#allocation10 + $0x50] sm:$0xff] }
 0x677   : > { %v1377_v61 = vpack.c.bf16 %v6617_v58, %v6614_v57 }
 0x679   : > { %1400 = vmatpush.bf16.msra.mxu0 %v1377_v61  ;;  %1624 = vmatpush.bf16.msrb.mxu2 %v5634_v54  ;;  %v5632_v61 = vld [vmem:[#allocation11 + $0x150] sm:$0xff]  ;;  %v5638_v54 = vld [vmem:[#allocation10 + $0x60] sm:$0xff] }
 0x67d   : > { %1401 = vmatpush.bf16.msra.mxu0 %v1376_v1  ;;  %1625 = vmatpush.bf16.msrb.mxu2 %v5633_v59  ;;  %v5630_v1 = vld [vmem:[#allocation11 + $0x140] sm:$0xff]  ;;  %v5642_v59 = vld [vmem:[#allocation11 + $0x190] sm:$0xff] }
 0x680   : > { %4777 = vmatmul.msk.bf16.vlgmr.msra.gmra.mxu0 %vm749_vm5, %v5618_v2 }
 0x681   : > { %1626 = vmatpush.bf16.msrb.mxu2 %v5632_v61  ;;  %v5640_v61 = vld [vmem:[#allocation11 + $0x180] sm:$0xff] }
 0x685   : > { %1627 = vmatpush.bf16.msrb.mxu2 %v5631_v0 }
 0x689   : > { %1628 = vmatpush.bf16.msrb.mxu2 %v5630_v1 }
 0x690   : > { %4778 = vmatmul.msk.bf16.gmra.mxu0 %vm749_vm5, %v5619_v4 }
 0x6fd   : > { %v1403_v8 = vpop.f32.mrf.mxu0 }
 0x705   : > { %v1405_v9 = vpop.f32.mrf.mxu0 }
 0x706   : > { %v1413_v10 = vpack.c.bf16 %v1405_v9, %v1403_v8 }
 0x708   : > { %1471 = vmatmul.bf16.vlgmr.msra.gmra.mxu3 %v1413_v10  ;;  %v1643_v10 = vld [vmem:[#allocation13 + $0xb0] sm:$0xff] }
 0x70d   : > { %v1408_v11 = vpop.f32.mrf.mxu0 }
 0x715   : > { %v1410_v12 = vpop.f32.mrf.mxu0 }
 0x716   : > { %v1414_v15 = vpack.c.bf16 %v1410_v12, %v1408_v11  ;;  %v1642_v11 = vld [vmem:[#allocation13 + $0xa8] sm:$0xff] }
 0x718   : > { %1476 = vmatmul.bf16.gmra.mxu3 %v1414_v15 }
 0x78b   : > { %v1472_v16 = vpop.f32.mrf.mxu3 }
 0x78c   : > { %v1492_v29 = vmul.f32 %v1483_v24, %v1472_v16  ;;  %v1641_v16 = vld [vmem:[#allocation13 + $0xa0] sm:$0xff] }
 0x78d   : > { %v1646_v24 = vld [vmem:[#allocation14 + $0xa0] sm:$0xff] }
 0x78e   : > { %v1496_v37 = vadd.f32 %v1492_v29, %v1488_v31 }
 0x790   : > { %v1504_v45 = vmul.f32 0.01, %v1496_v37  ;;  %vm1500_vm10 = vcmp.ge.f32.partialorder %v1496_v37, 0.0 }
 0x792   : > { %v1508_v53 = vsel %vm1500_vm10, %v1496_v37, %v1504_v45 }
 0x793   : > { %v1474_v17 = vpop.f32.mrf.mxu3 }
 0x794   : > { %v1493_v26 = vmul.f32 %v1484_v22, %v1474_v17  ;;  %v1648_v17 = vld [vmem:[#allocation14 + $0xb0] sm:$0xff] }
 0x796   : > { %v1497_v34 = vadd.f32 %v1493_v26, %v1489_v27 }
 0x798   : > { %v1505_v41 = vmul.f32 0.01, %v1497_v34  ;;  %vm1501_vm9 = vcmp.ge.f32.partialorder %v1497_v34, 0.0 }
 0x79a   : > { %v1509_v52 = vsel %vm1501_vm9, %v1497_v34, %v1505_v41  ;;  %v5647_v34 = vld [vmem:[#allocation11 + $0x1b8] sm:$0xff] }
 0x79b   : > { %v1477_v20 = vpop.f32.mrf.mxu3  ;;  %v1534_v55 = vpack.c.bf16 %v1509_v52, %v1508_v53  ;;  %1783 = vmatpush.bf16.msrb.mxu3 %v5647_v34  ;;  %v5644_v52 = vld [vmem:[#allocation11 + $0x1a0] sm:$0xff] }
 0x79c   : > { %v1494_v23 = vmul.f32 %v1485_v21, %v1477_v20  ;;  %v1647_v21 = vld [vmem:[#allocation14 + $0xa8] sm:$0xff] }
 0x79e   : > { %v1498_v30 = vadd.f32 %v1494_v23, %v1490_v25  ;;  %v1644_v25 = vld [vmem:[#allocation13 + $0xb8] sm:$0xff] }
 0x7a0   : > { %v1506_v38 = vmul.f32 0.01, %v1498_v30  ;;  %vm1502_vm7 = vcmp.ge.f32.partialorder %v1498_v30, 0.0 }
 0x7a2   : > { %v1510_v48 = vsel %vm1502_vm7, %v1498_v30, %v1506_v38  ;;  %v5646_v38 = vld [vmem:[#allocation11 + $0x1b0] sm:$0xff] }
 0x7a3   : > { %v1479_v32 = vpop.f32.mrf.mxu3  ;;  %1784 = vmatpush.bf16.msrb.mxu3 %v5646_v38  ;;  %v5655_v38 = vld [vmem:[#allocation11 + $0x1e8] sm:$0xff] }
 0x7a4   : > { %v1495_v35 = vmul.f32 %v1486_v28, %v1479_v32  ;;  %v1649_v28 = vld [vmem:[#allocation14 + $0xb8] sm:$0xff] }
 0x7a6   : > { %v1499_v39 = vadd.f32 %v1495_v35, %v1491_v33 }
 0x7a8   : > { %vm1503_vm8 = vcmp.ge.f32.partialorder %v1499_v39, 0.0  ;;  %v1507_v44 = vmul.f32 0.01, %v1499_v39 }
 0x7aa   : > { %v1511_v49 = vsel %vm1503_vm8, %v1499_v39, %v1507_v44 }
 0x7ab   : > { %v1535_v51 = vpack.c.bf16 %v1511_v49, %v1510_v48  ;;  %v5645_v48 = vld [vmem:[#allocation11 + $0x1a8] sm:$0xff] }
 0x7ac   : > { %1785 = vmatpush.bf16.msrb.mxu3 %v5645_v48  ;;  %v5654_v48 = vld [vmem:[#allocation11 + $0x1e0] sm:$0xff] }
 0x7ad   : > { %1558 = vmatpush.bf16.msrb.mxu1 %v1535_v51 }
 0x7b0   : > { %1786 = vmatpush.bf16.msrb.mxu3 %v5644_v52  ;;  %v5648_v52 = vld [vmem:[#allocation10 + $0x70] sm:$0xff] }
 0x7b1   : > { %1559 = vmatpush.bf16.msrb.mxu1 %v1534_v55  ;;  %v5643_v55 = vld [vmem:[#allocation11 + $0x198] sm:$0xff] }
 0x7b4   : > { %4819 = vmatmul.msk.bf16.vlgmr.msrb.gmra.mxu1 %vm749_vm5, %v5628_v56  ;;  %1787 = vmatpush.bf16.msrb.mxu3 %v5643_v55  ;;  %v5639_v56 = vld [vmem:[#allocation10 + $0x68] sm:$0xff]  ;;  %v5652_v55 = vld [vmem:[#allocation11 + $0x1d0] sm:$0xff] }
 0x7b8   : > { %1788 = vmatpush.bf16.msrb.mxu3 %v5642_v59  ;;  %v5650_v59 = vld [vmem:[#allocation11 + $0x1c0] sm:$0xff] }
 0x7c4   : > { %4820 = vmatmul.msk.bf16.gmra.mxu1 %vm749_vm5, %v5629_v60  ;;  %v5641_v60 = vld [vmem:[#allocation11 + $0x188] sm:$0xff] }
 0x7c5   : > { %1789 = vmatpush.bf16.msrb.mxu3 %v5641_v60 }
 0x7c9   : > { %1790 = vmatpush.bf16.msrb.mxu3 %v5640_v61 }
 0x831   : > { %v1561_v2 = vpop.f32.mrf.mxu1 }
 0x839   : > { %v1563_v3 = vpop.f32.mrf.mxu1 }
 0x83a   : > { %v1571_v4 = vpack.c.bf16 %v1563_v3, %v1561_v2 }
 0x83c   : > { %1629 = vmatmul.bf16.vlgmr.msrb.gmra.mxu2 %v1571_v4 }
 0x841   : > { %v1566_v5 = vpop.f32.mrf.mxu1 }
 0x849   : > { %v1568_v6 = vpop.f32.mrf.mxu1 }
 0x84a   : > { %v1572_v7 = vpack.c.bf16 %v1568_v6, %v1566_v5 }
 0x84c   : > { %1634 = vmatmul.bf16.gmra.mxu2 %v1572_v7 }
 0x8bf   : > { %v1630_v8 = vpop.f32.mrf.mxu2 }
 0x8c0   : > { %v1650_v22 = vmul.f32 %v1641_v16, %v1630_v8 }
 0x8c2   : > { %v1654_v29 = vadd.f32 %v1650_v22, %v1646_v24 }
 0x8c4   : > { %v1662_v35 = vmul.f32 0.01, %v1654_v29  ;;  %vm1658_vm14 = vcmp.ge.f32.partialorder %v1654_v29, 0.0 }
 0x8c6   : > { %v1666_v45 = vsel %vm1658_vm14, %v1654_v29, %v1662_v35 }
 0x8c7   : > { %v1632_v9 = vpop.f32.mrf.mxu2  ;;  %v6645_v51 = vadd.f32 %v1666_v45, %v6625_v63 }
 0x8c8   : > { %v1651_v20 = vmul.f32 %v1642_v11, %v1632_v9  ;;  %v1805_v9 = vld [vmem:[#allocation13 + $0xd0] sm:$0xff] }
 0x8ca   : > { %v1655_v26 = vadd.f32 %v1651_v20, %v1647_v21  ;;  %v1806_v20 = vld [vmem:[#allocation13 + $0xd8] sm:$0xff] }
 0x8cc   : > { %v1663_v32 = vmul.f32 0.01, %v1655_v26  ;;  %vm1659_vm12 = vcmp.ge.f32.partialorder %v1655_v26, 0.0 }
 0x8ce   : > { %v1667_v39 = vsel %vm1659_vm12, %v1655_v26, %v1663_v32  ;;  %v5656_v32 = vld [vmem:[#allocation11 + $0x1f0] sm:$0xff] }
 0x8cf   : > { %v1635_v12 = vpop.f32.mrf.mxu2  ;;  %v6642_v50 = vadd.f32 %v1667_v39, %v6622_v62 }
 0x8d0   : > { %v1652_v15 = vmul.f32 %v1643_v10, %v1635_v12  ;;  %v1804_v10 = vld [vmem:[#allocation13 + $0xc8] sm:$0xff]  ;;  %v1803_v12 = vld [vmem:[#allocation13 + $0xc0] sm:$0xff] }
 0x8d1   : > { %v1696_v53 = vpack.c.bf16 %v6642_v50, %v6645_v51 }
 0x8d2   : > { %v1656_v23 = vadd.f32 %v1652_v15, %v1648_v17  ;;  %v1810_v15 = vld [vmem:[#allocation14 + $0xd0] sm:$0xff]  ;;  %v1809_v17 = vld [vmem:[#allocation14 + $0xc8] sm:$0xff] }
 0x8d4   : > { %v1664_v30 = vmul.f32 0.01, %v1656_v23  ;;  %vm1660_vm11 = vcmp.ge.f32.partialorder %v1656_v23, 0.0 }
 0x8d6   : > { %v1668_v36 = vsel %vm1660_vm11, %v1656_v23, %v1664_v30  ;;  %v1808_v23 = vld [vmem:[#allocation14 + $0xc0] sm:$0xff] }
 0x8d7   : > { %v1637_v27 = vpop.f32.mrf.mxu2  ;;  %v6634_v41 = vadd.f32 %v1668_v36, %v6614_v57 }
 0x8d8   : > { %v1653_v31 = vmul.f32 %v1644_v25, %v1637_v27  ;;  %v1811_v25 = vld [vmem:[#allocation14 + $0xd8] sm:$0xff] }
 0x8da   : > { %v1657_v33 = vadd.f32 %v1653_v31, %v1649_v28  ;;  %v5657_v28 = vld [vmem:[#allocation11 + $0x1f8] sm:$0xff] }
 0x8db   : > { %1941 = vmatpush.bf16.msra.mxu2 %v5657_v28 }
 0x8dc   : > { %vm1661_vm13 = vcmp.ge.f32.partialorder %v1657_v33, 0.0  ;;  %v1665_v37 = vmul.f32 0.01, %v1657_v33 }
 0x8de   : > { %v1669_v40 = vsel %vm1661_vm13, %v1657_v33, %v1665_v37 }
 0x8df   : > { %v6637_v44 = vadd.f32 %v1669_v40, %v6617_v58  ;;  %1942 = vmatpush.bf16.msra.mxu2 %v5656_v32 }
 0x8e1   : > { %v1697_v49 = vpack.c.bf16 %v6637_v44, %v6634_v41 }
 0x8e3   : > { %1720 = vmatpush.bf16.msrb.mxu0 %v1697_v49  ;;  %1943 = vmatpush.bf16.msra.mxu2 %v5655_v38 }
 0x8e7   : > { %1721 = vmatpush.bf16.msrb.mxu0 %v1696_v53  ;;  %1944 = vmatpush.bf16.msra.mxu2 %v5654_v48  ;;  %v5653_v53 = vld [vmem:[#allocation11 + $0x1d8] sm:$0xff] }
 0x8ea   : > { %4861 = vmatmul.msk.bf16.vlgmr.msrb.gmra.mxu0 %vm749_vm5, %v5638_v54  ;;  %v5649_v54 = vld [vmem:[#allocation10 + $0x78] sm:$0xff] }
 0x8eb   : > { %1945 = vmatpush.bf16.msra.mxu2 %v5653_v53 }
 0x8ef   : > { %1946 = vmatpush.bf16.msra.mxu2 %v5652_v55  ;;  %v5663_v55 = vld [vmem:[#allocation11 + $0x218] sm:$0xff] }
 0x8fa   : > { %4862 = vmatmul.msk.bf16.gmra.mxu0 %vm749_vm5, %v5639_v56  ;;  %v5651_v56 = vld [vmem:[#allocation11 + $0x1c8] sm:$0xff] }
 0x8fb   : > { %1947 = vmatpush.bf16.msra.mxu2 %v5651_v56  ;;  %v5659_v56 = vld [vmem:[#allocation10 + $0x88] sm:$0xff] }
 0x8ff   : > { %1948 = vmatpush.bf16.msra.mxu2 %v5650_v59  ;;  %v5662_v59 = vld [vmem:[#allocation11 + $0x210] sm:$0xff] }
 0x967   : > { %v1723_v0 = vpop.f32.mrf.mxu0 }
 0x96f   : > { %v1725_v1 = vpop.f32.mrf.mxu0 }
 0x970   : > { %v1733_v2 = vpack.c.bf16 %v1725_v1, %v1723_v0 }
 0x972   : > { %1791 = vmatmul.bf16.vlgmr.msrb.gmra.mxu3 %v1733_v2 }
 0x977   : > { %v1728_v3 = vpop.f32.mrf.mxu0 }
 0x97f   : > { %v1730_v4 = vpop.f32.mrf.mxu0 }
 0x980   : > { %v1734_v5 = vpack.c.bf16 %v1730_v4, %v1728_v3 }
 0x982   : > { %1796 = vmatmul.bf16.gmra.mxu3 %v1734_v5 }
 0x9f5   : > { %v1792_v6 = vpop.f32.mrf.mxu3 }
 0x9f6   : > { %v1812_v21 = vmul.f32 %v1803_v12, %v1792_v6  ;;  %v1963_v6 = vld [vmem:[#allocation13 + $0xf0] sm:$0xff] }
 0x9f8   : > { %v1816_v29 = vadd.f32 %v1812_v21, %v1808_v23  ;;  %v1964_v21 = vld [vmem:[#allocation13 + $0xf8] sm:$0xff] }
 0x9fa   : > { %v1824_v35 = vmul.f32 0.01, %v1816_v29  ;;  %vm1820_vm2 = vcmp.ge.f32.partialorder %v1816_v29, 0.0 }
 0x9fc   : > { %v1828_v45 = vsel %vm1820_vm2, %v1816_v29, %v1824_v35 }
 0x9fd   : > { %v1794_v7 = vpop.f32.mrf.mxu3 }
 0x9fe   : > { %v1813_v16 = vmul.f32 %v1804_v10, %v1794_v7  ;;  %v1962_v7 = vld [vmem:[#allocation13 + $0xe8] sm:$0xff]  ;;  %v1961_v10 = vld [vmem:[#allocation13 + $0xe0] sm:$0xff] }
 0xa00   : > { %v1817_v26 = vadd.f32 %v1813_v16, %v1809_v17 }
 0xa02   : > { %v1825_v33 = vmul.f32 0.01, %v1817_v26  ;;  %vm1821_vm1 = vcmp.ge.f32.partialorder %v1817_v26, 0.0 }
 0xa04   : > { %v1829_v40 = vsel %vm1821_vm1, %v1817_v26, %v1825_v33 }
 0xa05   : > { %v1797_v8 = vpop.f32.mrf.mxu3  ;;  %v1854_v49 = vpack.c.bf16 %v1829_v40, %v1828_v45  ;;  %v5665_v40 = vld [vmem:[#allocation11 + $0x228] sm:$0xff] }
 0xa06   : > { %v1814_v11 = vmul.f32 %v1805_v9, %v1797_v8 }
 0xa08   : > { %v1818_v22 = vadd.f32 %v1814_v11, %v1810_v15  ;;  %v1968_v11 = vld [vmem:[#allocation14 + $0xf0] sm:$0xff]  ;;  %v1967_v15 = vld [vmem:[#allocation14 + $0xe8] sm:$0xff] }
 0xa0a   : > { %v1826_v30 = vmul.f32 0.01, %v1818_v22  ;;  %vm1822_vm15 = vcmp.ge.f32.partialorder %v1818_v22, 0.0 }
 0xa0c   : > { %v1830_v36 = vsel %vm1822_vm15, %v1818_v22, %v1826_v30  ;;  %v5667_v30 = vld [vmem:[#allocation11 + $0x238] sm:$0xff] }
 0xa0d   : > { %v1799_v24 = vpop.f32.mrf.mxu3  ;;  %2103 = vmatpush.bf16.msra.mxu3 %v5667_v30 }
 0xa0e   : > { %v1815_v27 = vmul.f32 %v1806_v20, %v1799_v24  ;;  %v1966_v20 = vld [vmem:[#allocation14 + $0xe0] sm:$0xff]  ;;  %v1969_v24 = vld [vmem:[#allocation14 + $0xf8] sm:$0xff] }
 0xa10   : > { %v1819_v31 = vadd.f32 %v1815_v27, %v1811_v25 }
 0xa12   : > { %vm1823_vm0 = vcmp.ge.f32.partialorder %v1819_v31, 0.0  ;;  %v1827_v34 = vmul.f32 0.01, %v1819_v31 }
 0xa14   : > { %v1831_v37 = vsel %vm1823_vm0, %v1819_v31, %v1827_v34  ;;  %v5666_v34 = vld [vmem:[#allocation11 + $0x230] sm:$0xff] }
 0xa15   : > { %v1855_v39 = vpack.c.bf16 %v1831_v37, %v1830_v36  ;;  %2104 = vmatpush.bf16.msra.mxu3 %v5666_v34 }
 0xa17   : > { %1878 = vmatpush.bf16.msra.mxu1 %v1855_v39 }
 0xa19   : > { %2105 = vmatpush.bf16.msra.mxu3 %v5665_v40  ;;  %v5675_v40 = vld [vmem:[#allocation11 + $0x268] sm:$0xff] }
 0xa1b   : > { %1879 = vmatpush.bf16.msra.mxu1 %v1854_v49 }
 0xa1e   : > { %4903 = vmatmul.msk.bf16.vlgmr.msra.gmra.mxu1 %vm749_vm5, %v5648_v52  ;;  %v5664_v52 = vld [vmem:[#allocation11 + $0x220] sm:$0xff] }
 0xa1f   : > { %2106 = vmatpush.bf16.msra.mxu3 %v5664_v52 }
 0xa23   : > { %2107 = vmatpush.bf16.msra.mxu3 %v5663_v55 }
 0xa27   : > { %2108 = vmatpush.bf16.msra.mxu3 %v5662_v59  ;;  %v5673_v59 = vld [vmem:[#allocation11 + $0x258] sm:$0xff] }
 0xa2e   : > { %4904 = vmatmul.msk.bf16.gmra.mxu1 %vm749_vm5, %v5649_v54  ;;  %v5658_v54 = vld [vmem:[#allocation10 + $0x80] sm:$0xff] }
 0xa9b   : > { %v1881_v60 = vpop.f32.mrf.mxu1 }
 0xaa3   : > { %v1883_v61 = vpop.f32.mrf.mxu1 }
 0xaa4   : > { %v1891_v0 = vpack.c.bf16 %v1883_v61, %v1881_v60  ;;  %v5661_v60 = vld [vmem:[#allocation11 + $0x208] sm:$0xff]  ;;  %v5660_v61 = vld [vmem:[#allocation11 + $0x200] sm:$0xff] }
 0xaa5   : > { %2109 = vmatpush.bf16.msra.mxu3 %v5661_v60  ;;  %v5669_v60 = vld [vmem:[#allocation10 + $0x98] sm:$0xff] }
 0xaa6   : > { %1949 = vmatmul.bf16.vlgmr.msra.gmra.mxu2 %v1891_v0 }
 0xaa9   : > { %2110 = vmatpush.bf16.msra.mxu3 %v5660_v61  ;;  %v5672_v61 = vld [vmem:[#allocation11 + $0x250] sm:$0xff] }
 0xaab   : > { %v1886_v1 = vpop.f32.mrf.mxu1 }
 0xab3   : > { %v1888_v2 = vpop.f32.mrf.mxu1 }
 0xab4   : > { %v1892_v3 = vpack.c.bf16 %v1888_v2, %v1886_v1 }
 0xab6   : > { %1954 = vmatmul.bf16.gmra.mxu2 %v1892_v3 }
 0xb29   : > { %v1950_v4 = vpop.f32.mrf.mxu2 }
 0xb2a   : > { %v1970_v16 = vmul.f32 %v1961_v10, %v1950_v4  ;;  %v2124_v10 = vld [vmem:[#allocation13 + $0x108] sm:$0xff] }
 0xb2c   : > { %v1974_v25 = vadd.f32 %v1970_v16, %v1966_v20  ;;  %v2126_v20 = vld [vmem:[#allocation13 + $0x118] sm:$0xff] }
 0xb2e   : > { %v1982_v31 = vmul.f32 0.01, %v1974_v25  ;;  %vm1978_vm7 = vcmp.ge.f32.partialorder %v1974_v25, 0.0 }
 0xb30   : > { %v1986_v39 = vsel %vm1978_vm7, %v1974_v25, %v1982_v31  ;;  %v2131_v25 = vld [vmem:[#allocation14 + $0x118] sm:$0xff] }
 0xb31   : > { %v1952_v5 = vpop.f32.mrf.mxu2  ;;  %v6665_v49 = vadd.f32 %v1986_v39, %v6645_v51 }
 0xb32   : > { %v1971_v12 = vmul.f32 %v1962_v7, %v1952_v5 }
 0xb34   : > { %v1975_v22 = vadd.f32 %v1971_v12, %v1967_v15  ;;  %v2123_v12 = vld [vmem:[#allocation13 + $0x100] sm:$0xff]  ;;  %v2130_v15 = vld [vmem:[#allocation14 + $0x110] sm:$0xff] }
 0xb36   : > { %v1983_v28 = vmul.f32 0.01, %v1975_v22  ;;  %vm1979_vm4 = vcmp.ge.f32.partialorder %v1975_v22, 0.0 }
 0xb38   : > { %v1987_v35 = vsel %vm1979_vm4, %v1975_v22, %v1983_v28  ;;  %v5677_v28 = vld [vmem:[#allocation11 + $0x278] sm:$0xff] }
 0xb39   : > { %v1955_v8 = vpop.f32.mrf.mxu2  ;;  %v6662_v48 = vadd.f32 %v1987_v35, %v6642_v50  ;;  %2261 = vmatpush.bf16.msrb.mxu2 %v5677_v28  ;;  %v2289_v28 = vld [vmem:[#allocation14 + $0x138] sm:$0xff] }
 0xb3a   : > { %v1972_v9 = vmul.f32 %v1963_v6, %v1955_v8 }
 0xb3b   : > { %v2016_v53 = vpack.c.bf16 %v6662_v48, %v6665_v49 }
 0xb3c   : > { %v1976_v17 = vadd.f32 %v1972_v9, %v1968_v11  ;;  %v2125_v9 = vld [vmem:[#allocation13 + $0x110] sm:$0xff] }
 0xb3e   : > { %v1984_v26 = vmul.f32 0.01, %v1976_v17  ;;  %vm1980_vm3 = vcmp.ge.f32.partialorder %v1976_v17, 0.0 }
 0xb40   : > { %v1988_v32 = vsel %vm1980_vm3, %v1976_v17, %v1984_v26  ;;  %v2129_v17 = vld [vmem:[#allocation14 + $0x108] sm:$0xff] }
 0xb41   : > { %v1957_v23 = vpop.f32.mrf.mxu2  ;;  %v6654_v37 = vadd.f32 %v1988_v32, %v6634_v41  ;;  %v5676_v32 = vld [vmem:[#allocation11 + $0x270] sm:$0xff] }
 0xb42   : > { %v1973_v27 = vmul.f32 %v1964_v21, %v1957_v23  ;;  %v2128_v23 = vld [vmem:[#allocation14 + $0x100] sm:$0xff]  ;;  %2262 = vmatpush.bf16.msrb.mxu2 %v5676_v32 }
 0xb44   : > { %v1977_v29 = vadd.f32 %v1973_v27, %v1969_v24 }
 0xb46   : > { %vm1981_vm6 = vcmp.ge.f32.partialorder %v1977_v29, 0.0  ;;  %v1985_v33 = vmul.f32 0.01, %v1977_v29  ;;  %2263 = vmatpush.bf16.msrb.mxu2 %v5675_v40  ;;  %v5686_v40 = vld [vmem:[#allocation11 + $0x2b0] sm:$0xff] }
 0xb48   : > { %v1989_v36 = vsel %vm1981_vm6, %v1977_v29, %v1985_v33 }
 0xb49   : > { %v6657_v38 = vadd.f32 %v1989_v36, %v6637_v44 }
 0xb4b   : > { %v2017_v45 = vpack.c.bf16 %v6657_v38, %v6654_v37 }
 0xb4d   : > { %2040 = vmatpush.bf16.msra.mxu0 %v2017_v45 }
 0xb51   : > { %2041 = vmatpush.bf16.msra.mxu0 %v2016_v53 }
 0xb54   : > { %4945 = vmatmul.msk.bf16.vlgmr.msra.gmra.mxu0 %vm749_vm5, %v5658_v54  ;;  %v5674_v54 = vld [vmem:[#allocation11 + $0x260] sm:$0xff] }
 0xb55   : > { %2264 = vmatpush.bf16.msrb.mxu2 %v5674_v54 }
 0xb59   : > { %2265 = vmatpush.bf16.msrb.mxu2 %v5673_v59 }
 0xb5d   : > { %2266 = vmatpush.bf16.msrb.mxu2 %v5672_v61 }
 0xb64   : > { %4946 = vmatmul.msk.bf16.gmra.mxu0 %vm749_vm5, %v5659_v56  ;;  %v5668_v56 = vld [vmem:[#allocation10 + $0x90] sm:$0xff] }
 0xbd1   : > { %v2043_v0 = vpop.f32.mrf.mxu0 }
 0xbd9   : > { %v2045_v1 = vpop.f32.mrf.mxu0 }
 0xbda   : > { %v2053_v2 = vpack.c.bf16 %v2045_v1, %v2043_v0  ;;  %v5671_v0 = vld [vmem:[#allocation11 + $0x248] sm:$0xff]  ;;  %v5670_v1 = vld [vmem:[#allocation11 + $0x240] sm:$0xff] }
 0xbdb   : > { %2267 = vmatpush.bf16.msrb.mxu2 %v5671_v0  ;;  %v5684_v0 = vld [vmem:[#allocation11 + $0x2a0] sm:$0xff] }
 0xbdc   : > { %2111 = vmatmul.bf16.vlgmr.msra.gmra.mxu3 %v2053_v2 }
 0xbdf   : > { %2268 = vmatpush.bf16.msrb.mxu2 %v5670_v1 }
 0xbe1   : > { %v2048_v3 = vpop.f32.mrf.mxu0 }
 0xbe9   : > { %v2050_v4 = vpop.f32.mrf.mxu0 }
 0xbea   : > { %v2054_v5 = vpack.c.bf16 %v2050_v4, %v2048_v3 }
 0xbec   : > { %2116 = vmatmul.bf16.gmra.mxu3 %v2054_v5 }
 0xc5f   : > { %v2112_v6 = vpop.f32.mrf.mxu3 }
 0xc60   : > { %v2132_v21 = vmul.f32 %v2123_v12, %v2112_v6 }
 0xc62   : > { %v2136_v29 = vadd.f32 %v2132_v21, %v2128_v23  ;;  %v2287_v21 = vld [vmem:[#allocation14 + $0x128] sm:$0xff] }
 0xc64   : > { %v2144_v35 = vmul.f32 0.01, %v2136_v29  ;;  %vm2140_vm11 = vcmp.ge.f32.partialorder %v2136_v29, 0.0 }
 0xc66   : > { %v2148_v53 = vsel %vm2140_vm11, %v2136_v29, %v2144_v35 }
 0xc67   : > { %v2114_v7 = vpop.f32.mrf.mxu3 }
 0xc68   : > { %v2133_v16 = vmul.f32 %v2124_v10, %v2114_v7  ;;  %v2283_v10 = vld [vmem:[#allocation13 + $0x130] sm:$0xff] }
 0xc6a   : > { %v2137_v26 = vadd.f32 %v2133_v16, %v2129_v17  ;;  %v2281_v16 = vld [vmem:[#allocation13 + $0x120] sm:$0xff]  ;;  %v2288_v17 = vld [vmem:[#allocation14 + $0x130] sm:$0xff] }
 0xc6c   : > { %v2145_v33 = vmul.f32 0.01, %v2137_v26  ;;  %vm2141_vm10 = vcmp.ge.f32.partialorder %v2137_v26, 0.0 }
 0xc6e   : > { %v2149_v52 = vsel %vm2141_vm10, %v2137_v26, %v2145_v33 }
 0xc6f   : > { %v2117_v8 = vpop.f32.mrf.mxu3  ;;  %v2174_v55 = vpack.c.bf16 %v2149_v52, %v2148_v53 }
 0xc70   : > { %v2134_v11 = vmul.f32 %v2125_v9, %v2117_v8 }
 0xc72   : > { %v2138_v22 = vadd.f32 %v2134_v11, %v2130_v15  ;;  %v2282_v11 = vld [vmem:[#allocation13 + $0x128] sm:$0xff] }
 0xc74   : > { %v2146_v30 = vmul.f32 0.01, %v2138_v22  ;;  %vm2142_vm8 = vcmp.ge.f32.partialorder %v2138_v22, 0.0 }
 0xc76   : > { %v2150_v36 = vsel %vm2142_vm8, %v2138_v22, %v2146_v30 }
 0xc77   : > { %v2119_v24 = vpop.f32.mrf.mxu3 }
 0xc78   : > { %v2135_v27 = vmul.f32 %v2126_v20, %v2119_v24  ;;  %v2286_v24 = vld [vmem:[#allocation14 + $0x120] sm:$0xff] }
 0xc7a   : > { %v2139_v31 = vadd.f32 %v2135_v27, %v2131_v25  ;;  %v2284_v25 = vld [vmem:[#allocation13 + $0x138] sm:$0xff] }
 0xc7c   : > { %vm2143_vm9 = vcmp.ge.f32.partialorder %v2139_v31, 0.0  ;;  %v2147_v34 = vmul.f32 0.01, %v2139_v31 }
 0xc7e   : > { %v2151_v39 = vsel %vm2143_vm9, %v2139_v31, %v2147_v34  ;;  %v5687_v34 = vld [vmem:[#allocation11 + $0x2b8] sm:$0xff] }
 0xc7f   : > { %v2175_v45 = vpack.c.bf16 %v2151_v39, %v2150_v36  ;;  %2423 = vmatpush.bf16.msrb.mxu3 %v5687_v34 }
 0xc81   : > { %2198 = vmatpush.bf16.msrb.mxu1 %v2175_v45 }
 0xc83   : > { %2424 = vmatpush.bf16.msrb.mxu3 %v5686_v40 }
 0xc85   : > { %2199 = vmatpush.bf16.msrb.mxu1 %v2174_v55 }
 0xc88   : > { %4987 = vmatmul.msk.bf16.vlgmr.msrb.gmra.mxu1 %vm749_vm5, %v5668_v56  ;;  %v5685_v56 = vld [vmem:[#allocation11 + $0x2a8] sm:$0xff] }
 0xc89   : > { %2425 = vmatpush.bf16.msrb.mxu3 %v5685_v56 }
 0xc8d   : > { %2426 = vmatpush.bf16.msrb.mxu3 %v5684_v0 }
 0xc98   : > { %4988 = vmatmul.msk.bf16.gmra.mxu1 %vm749_vm5, %v5669_v60 }
 0xd05   : > { %v2201_v2 = vpop.f32.mrf.mxu1 }
 0xd0d   : > { %v2203_v3 = vpop.f32.mrf.mxu1 }
 0xd0e   : > { %v2211_v4 = vpack.c.bf16 %v2203_v3, %v2201_v2  ;;  %v5678_v2 = vld [vmem:[#allocation10 + $0xa0] sm:$0xff]  ;;  %v5683_v3 = vld [vmem:[#allocation11 + $0x298] sm:$0xff] }
 0xd0f   : > { %2427 = vmatpush.bf16.msrb.mxu3 %v5683_v3 }
 0xd10   : > { %2269 = vmatmul.bf16.vlgmr.msrb.gmra.mxu2 %v2211_v4  ;;  %v5679_v4 = vld [vmem:[#allocation10 + $0xa8] sm:$0xff] }
 0xd15   : > { %v2206_v5 = vpop.f32.mrf.mxu1 }
 0xd1d   : > { %v2208_v6 = vpop.f32.mrf.mxu1 }
 0xd1e   : > { %v2212_v7 = vpack.c.bf16 %v2208_v6, %v2206_v5  ;;  %v5682_v5 = vld [vmem:[#allocation11 + $0x290] sm:$0xff]  ;;  %v5681_v6 = vld [vmem:[#allocation11 + $0x288] sm:$0xff] }
 0xd1f   : > { %2428 = vmatpush.bf16.msrb.mxu3 %v5682_v5 }
 0xd20   : > { %2274 = vmatmul.bf16.gmra.mxu2 %v2212_v7  ;;  %v5680_v7 = vld [vmem:[#allocation11 + $0x280] sm:$0xff] }
 0xd23   : > { %2429 = vmatpush.bf16.msrb.mxu3 %v5681_v6  ;;  %v5694_v6 = vld [vmem:[#allocation11 + $0x2e0] sm:$0xff] }
 0xd27   : > { %2430 = vmatpush.bf16.msrb.mxu3 %v5680_v7 }
 0xd93   : > { %v2270_v8 = vpop.f32.mrf.mxu2 }
 0xd94   : > { %v2290_v22 = vmul.f32 %v2281_v16, %v2270_v8 }
 0xd96   : > { %v2294_v29 = vadd.f32 %v2290_v22, %v2286_v24  ;;  %v2444_v22 = vld [vmem:[#allocation13 + $0x148] sm:$0xff]  ;;  %v2443_v24 = vld [vmem:[#allocation13 + $0x140] sm:$0xff] }
 0xd98   : > { %v2302_v35 = vmul.f32 0.01, %v2294_v29  ;;  %vm2298_vm15 = vcmp.ge.f32.partialorder %v2294_v29, 0.0 }
 0xd9a   : > { %v2306_v55 = vsel %vm2298_vm15, %v2294_v29, %v2302_v35 }
 0xd9b   : > { %v2272_v9 = vpop.f32.mrf.mxu2  ;;  %v6685_v61 = vadd.f32 %v2306_v55, %v6665_v49 }
 0xd9c   : > { %v2291_v20 = vmul.f32 %v2282_v11, %v2272_v9 }
 0xd9e   : > { %v2295_v26 = vadd.f32 %v2291_v20, %v2287_v21  ;;  %v2445_v21 = vld [vmem:[#allocation13 + $0x150] sm:$0xff] }
 0xda0   : > { %v2303_v32 = vmul.f32 0.01, %v2295_v26  ;;  %vm2299_vm13 = vcmp.ge.f32.partialorder %v2295_v26, 0.0 }
 0xda2   : > { %v2307_v45 = vsel %vm2299_vm13, %v2295_v26, %v2303_v32 }
 0xda3   : > { %v2275_v12 = vpop.f32.mrf.mxu2  ;;  %v6682_v60 = vadd.f32 %v2307_v45, %v6662_v48 }
 0xda4   : > { %v2292_v15 = vmul.f32 %v2283_v10, %v2275_v12 }
 0xda5   : > { %v2336_v1 = vpack.c.bf16 %v6682_v60, %v6685_v61 }
 0xda6   : > { %v2296_v23 = vadd.f32 %v2292_v15, %v2288_v17 }
 0xda8   : > { %v2304_v30 = vmul.f32 0.01, %v2296_v23  ;;  %vm2300_vm12 = vcmp.ge.f32.partialorder %v2296_v23, 0.0 }
 0xdaa   : > { %v2308_v36 = vsel %vm2300_vm12, %v2296_v23, %v2304_v30 }
 0xdab   : > { %v2277_v27 = vpop.f32.mrf.mxu2  ;;  %v6674_v53 = vadd.f32 %v2308_v36, %v6654_v37  ;;  %v5697_v36 = vld [vmem:[#allocation11 + $0x2f8] sm:$0xff] }
 0xdac   : > { %v2293_v31 = vmul.f32 %v2284_v25, %v2277_v27  ;;  %v2450_v25 = vld [vmem:[#allocation14 + $0x150] sm:$0xff]  ;;  %v2449_v27 = vld [vmem:[#allocation14 + $0x148] sm:$0xff]  ;;  %2581 = vmatpush.bf16.msra.mxu2 %v5697_v36  ;;  %v2606_v36 = vld [vmem:[#allocation14 + $0x160] sm:$0xff] }
 0xdae   : > { %v2297_v33 = vadd.f32 %v2293_v31, %v2289_v28  ;;  %v2446_v28 = vld [vmem:[#allocation13 + $0x158] sm:$0xff]  ;;  %v2448_v31 = vld [vmem:[#allocation14 + $0x140] sm:$0xff] }
 0xdb0   : > { %vm2301_vm14 = vcmp.ge.f32.partialorder %v2297_v33, 0.0  ;;  %v2305_v39 = vmul.f32 0.01, %v2297_v33 }
 0xdb2   : > { %v2309_v52 = vsel %vm2301_vm14, %v2297_v33, %v2305_v39  ;;  %v2451_v33 = vld [vmem:[#allocation14 + $0x158] sm:$0xff] }
 0xdb3   : > { %v6677_v54 = vadd.f32 %v2309_v52, %v6657_v38  ;;  %v5696_v52 = vld [vmem:[#allocation11 + $0x2f0] sm:$0xff] }
 0xdb4   : > { %2582 = vmatpush.bf16.msra.mxu2 %v5696_v52 }
 0xdb5   : > { %v2337_v59 = vpack.c.bf16 %v6677_v54, %v6674_v53 }
 0xdb7   : > { %2360 = vmatpush.bf16.msrb.mxu0 %v2337_v59 }
 0xdbb   : > { %2361 = vmatpush.bf16.msrb.mxu0 %v2336_v1 }
 0xdbe   : > { %5029 = vmatmul.msk.bf16.vlgmr.msrb.gmra.mxu0 %vm749_vm5, %v5678_v2  ;;  %v5695_v2 = vld [vmem:[#allocation11 + $0x2e8] sm:$0xff] }
 0xdbf   : > { %2583 = vmatpush.bf16.msra.mxu2 %v5695_v2 }
 0xdc3   : > { %2584 = vmatpush.bf16.msra.mxu2 %v5694_v6  ;;  %v5707_v6 = vld [vmem:[#allocation11 + $0x338] sm:$0xff] }
 0xdc4   : > { %2747 = vmatpush.bf16.msra.mxu3 %v5707_v6 }
 0xdce   : > { %5030 = vmatmul.msk.bf16.gmra.mxu0 %vm749_vm5, %v5679_v4 }
 0xe3b   : > { %v2363_v8 = vpop.f32.mrf.mxu0 }
 0xe43   : > { %v2365_v9 = vpop.f32.mrf.mxu0 }
 0xe44   : > { %v2373_v10 = vpack.c.bf16 %v2365_v9, %v2363_v8  ;;  %v5688_v8 = vld [vmem:[#allocation10 + $0xb0] sm:$0xff]  ;;  %v5693_v9 = vld [vmem:[#allocation11 + $0x2d8] sm:$0xff] }
 0xe45   : > { %2585 = vmatpush.bf16.msra.mxu2 %v5693_v9 }
 0xe46   : > { %2431 = vmatmul.bf16.vlgmr.msrb.gmra.mxu3 %v2373_v10  ;;  %v5689_v10 = vld [vmem:[#allocation10 + $0xb8] sm:$0xff] }
 0xe4b   : > { %v2368_v11 = vpop.f32.mrf.mxu0 }
 0xe53   : > { %v2370_v12 = vpop.f32.mrf.mxu0 }
 0xe54   : > { %v2374_v15 = vpack.c.bf16 %v2370_v12, %v2368_v11  ;;  %v5692_v11 = vld [vmem:[#allocation11 + $0x2d0] sm:$0xff]  ;;  %v5691_v12 = vld [vmem:[#allocation11 + $0x2c8] sm:$0xff] }
 0xe55   : > { %2586 = vmatpush.bf16.msra.mxu2 %v5692_v11 }
 0xe56   : > { %2436 = vmatmul.bf16.gmra.mxu3 %v2374_v15  ;;  %v5690_v15 = vld [vmem:[#allocation11 + $0x2c0] sm:$0xff] }
 0xe59   : > { %2587 = vmatpush.bf16.msra.mxu2 %v5691_v12 }
 0xe5d   : > { %2588 = vmatpush.bf16.msra.mxu2 %v5690_v15 }
 0xec9   : > { %v2432_v16 = vpop.f32.mrf.mxu3 }
 0xeca   : > { %v2452_v29 = vmul.f32 %v2443_v24, %v2432_v16 }
 0xecc   : > { %v2456_v39 = vadd.f32 %v2452_v29, %v2448_v31 }
 0xece   : > { %v2464_v59 = vmul.f32 0.01, %v2456_v39  ;;  %vm2460_vm3 = vcmp.ge.f32.partialorder %v2456_v39, 0.0 }
 0xed0   : > { %v2468_v5 = vsel %vm2460_vm3, %v2456_v39, %v2464_v59 }
 0xed1   : > { %v2434_v17 = vpop.f32.mrf.mxu3 }
 0xed2   : > { %v2453_v26 = vmul.f32 %v2444_v22, %v2434_v17 }
 0xed4   : > { %v2457_v34 = vadd.f32 %v2453_v26, %v2449_v27  ;;  %v2602_v26 = vld [vmem:[#allocation13 + $0x168] sm:$0xff]  ;;  %v2603_v27 = vld [vmem:[#allocation13 + $0x170] sm:$0xff] }
 0xed6   : > { %v2465_v55 = vmul.f32 0.01, %v2457_v34  ;;  %vm2461_vm2 = vcmp.ge.f32.partialorder %v2457_v34, 0.0 }
 0xed8   : > { %v2469_v4 = vsel %vm2461_vm2, %v2457_v34, %v2465_v55 }
 0xed9   : > { %v2437_v20 = vpop.f32.mrf.mxu3  ;;  %v2494_v7 = vpack.c.bf16 %v2469_v4, %v2468_v5 }
 0xeda   : > { %v2454_v23 = vmul.f32 %v2445_v21, %v2437_v20 }
 0xedc   : > { %v2458_v30 = vadd.f32 %v2454_v23, %v2450_v25 }
 0xede   : > { %v2466_v40 = vmul.f32 0.01, %v2458_v30  ;;  %vm2462_vm0 = vcmp.ge.f32.partialorder %v2458_v30, 0.0 }
 0xee0   : > { %v2470_v0 = vsel %vm2462_vm0, %v2458_v30, %v2466_v40  ;;  %v2608_v30 = vld [vmem:[#allocation14 + $0x170] sm:$0xff]  ;;  %v2604_v40 = vld [vmem:[#allocation13 + $0x178] sm:$0xff] }
 0xee1   : > { %v2439_v32 = vpop.f32.mrf.mxu3 }
 0xee2   : > { %v2455_v35 = vmul.f32 %v2446_v28, %v2439_v32  ;;  %v2601_v28 = vld [vmem:[#allocation13 + $0x160] sm:$0xff] }
 0xee4   : > { %v2459_v45 = vadd.f32 %v2455_v35, %v2451_v33  ;;  %v2607_v33 = vld [vmem:[#allocation14 + $0x168] sm:$0xff] }
 0xee6   : > { %vm2463_vm1 = vcmp.ge.f32.partialorder %v2459_v45, 0.0  ;;  %v2467_v56 = vmul.f32 0.01, %v2459_v45 }
 0xee8   : > { %v2471_v1 = vsel %vm2463_vm1, %v2459_v45, %v2467_v56  ;;  %v2609_v56 = vld [vmem:[#allocation14 + $0x178] sm:$0xff] }
 0xee9   : > { %v2495_v3 = vpack.c.bf16 %v2471_v1, %v2470_v0 }
 0xeeb   : > { %2518 = vmatpush.bf16.msra.mxu1 %v2495_v3 }
 0xeef   : > { %2519 = vmatpush.bf16.msra.mxu1 %v2494_v7 }
 0xef2   : > { %5071 = vmatmul.msk.bf16.vlgmr.msra.gmra.mxu1 %vm749_vm5, %v5688_v8 }
 0xf02   : > { %5072 = vmatmul.msk.bf16.gmra.mxu1 %vm749_vm5, %v5689_v10  ;;  %v5706_v10 = vld [vmem:[#allocation11 + $0x330] sm:$0xff] }
 0xf03   : > { %2748 = vmatpush.bf16.msra.mxu3 %v5706_v10 }
 0xf6f   : > { %v2521_v16 = vpop.f32.mrf.mxu1 }
 0xf77   : > { %v2523_v17 = vpop.f32.mrf.mxu1 }
 0xf78   : > { %v2531_v20 = vpack.c.bf16 %v2523_v17, %v2521_v16 }
 0xf7a   : > { %2589 = vmatmul.bf16.vlgmr.msra.gmra.mxu2 %v2531_v20  ;;  %v5705_v20 = vld [vmem:[#allocation11 + $0x328] sm:$0xff] }
 0xf7b   : > { %2749 = vmatpush.bf16.msra.mxu3 %v5705_v20 }
 0xf7f   : > { %v2526_v21 = vpop.f32.mrf.mxu1 }
 0xf87   : > { %v2528_v22 = vpop.f32.mrf.mxu1 }
 0xf88   : > { %v2532_v23 = vpack.c.bf16 %v2528_v22, %v2526_v21 }
 0xf8a   : > { %2594 = vmatmul.bf16.gmra.mxu2 %v2532_v23 }
 0xffd   : > { %v2590_v24 = vpop.f32.mrf.mxu2 }
 0xffe   : > { %v2610_v34 = vmul.f32 %v2601_v28, %v2590_v24  ;;  %v5698_v24 = vld [vmem:[#allocation10 + $0xc0] sm:$0xff] }
0x1000   : > { %v2614_v45 = vadd.f32 %v2610_v34, %v2606_v36 }
0x1002   : > { %v2622_v1 = vmul.f32 0.01, %v2614_v45  ;;  %vm2618_vm7 = vcmp.ge.f32.partialorder %v2614_v45, 0.0 }
0x1004   : > { %v2626_v8 = vsel %vm2618_vm7, %v2614_v45, %v2622_v1 }
0x1005   : > { %v2592_v25 = vpop.f32.mrf.mxu2  ;;  %v2630_v17 = vadd.f32 %v2626_v8, %v6685_v61  ;;  %v5717_v8 = vld [vmem:[#allocation11 + $0x378] sm:$0xff] }
0x1006   : > { %v2611_v31 = vmul.f32 %v2602_v26, %v2592_v25  ;;  %v5703_v25 = vld [vmem:[#allocation11 + $0x318] sm:$0xff]  ;;  %v5699_v26 = vld [vmem:[#allocation10 + $0xc8] sm:$0xff]  ;;  %2905 = vmatpush.bf16.msrb.mxu2 %v5717_v8  ;;  %v2930_v8 = vld [vmem:[#allocation14 + $0x1a0] sm:$0xff] }
0x1007   : > { %v6709_v23 = vadd.f32 %v2630_v17, %v6685_v61  ;;  %v5700_v61 = vld [vmem:[#allocation11 + $0x300] sm:$0xff] }
0x1008   : > { %v2615_v39 = vadd.f32 %v2611_v31, %v2607_v33 }
0x100a   : > { %v2623_v59 = vmul.f32 0.01, %v2615_v39  ;;  %vm2619_vm6 = vcmp.ge.f32.partialorder %v2615_v39, 0.0 }
0x100c   : > { %v2627_v4 = vsel %vm2619_vm6, %v2615_v39, %v2623_v59  ;;  %v2769_v39 = vld [vmem:[#allocation13 + $0x190] sm:$0xff]  ;;  %v2773_v59 = vld [vmem:[#allocation14 + $0x188] sm:$0xff] }
0x100d   : > { %v2595_v29 = vpop.f32.mrf.mxu2  ;;  %v2631_v12 = vadd.f32 %v2627_v4, %v6682_v60 }
0x100e   : > { %v2612_v32 = vmul.f32 %v2603_v27, %v2595_v29  ;;  %v5701_v27 = vld [vmem:[#allocation11 + $0x308] sm:$0xff] }
0x100f   : > { %v6706_v22 = vadd.f32 %v2631_v12, %v6682_v60  ;;  %v5702_v60 = vld [vmem:[#allocation11 + $0x310] sm:$0xff] }
0x1010   : > { %v2616_v35 = vadd.f32 %v2612_v32, %v2608_v30  ;;  %v5716_v12 = vld [vmem:[#allocation11 + $0x370] sm:$0xff] }
0x1011   : > { %2906 = vmatpush.bf16.msrb.mxu2 %v5716_v12 }
0x1012   : > { %v2624_v52 = vmul.f32 0.01, %v2616_v35  ;;  %vm2620_vm4 = vcmp.ge.f32.partialorder %v2616_v35, 0.0 }
0x1014   : > { %v2628_v2 = vsel %vm2620_vm4, %v2616_v35, %v2624_v52  ;;  %v2767_v52 = vld [vmem:[#allocation13 + $0x180] sm:$0xff] }
0x1015   : > { %v2597_v55 = vpop.f32.mrf.mxu2  ;;  %v2632_v7 = vadd.f32 %v2628_v2, %v6674_v53 }
0x1016   : > { %v2613_v0 = vmul.f32 %v2604_v40, %v2597_v55  ;;  %v2768_v40 = vld [vmem:[#allocation13 + $0x188] sm:$0xff]  ;;  %v2774_v55 = vld [vmem:[#allocation14 + $0x190] sm:$0xff] }
0x1017   : > { %v6697_v15 = vadd.f32 %v2632_v7, %v6674_v53  ;;  %v5704_v53 = vld [vmem:[#allocation11 + $0x320] sm:$0xff] }
0x1018   : > { %v2617_v3 = vadd.f32 %v2613_v0, %v2609_v56  ;;  %2750 = vmatpush.bf16.msra.mxu3 %v5704_v53  ;;  %v2770_v0 = vld [vmem:[#allocation13 + $0x198] sm:$0xff] }
0x101a   : > { %vm2621_vm8 = vcmp.ge.f32.partialorder %v2617_v3, 0.0  ;;  %v2625_v5 = vmul.f32 0.01, %v2617_v3 }
0x101c   : > { %v2629_v9 = vsel %vm2621_vm8, %v2617_v3, %v2625_v5  ;;  %2751 = vmatpush.bf16.msra.mxu3 %v5703_v25  ;;  %v2772_v3 = vld [vmem:[#allocation14 + $0x180] sm:$0xff]  ;;  %v2775_v5 = vld [vmem:[#allocation14 + $0x198] sm:$0xff] }
0x101d   : > { %v2633_v11 = vadd.f32 %v2629_v9, %v6677_v54 }
0x101f   : > { %v6700_v16 = vadd.f32 %v2633_v11, %v6677_v54  ;;  %v2660_v54 = vpack.c.bf16 %v6706_v22, %v6709_v23 }
0x1020   : > { %2752 = vmatpush.bf16.msra.mxu3 %v5702_v60 }
0x1021   : > { %v2661_v21 = vpack.c.bf16 %v6700_v16, %v6697_v15 }
0x1023   : > { %2684 = vmatpush.bf16.msra.mxu0 %v2661_v21 }
0x1024   : > { %2753 = vmatpush.bf16.msra.mxu3 %v5701_v27  ;;  %v5714_v27 = vld [vmem:[#allocation11 + $0x360] sm:$0xff] }
0x1027   : > { %2685 = vmatpush.bf16.msra.mxu0 %v2660_v54 }
0x1028   : > { %2754 = vmatpush.bf16.msra.mxu3 %v5700_v61 }
0x102a   : > { %5113 = vmatmul.msk.bf16.vlgmr.msra.gmra.mxu0 %vm749_vm5, %v5698_v24  ;;  %v5715_v24 = vld [vmem:[#allocation11 + $0x368] sm:$0xff] }
0x102b   : > { %2907 = vmatpush.bf16.msrb.mxu2 %v5715_v24 }
0x102f   : > { %2908 = vmatpush.bf16.msrb.mxu2 %v5714_v27  ;;  %v5727_v27 = vld [vmem:[#allocation11 + $0x3b8] sm:$0xff] }
0x1030   : > { %3071 = vmatpush.bf16.msrb.mxu3 %v5727_v27 }
0x103a   : > { %5114 = vmatmul.msk.bf16.gmra.mxu0 %vm749_vm5, %v5699_v26 }
0x10a7   : > { %v2687_v28 = vpop.f32.mrf.mxu0 }
0x10af   : > { %v2689_v29 = vpop.f32.mrf.mxu0 }
0x10b0   : > { %v2697_v30 = vpack.c.bf16 %v2689_v29, %v2687_v28  ;;  %v5708_v28 = vld [vmem:[#allocation10 + $0xd0] sm:$0xff]  ;;  %v5713_v29 = vld [vmem:[#allocation11 + $0x358] sm:$0xff] }
0x10b1   : > { %2909 = vmatpush.bf16.msrb.mxu2 %v5713_v29 }
0x10b2   : > { %2755 = vmatmul.bf16.vlgmr.msra.gmra.mxu3 %v2697_v30  ;;  %v5709_v30 = vld [vmem:[#allocation10 + $0xd8] sm:$0xff] }
0x10b7   : > { %v2692_v31 = vpop.f32.mrf.mxu0 }
0x10bf   : > { %v2694_v32 = vpop.f32.mrf.mxu0 }
0x10c0   : > { %v2698_v33 = vpack.c.bf16 %v2694_v32, %v2692_v31  ;;  %v5712_v31 = vld [vmem:[#allocation11 + $0x350] sm:$0xff]  ;;  %v5711_v32 = vld [vmem:[#allocation11 + $0x348] sm:$0xff] }
0x10c1   : > { %2910 = vmatpush.bf16.msrb.mxu2 %v5712_v31 }
0x10c2   : > { %2760 = vmatmul.bf16.gmra.mxu3 %v2698_v33  ;;  %v5710_v33 = vld [vmem:[#allocation11 + $0x340] sm:$0xff] }
0x10c5   : > { %2911 = vmatpush.bf16.msrb.mxu2 %v5711_v32 }
0x10c9   : > { %2912 = vmatpush.bf16.msrb.mxu2 %v5710_v33 }
0x1135   : > { %v2756_v34 = vpop.f32.mrf.mxu3 }
0x1136   : > { %v2776_v1 = vmul.f32 %v2767_v52, %v2756_v34 }
0x1138   : > { %v2780_v9 = vadd.f32 %v2776_v1, %v2772_v3 }
0x113a   : > { %v2788_v21 = vmul.f32 0.01, %v2780_v9  ;;  %vm2784_vm12 = vcmp.ge.f32.partialorder %v2780_v9, 0.0 }
0x113c   : > { %v2792_v60 = vsel %vm2784_vm12, %v2780_v9, %v2788_v21 }
0x113d   : > { %v2758_v35 = vpop.f32.mrf.mxu3 }
0x113e   : > { %v2777_v56 = vmul.f32 %v2768_v40, %v2758_v35 }
0x1140   : > { %v2781_v6 = vadd.f32 %v2777_v56, %v2773_v59  ;;  %v2926_v56 = vld [vmem:[#allocation13 + $0x1a8] sm:$0xff]  ;;  %v2927_v59 = vld [vmem:[#allocation13 + $0x1b0] sm:$0xff] }
0x1142   : > { %v2789_v17 = vmul.f32 0.01, %v2781_v6  ;;  %vm2785_vm11 = vcmp.ge.f32.partialorder %v2781_v6, 0.0 }
0x1144   : > { %v2793_v26 = vsel %vm2785_vm11, %v2781_v6, %v2789_v17 }
0x1145   : > { %v2761_v36 = vpop.f32.mrf.mxu3  ;;  %v2818_v61 = vpack.c.bf16 %v2793_v26, %v2792_v60 }
0x1146   : > { %v2778_v45 = vmul.f32 %v2769_v39, %v2761_v36 }
0x1148   : > { %v2782_v2 = vadd.f32 %v2778_v45, %v2774_v55 }
0x114a   : > { %v2790_v10 = vmul.f32 0.01, %v2782_v2  ;;  %vm2786_vm9 = vcmp.ge.f32.partialorder %v2782_v2, 0.0 }
0x114c   : > { %v2794_v53 = vsel %vm2786_vm9, %v2782_v2, %v2790_v10  ;;  %v2932_v2 = vld [vmem:[#allocation14 + $0x1b0] sm:$0xff]  ;;  %v2928_v10 = vld [vmem:[#allocation13 + $0x1b8] sm:$0xff] }
0x114d   : > { %v2763_v4 = vpop.f32.mrf.mxu3 }
0x114e   : > { %v2779_v7 = vmul.f32 %v2770_v0, %v2763_v4  ;;  %v2925_v0 = vld [vmem:[#allocation13 + $0x1a0] sm:$0xff] }
0x1150   : > { %v2783_v11 = vadd.f32 %v2779_v7, %v2775_v5  ;;  %v2931_v5 = vld [vmem:[#allocation14 + $0x1a8] sm:$0xff] }
0x1152   : > { %vm2787_vm10 = vcmp.ge.f32.partialorder %v2783_v11, 0.0  ;;  %v2791_v20 = vmul.f32 0.01, %v2783_v11 }
0x1154   : > { %v2795_v54 = vsel %vm2787_vm10, %v2783_v11, %v2791_v20  ;;  %v2933_v20 = vld [vmem:[#allocation14 + $0x1b8] sm:$0xff] }
0x1155   : > { %v2819_v25 = vpack.c.bf16 %v2795_v54, %v2794_v53 }
0x1157   : > { %2842 = vmatpush.bf16.msrb.mxu1 %v2819_v25 }
0x115b   : > { %2843 = vmatpush.bf16.msrb.mxu1 %v2818_v61 }
0x115e   : > { %5155 = vmatmul.msk.bf16.vlgmr.msrb.gmra.mxu1 %vm749_vm5, %v5708_v28 }
0x116e   : > { %5156 = vmatmul.msk.bf16.gmra.mxu1 %vm749_vm5, %v5709_v30  ;;  %v5726_v30 = vld [vmem:[#allocation11 + $0x3b0] sm:$0xff] }
0x116f   : > { %3072 = vmatpush.bf16.msrb.mxu3 %v5726_v30 }
0x11db   : > { %v2845_v34 = vpop.f32.mrf.mxu1 }
0x11e3   : > { %v2847_v35 = vpop.f32.mrf.mxu1 }
0x11e4   : > { %v2855_v36 = vpack.c.bf16 %v2847_v35, %v2845_v34 }
0x11e6   : > { %2913 = vmatmul.bf16.vlgmr.msrb.gmra.mxu2 %v2855_v36  ;;  %v5725_v36 = vld [vmem:[#allocation11 + $0x3a8] sm:$0xff] }
0x11e7   : > { %3073 = vmatpush.bf16.msrb.mxu3 %v5725_v36  ;;  %v5735_v36 = vld [vmem:[#allocation11 + $0x3e8] sm:$0xff] }
0x11eb   : > { %v2850_v39 = vpop.f32.mrf.mxu1 }
0x11f3   : > { %v2852_v40 = vpop.f32.mrf.mxu1 }
0x11f4   : > { %v2856_v45 = vpack.c.bf16 %v2852_v40, %v2850_v39  ;;  %v5719_v40 = vld [vmem:[#allocation10 + $0xe8] sm:$0xff] }
0x11f6   : > { %2918 = vmatmul.bf16.gmra.mxu2 %v2856_v45  ;;  %v5721_v45 = vld [vmem:[#allocation11 + $0x388] sm:$0xff] }
0x1269   : > { %v2914_v52 = vpop.f32.mrf.mxu2 }
0x126a   : > { %v2934_v6 = vmul.f32 %v2925_v0, %v2914_v52 }
0x126c   : > { %v2938_v11 = vadd.f32 %v2934_v6, %v2930_v8  ;;  %v3092_v6 = vld [vmem:[#allocation13 + $0x1c8] sm:$0xff]  ;;  %v3091_v8 = vld [vmem:[#allocation13 + $0x1c0] sm:$0xff] }
0x126e   : > { %v2946_v54 = vmul.f32 0.01, %v2938_v11  ;;  %vm2942_vm15 = vcmp.ge.f32.partialorder %v2938_v11, 0.0 }
0x1270   : > { %v2950_v28 = vsel %vm2942_vm15, %v2938_v11, %v2946_v54  ;;  %v3097_v11 = vld [vmem:[#allocation14 + $0x1c8] sm:$0xff]  ;;  %v3099_v54 = vld [vmem:[#allocation14 + $0x1d8] sm:$0xff] }
0x1271   : > { %v2916_v55 = vpop.f32.mrf.mxu2  ;;  %v2954_v35 = vadd.f32 %v2950_v28, %v6709_v23  ;;  %v5723_v23 = vld [vmem:[#allocation11 + $0x398] sm:$0xff]  ;;  %v5736_v28 = vld [vmem:[#allocation11 + $0x3f0] sm:$0xff] }
0x1272   : > { %v2935_v3 = vmul.f32 %v2926_v56, %v2916_v55 }
0x1274   : > { %v2939_v9 = vadd.f32 %v2935_v3, %v2931_v5  ;;  %v3093_v5 = vld [vmem:[#allocation13 + $0x1d0] sm:$0xff] }
0x1276   : > { %v2947_v21 = vmul.f32 0.01, %v2939_v9  ;;  %vm2943_vm14 = vcmp.ge.f32.partialorder %v2939_v9, 0.0 }
0x1278   : > { %v2951_v26 = vsel %vm2943_vm14, %v2939_v9, %v2947_v21  ;;  %v3098_v9 = vld [vmem:[#allocation14 + $0x1d0] sm:$0xff]  ;;  %v3096_v21 = vld [vmem:[#allocation14 + $0x1c0] sm:$0xff] }
0x1279   : > { %v2919_v1 = vpop.f32.mrf.mxu2  ;;  %v2955_v32 = vadd.f32 %v2951_v26, %v6706_v22  ;;  %v5718_v22 = vld [vmem:[#allocation10 + $0xe0] sm:$0xff]  ;;  %v5737_v26 = vld [vmem:[#allocation11 + $0x3f8] sm:$0xff] }
0x127a   : > { %v2936_v4 = vmul.f32 %v2927_v59, %v2919_v1  ;;  %3229 = vmatpush.bf16.msra.mxu2 %v5737_v26 }
0x127b   : > { %v6730_v39 = vadd.f32 %v2955_v32, %v6662_v48  ;;  %v5722_v48 = vld [vmem:[#allocation11 + $0x390] sm:$0xff] }
0x127c   : > { %v2940_v7 = vadd.f32 %v2936_v4, %v2932_v2 }
0x127e   : > { %v2948_v12 = vmul.f32 0.01, %v2940_v7  ;;  %vm2944_vm13 = vcmp.ge.f32.partialorder %v2940_v7, 0.0  ;;  %3230 = vmatpush.bf16.msra.mxu2 %v5736_v28 }
0x1280   : > { %v2952_v24 = vsel %vm2944_vm13, %v2940_v7, %v2948_v12  ;;  %v3094_v12 = vld [vmem:[#allocation13 + $0x1d8] sm:$0xff] }
0x1281   : > { %v2921_v17 = vpop.f32.mrf.mxu2  ;;  %v2956_v61 = vadd.f32 %v2952_v24, %v6697_v15 }
0x1282   : > { %v2937_v53 = vmul.f32 %v2928_v10, %v2921_v17  ;;  %3231 = vmatpush.bf16.msra.mxu2 %v5735_v36  ;;  %v5747_v36 = vld [vmem:[#allocation11 + $0x438] sm:$0xff] }
0x1283   : > { %v6721_v33 = vadd.f32 %v2956_v61, %v6654_v37  ;;  %v5724_v37 = vld [vmem:[#allocation11 + $0x3a0] sm:$0xff] }
0x1284   : > { %v2941_v25 = vadd.f32 %v2937_v53, %v2933_v20  ;;  %3074 = vmatpush.bf16.msrb.mxu3 %v5724_v37 }
0x1286   : > { %vm2945_vm0 = vcmp.ge.f32.partialorder %v2941_v25, 0.0  ;;  %v2949_v60 = vmul.f32 0.01, %v2941_v25 }
0x1288   : > { %v2953_v29 = vsel %vm2945_vm0, %v2941_v25, %v2949_v60  ;;  %3075 = vmatpush.bf16.msrb.mxu3 %v5723_v23 }
0x1289   : > { %v2957_v31 = vadd.f32 %v2953_v29, %v6700_v16  ;;  %v6733_v16 = vadd.f32 %v2954_v35, %v6665_v49  ;;  %v5720_v49 = vld [vmem:[#allocation11 + $0x380] sm:$0xff] }
0x128b   : > { %v6724_v34 = vadd.f32 %v2957_v31, %v6657_v38  ;;  %v2984_v38 = vpack.c.bf16 %v6730_v39, %v6733_v16 }
0x128c   : > { %3076 = vmatpush.bf16.msrb.mxu3 %v5722_v48  ;;  %v5733_v48 = vld [vmem:[#allocation11 + $0x3d8] sm:$0xff] }
0x128d   : > { %v2985_v15 = vpack.c.bf16 %v6724_v34, %v6721_v33 }
0x128f   : > { %3008 = vmatpush.bf16.msrb.mxu0 %v2985_v15 }
0x1290   : > { %3077 = vmatpush.bf16.msrb.mxu3 %v5721_v45  ;;  %v5729_v45 = vld [vmem:[#allocation10 + $0xf8] sm:$0xff] }
0x1293   : > { %3009 = vmatpush.bf16.msrb.mxu0 %v2984_v38 }
0x1294   : > { %3078 = vmatpush.bf16.msrb.mxu3 %v5720_v49  ;;  %v5732_v49 = vld [vmem:[#allocation11 + $0x3d0] sm:$0xff] }
0x1296   : > { %5197 = vmatmul.msk.bf16.vlgmr.msrb.gmra.mxu0 %vm749_vm5, %v5718_v22  ;;  %v5734_v22 = vld [vmem:[#allocation11 + $0x3e0] sm:$0xff] }
0x1297   : > { %3232 = vmatpush.bf16.msra.mxu2 %v5734_v22  ;;  %v5746_v22 = vld [vmem:[#allocation11 + $0x430] sm:$0xff] }
0x1298   : > { %3395 = vmatpush.bf16.msra.mxu3 %v5747_v36 }
0x129b   : > { %3233 = vmatpush.bf16.msra.mxu2 %v5733_v48 }
0x129c   : > { %3396 = vmatpush.bf16.msra.mxu3 %v5746_v22  ;;  %v5755_v22 = vld [vmem:[#allocation11 + $0x468] sm:$0xff] }
0x129f   : > { %3234 = vmatpush.bf16.msra.mxu2 %v5732_v49 }
0x12a6   : > { %5198 = vmatmul.msk.bf16.gmra.mxu0 %vm749_vm5, %v5719_v40  ;;  %v5728_v40 = vld [vmem:[#allocation10 + $0xf0] sm:$0xff] }
0x1313   : > { %v3011_v52 = vpop.f32.mrf.mxu0 }
0x131b   : > { %v3013_v55 = vpop.f32.mrf.mxu0 }
0x131c   : > { %v3021_v56 = vpack.c.bf16 %v3013_v55, %v3011_v52  ;;  %v5731_v52 = vld [vmem:[#allocation11 + $0x3c8] sm:$0xff]  ;;  %v5730_v55 = vld [vmem:[#allocation11 + $0x3c0] sm:$0xff] }
0x131d   : > { %3235 = vmatpush.bf16.msra.mxu2 %v5731_v52  ;;  %v5745_v52 = vld [vmem:[#allocation11 + $0x428] sm:$0xff] }
0x131e   : > { %3079 = vmatmul.bf16.vlgmr.msrb.gmra.mxu3 %v3021_v56 }
0x131f   : > { %3397 = vmatpush.bf16.msra.mxu3 %v5745_v52  ;;  %v5754_v52 = vld [vmem:[#allocation11 + $0x460] sm:$0xff] }
0x1321   : > { %3236 = vmatpush.bf16.msra.mxu2 %v5730_v55 }
0x1323   : > { %v3016_v59 = vpop.f32.mrf.mxu0 }
0x132b   : > { %v3018_v0 = vpop.f32.mrf.mxu0 }
0x132c   : > { %v3022_v1 = vpack.c.bf16 %v3018_v0, %v3016_v59 }
0x132e   : > { %3084 = vmatmul.bf16.gmra.mxu3 %v3022_v1 }
0x13a1   : > { %v3080_v2 = vpop.f32.mrf.mxu3 }
0x13a2   : > { %v3100_v17 = vmul.f32 %v3091_v8, %v3080_v2  ;;  %v3249_v8 = vld [vmem:[#allocation13 + $0x1e0] sm:$0xff] }
0x13a4   : > { %v3104_v60 = vadd.f32 %v3100_v17, %v3096_v21  ;;  %v3255_v17 = vld [vmem:[#allocation14 + $0x1e8] sm:$0xff] }
0x13a6   : > { %v3112_v31 = vmul.f32 0.01, %v3104_v60  ;;  %vm3108_vm4 = vcmp.ge.f32.partialorder %v3104_v60, 0.0 }
0x13a8   : > { %v3116_v38 = vsel %vm3108_vm4, %v3104_v60, %v3112_v31 }
0x13a9   : > { %v3082_v3 = vpop.f32.mrf.mxu3 }
0x13aa   : > { %v3101_v10 = vmul.f32 %v3092_v6, %v3082_v3  ;;  %v3250_v6 = vld [vmem:[#allocation13 + $0x1e8] sm:$0xff] }
0x13ac   : > { %v3105_v24 = vadd.f32 %v3101_v10, %v3097_v11  ;;  %v3256_v10 = vld [vmem:[#allocation14 + $0x1f0] sm:$0xff] }
0x13ae   : > { %v3113_v29 = vmul.f32 0.01, %v3105_v24  ;;  %vm3109_vm3 = vcmp.ge.f32.partialorder %v3105_v24, 0.0 }
0x13b0   : > { %v3117_v37 = vsel %vm3109_vm3, %v3105_v24, %v3113_v29  ;;  %v3252_v24 = vld [vmem:[#allocation13 + $0x1f8] sm:$0xff] }
0x13b1   : > { %v3085_v4 = vpop.f32.mrf.mxu3  ;;  %v3142_v23 = vpack.c.bf16 %v3117_v37, %v3116_v38 }
0x13b2   : > { %v3102_v7 = vmul.f32 %v3093_v5, %v3085_v4 }
0x13b4   : > { %v3106_v20 = vadd.f32 %v3102_v7, %v3098_v9  ;;  %v3251_v7 = vld [vmem:[#allocation13 + $0x1f0] sm:$0xff] }
0x13b6   : > { %v3114_v27 = vmul.f32 0.01, %v3106_v20  ;;  %vm3110_vm1 = vcmp.ge.f32.partialorder %v3106_v20, 0.0 }
0x13b8   : > { %v3118_v32 = vsel %vm3110_vm1, %v3106_v20, %v3114_v27  ;;  %v3257_v27 = vld [vmem:[#allocation14 + $0x1f8] sm:$0xff] }
0x13b9   : > { %v3087_v53 = vpop.f32.mrf.mxu3 }
0x13ba   : > { %v3103_v25 = vmul.f32 %v3094_v12, %v3087_v53  ;;  %v3254_v53 = vld [vmem:[#allocation14 + $0x1e0] sm:$0xff] }
0x13bc   : > { %v3107_v61 = vadd.f32 %v3103_v25, %v3099_v54 }
0x13be   : > { %vm3111_vm2 = vcmp.ge.f32.partialorder %v3107_v61, 0.0  ;;  %v3115_v30 = vmul.f32 0.01, %v3107_v61 }
0x13c0   : > { %v3119_v35 = vsel %vm3111_vm2, %v3107_v61, %v3115_v30 }
0x13c1   : > { %v3143_v15 = vpack.c.bf16 %v3119_v35, %v3118_v32 }
0x13c3   : > { %3166 = vmatpush.bf16.msra.mxu1 %v3143_v15 }
0x13c7   : > { %3167 = vmatpush.bf16.msra.mxu1 %v3142_v23 }
0x13ca   : > { %5239 = vmatmul.msk.bf16.vlgmr.msra.gmra.mxu1 %vm749_vm5, %v5728_v40 }
0x13da   : > { %5240 = vmatmul.msk.bf16.gmra.mxu1 %vm749_vm5, %v5729_v45 }
0x1447   : > { %v3169_v56 = vpop.f32.mrf.mxu1 }
0x144f   : > { %v3171_v59 = vpop.f32.mrf.mxu1 }
0x1450   : > { %v3179_v0 = vpack.c.bf16 %v3171_v59, %v3169_v56  ;;  %v5739_v56 = vld [vmem:[#allocation10 + $0x108] sm:$0xff] }
0x1451   : > { %v5741_v59 = vld [vmem:[#allocation11 + $0x408] sm:$0xff] }
0x1452   : > { %3237 = vmatmul.bf16.vlgmr.msra.gmra.mxu2 %v3179_v0 }
0x1457   : > { %v3174_v1 = vpop.f32.mrf.mxu1 }
0x145f   : > { %v3176_v2 = vpop.f32.mrf.mxu1 }
0x1460   : > { %v3180_v3 = vpack.c.bf16 %v3176_v2, %v3174_v1 }
0x1462   : > { %3242 = vmatmul.bf16.gmra.mxu2 %v3180_v3 }
0x14d5   : > { %v3238_v4 = vpop.f32.mrf.mxu2 }
0x14d6   : > { %v3258_v20 = vmul.f32 %v3249_v8, %v3238_v4 }
0x14d8   : > { %v3262_v25 = vadd.f32 %v3258_v20, %v3254_v53  ;;  %v3418_v53 = vld [vmem:[#allocation13 + $0x218] sm:$0xff] }
0x14da   : > { %v3270_v29 = vmul.f32 0.01, %v3262_v25  ;;  %vm3266_vm8 = vcmp.ge.f32.partialorder %v3262_v25, 0.0 }
0x14dc   : > { %v3274_v37 = vsel %vm3266_vm8, %v3262_v25, %v3270_v29  ;;  %v3420_v25 = vld [vmem:[#allocation14 + $0x200] sm:$0xff] }
0x14dd   : > { %v3240_v5 = vpop.f32.mrf.mxu2  ;;  %v3278_v49 = vadd.f32 %v3274_v37, %v6733_v16  ;;  %v5743_v16 = vld [vmem:[#allocation11 + $0x418] sm:$0xff] }
0x14de   : > { %v3259_v11 = vmul.f32 %v3250_v6, %v3240_v5 }
0x14e0   : > { %v3263_v54 = vadd.f32 %v3259_v11, %v3255_v17  ;;  %v3422_v17 = vld [vmem:[#allocation14 + $0x210] sm:$0xff] }
0x14e2   : > { %v3271_v61 = vmul.f32 0.01, %v3263_v54  ;;  %vm3267_vm7 = vcmp.ge.f32.partialorder %v3263_v54, 0.0 }
0x14e4   : > { %v3275_v32 = vsel %vm3267_vm7, %v3263_v54, %v3271_v61 }
0x14e5   : > { %v3243_v9 = vpop.f32.mrf.mxu2  ;;  %v3279_v40 = vadd.f32 %v3275_v32, %v6730_v39  ;;  %v5738_v39 = vld [vmem:[#allocation10 + $0x100] sm:$0xff]  ;;  %v5756_v32 = vld [vmem:[#allocation11 + $0x470] sm:$0xff] }
0x14e6   : > { %v3260_v12 = vmul.f32 %v3251_v7, %v3243_v9  ;;  %v3417_v9 = vld [vmem:[#allocation13 + $0x210] sm:$0xff] }
0x14e7   : > { %v6754_v55 = vadd.f32 %v3279_v40, %v6642_v50  ;;  %v5742_v50 = vld [vmem:[#allocation11 + $0x410] sm:$0xff] }
0x14e8   : > { %v3264_v21 = vadd.f32 %v3260_v12, %v3256_v10  ;;  %v3416_v10 = vld [vmem:[#allocation13 + $0x208] sm:$0xff]  ;;  %v3415_v12 = vld [vmem:[#allocation13 + $0x200] sm:$0xff] }
0x14ea   : > { %v3272_v26 = vmul.f32 0.01, %v3264_v21  ;;  %vm3268_vm6 = vcmp.ge.f32.partialorder %v3264_v21, 0.0 }
0x14ec   : > { %v3276_v30 = vsel %vm3268_vm6, %v3264_v21, %v3272_v26  ;;  %v3421_v21 = vld [vmem:[#allocation14 + $0x208] sm:$0xff] }
0x14ed   : > { %v3245_v60 = vpop.f32.mrf.mxu2  ;;  %v3280_v15 = vadd.f32 %v3276_v30, %v6721_v33 }
0x14ee   : > { %v3261_v28 = vmul.f32 %v3252_v24, %v3245_v60  ;;  %v3423_v60 = vld [vmem:[#allocation14 + $0x218] sm:$0xff] }
0x14ef   : > { %v6745_v48 = vadd.f32 %v3280_v15, %v6634_v41  ;;  %v5744_v41 = vld [vmem:[#allocation11 + $0x420] sm:$0xff] }
0x14f0   : > { %v3265_v31 = vadd.f32 %v3261_v28, %v3257_v27  ;;  %3398 = vmatpush.bf16.msra.mxu3 %v5744_v41  ;;  %v5757_v28 = vld [vmem:[#allocation11 + $0x478] sm:$0xff]  ;;  %v5748_v41 = vld [vmem:[#allocation10 + $0x110] sm:$0xff] }
0x14f1   : > { %3553 = vmatpush.bf16.msrb.mxu2 %v5757_v28 }
0x14f2   : > { %vm3269_vm9 = vcmp.ge.f32.partialorder %v3265_v31, 0.0  ;;  %v3273_v35 = vmul.f32 0.01, %v3265_v31 }
0x14f4   : > { %v3277_v38 = vsel %vm3269_vm9, %v3265_v31, %v3273_v35  ;;  %3399 = vmatpush.bf16.msra.mxu3 %v5743_v16  ;;  %v5752_v16 = vld [vmem:[#allocation11 + $0x450] sm:$0xff] }
0x14f5   : > { %v3281_v23 = vadd.f32 %v3277_v38, %v6724_v34  ;;  %v6757_v34 = vadd.f32 %v3278_v49, %v6645_v51  ;;  %v5740_v51 = vld [vmem:[#allocation11 + $0x400] sm:$0xff]  ;;  %3554 = vmatpush.bf16.msrb.mxu2 %v5756_v32 }
0x14f7   : > { %v6748_v45 = vadd.f32 %v3281_v23, %v6637_v44  ;;  %v3308_v44 = vpack.c.bf16 %v6754_v55, %v6757_v34 }
0x14f8   : > { %3400 = vmatpush.bf16.msra.mxu3 %v5742_v50  ;;  %v5750_v50 = vld [vmem:[#allocation11 + $0x440] sm:$0xff] }
0x14f9   : > { %v3309_v33 = vpack.c.bf16 %v6748_v45, %v6745_v48  ;;  %3555 = vmatpush.bf16.msrb.mxu2 %v5755_v22  ;;  %v5766_v22 = vld [vmem:[#allocation11 + $0x4b0] sm:$0xff] }
0x14fb   : > { %3332 = vmatpush.bf16.msra.mxu0 %v3309_v33 }
0x14fc   : > { %3401 = vmatpush.bf16.msra.mxu3 %v5741_v59 }
0x14fd   : > { %3556 = vmatpush.bf16.msrb.mxu2 %v5754_v52 }
0x14ff   : > { %3333 = vmatpush.bf16.msra.mxu0 %v3308_v44  ;;  %v5753_v44 = vld [vmem:[#allocation11 + $0x458] sm:$0xff] }
0x1500   : > { %3402 = vmatpush.bf16.msra.mxu3 %v5740_v51 }
0x1501   : > { %3557 = vmatpush.bf16.msrb.mxu2 %v5753_v44 }
0x1502   : > { %5281 = vmatmul.msk.bf16.vlgmr.msra.gmra.mxu0 %vm749_vm5, %v5738_v39  ;;  %v5749_v39 = vld [vmem:[#allocation10 + $0x118] sm:$0xff] }
0x1505   : > { %3558 = vmatpush.bf16.msrb.mxu2 %v5752_v16  ;;  %v5761_v16 = vld [vmem:[#allocation11 + $0x488] sm:$0xff] }
0x1512   : > { %5282 = vmatmul.msk.bf16.gmra.mxu0 %vm749_vm5, %v5739_v56  ;;  %v5751_v56 = vld [vmem:[#allocation11 + $0x448] sm:$0xff] }
0x1513   : > { %3559 = vmatpush.bf16.msrb.mxu2 %v5751_v56 }
0x1517   : > { %3560 = vmatpush.bf16.msrb.mxu2 %v5750_v50 }
0x157f   : > { %v3335_v0 = vpop.f32.mrf.mxu0 }
0x1587   : > { %v3337_v1 = vpop.f32.mrf.mxu0 }
0x1588   : > { %v3345_v2 = vpack.c.bf16 %v3337_v1, %v3335_v0 }
0x158a   : > { %3403 = vmatmul.bf16.vlgmr.msra.gmra.mxu3 %v3345_v2 }
0x158f   : > { %v3340_v3 = vpop.f32.mrf.mxu0 }
0x1597   : > { %v3342_v4 = vpop.f32.mrf.mxu0 }
0x1598   : > { %v3346_v5 = vpack.c.bf16 %v3342_v4, %v3340_v3 }
0x159a   : > { %3408 = vmatmul.bf16.gmra.mxu3 %v3346_v5 }
0x160d   : > { %v3404_v6 = vpop.f32.mrf.mxu3 }
0x160e   : > { %v3424_v54 = vmul.f32 %v3415_v12, %v3404_v6  ;;  %v3574_v6 = vld [vmem:[#allocation13 + $0x228] sm:$0xff] }
0x1610   : > { %v3428_v29 = vadd.f32 %v3424_v54, %v3420_v25 }
0x1612   : > { %v3436_v15 = vmul.f32 0.01, %v3428_v29  ;;  %vm3432_vm13 = vcmp.ge.f32.partialorder %v3428_v29, 0.0 }
0x1614   : > { %v3440_v49 = vsel %vm3432_vm13, %v3428_v29, %v3436_v15 }
0x1615   : > { %v3406_v7 = vpop.f32.mrf.mxu3 }
0x1616   : > { %v3425_v20 = vmul.f32 %v3416_v10, %v3406_v7  ;;  %v3575_v7 = vld [vmem:[#allocation13 + $0x230] sm:$0xff] }
0x1617   : > { %v3580_v10 = vld [vmem:[#allocation14 + $0x230] sm:$0xff] }
0x1618   : > { %v3429_v27 = vadd.f32 %v3425_v20, %v3421_v21 }
0x161a   : > { %v3437_v35 = vmul.f32 0.01, %v3429_v27  ;;  %vm3433_vm12 = vcmp.ge.f32.partialorder %v3429_v27, 0.0 }
0x161c   : > { %v3441_v40 = vsel %vm3433_vm12, %v3429_v27, %v3437_v35  ;;  %v3581_v27 = vld [vmem:[#allocation14 + $0x238] sm:$0xff] }
0x161d   : > { %v3409_v8 = vpop.f32.mrf.mxu3  ;;  %v3466_v33 = vpack.c.bf16 %v3441_v40, %v3440_v49 }
0x161e   : > { %v3426_v11 = vmul.f32 %v3417_v9, %v3409_v8  ;;  %v3573_v8 = vld [vmem:[#allocation13 + $0x220] sm:$0xff] }
0x1620   : > { %v3430_v24 = vadd.f32 %v3426_v11, %v3422_v17  ;;  %v3579_v17 = vld [vmem:[#allocation14 + $0x228] sm:$0xff] }
0x1622   : > { %v3438_v30 = vmul.f32 0.01, %v3430_v24  ;;  %vm3434_vm10 = vcmp.ge.f32.partialorder %v3430_v24, 0.0 }
0x1624   : > { %v3442_v37 = vsel %vm3434_vm10, %v3430_v24, %v3438_v30  ;;  %v3576_v24 = vld [vmem:[#allocation13 + $0x238] sm:$0xff] }
0x1625   : > { %v3411_v26 = vpop.f32.mrf.mxu3 }
0x1626   : > { %v3427_v61 = vmul.f32 %v3418_v53, %v3411_v26  ;;  %v3578_v53 = vld [vmem:[#allocation14 + $0x220] sm:$0xff] }
0x1628   : > { %v3431_v31 = vadd.f32 %v3427_v61, %v3423_v60 }
0x162a   : > { %vm3435_vm11 = vcmp.ge.f32.partialorder %v3431_v31, 0.0  ;;  %v3439_v36 = vmul.f32 0.01, %v3431_v31 }
0x162c   : > { %v3443_v38 = vsel %vm3435_vm11, %v3431_v31, %v3439_v36  ;;  %v5767_v36 = vld [vmem:[#allocation11 + $0x4b8] sm:$0xff] }
0x162d   : > { %v3467_v23 = vpack.c.bf16 %v3443_v38, %v3442_v37  ;;  %3719 = vmatpush.bf16.msrb.mxu3 %v5767_v36  ;;  %v5775_v36 = vld [vmem:[#allocation11 + $0x4e8] sm:$0xff] }
0x162f   : > { %3490 = vmatpush.bf16.msrb.mxu1 %v3467_v23 }
0x1631   : > { %3720 = vmatpush.bf16.msrb.mxu3 %v5766_v22  ;;  %v5774_v22 = vld [vmem:[#allocation11 + $0x4e0] sm:$0xff] }
0x1633   : > { %3491 = vmatpush.bf16.msrb.mxu1 %v3466_v33 }
0x1636   : > { %5323 = vmatmul.msk.bf16.vlgmr.msrb.gmra.mxu1 %vm749_vm5, %v5748_v41  ;;  %v5765_v41 = vld [vmem:[#allocation11 + $0x4a8] sm:$0xff] }
0x1637   : > { %3721 = vmatpush.bf16.msrb.mxu3 %v5765_v41  ;;  %v5769_v41 = vld [vmem:[#allocation10 + $0x138] sm:$0xff] }
0x1646   : > { %5324 = vmatmul.msk.bf16.gmra.mxu1 %vm749_vm5, %v5749_v39  ;;  %v5759_v39 = vld [vmem:[#allocation10 + $0x128] sm:$0xff] }
0x16b3   : > { %v3493_v59 = vpop.f32.mrf.mxu1 }
0x16bb   : > { %v3495_v51 = vpop.f32.mrf.mxu1 }
0x16bc   : > { %v3503_v0 = vpack.c.bf16 %v3495_v51, %v3493_v59 }
0x16be   : > { %3561 = vmatmul.bf16.vlgmr.msrb.gmra.mxu2 %v3503_v0 }
0x16c3   : > { %v3498_v1 = vpop.f32.mrf.mxu1 }
0x16cb   : > { %v3500_v2 = vpop.f32.mrf.mxu1 }
0x16cc   : > { %v3504_v3 = vpack.c.bf16 %v3500_v2, %v3498_v1 }
0x16ce   : > { %3566 = vmatmul.bf16.gmra.mxu2 %v3504_v3 }
0x1741   : > { %v3562_v4 = vpop.f32.mrf.mxu2 }
0x1742   : > { %v3582_v20 = vmul.f32 %v3573_v8, %v3562_v4  ;;  %v3739_v8 = vld [vmem:[#allocation13 + $0x240] sm:$0xff] }
0x1744   : > { %v3586_v25 = vadd.f32 %v3582_v20, %v3578_v53 }
0x1746   : > { %v3594_v29 = vmul.f32 0.01, %v3586_v25  ;;  %vm3590_vm0 = vcmp.ge.f32.partialorder %v3586_v25, 0.0 }
0x1748   : > { %v3598_v37 = vsel %vm3590_vm0, %v3586_v25, %v3594_v29 }
0x1749   : > { %v3564_v5 = vpop.f32.mrf.mxu2  ;;  %v3602_v33 = vadd.f32 %v3598_v37, %v6757_v34  ;;  %v5763_v34 = vld [vmem:[#allocation11 + $0x498] sm:$0xff] }
0x174a   : > { %v3583_v11 = vmul.f32 %v3574_v6, %v3564_v5  ;;  %v3741_v5 = vld [vmem:[#allocation13 + $0x250] sm:$0xff]  ;;  %v3740_v6 = vld [vmem:[#allocation13 + $0x248] sm:$0xff] }
0x174c   : > { %v3587_v54 = vadd.f32 %v3583_v11, %v3579_v17  ;;  %v3745_v11 = vld [vmem:[#allocation14 + $0x248] sm:$0xff] }
0x174e   : > { %v3595_v61 = vmul.f32 0.01, %v3587_v54  ;;  %vm3591_vm15 = vcmp.ge.f32.partialorder %v3587_v54, 0.0 }
0x1750   : > { %v3599_v32 = vsel %vm3591_vm15, %v3587_v54, %v3595_v61  ;;  %v3747_v54 = vld [vmem:[#allocation14 + $0x258] sm:$0xff] }
0x1751   : > { %v3567_v9 = vpop.f32.mrf.mxu2  ;;  %v3603_v40 = vadd.f32 %v3599_v32, %v6754_v55  ;;  %v5758_v55 = vld [vmem:[#allocation10 + $0x120] sm:$0xff] }
0x1752   : > { %v3584_v12 = vmul.f32 %v3575_v7, %v3567_v9  ;;  %v3746_v9 = vld [vmem:[#allocation14 + $0x250] sm:$0xff] }
0x1753   : > { %v6778_v44 = vadd.f32 %v3603_v40, %v6622_v62  ;;  %v5762_v62 = vld [vmem:[#allocation11 + $0x490] sm:$0xff] }
0x1754   : > { %v3588_v21 = vadd.f32 %v3584_v12, %v3580_v10  ;;  %v3742_v12 = vld [vmem:[#allocation13 + $0x258] sm:$0xff]  ;;  %v5768_v40 = vld [vmem:[#allocation10 + $0x130] sm:$0xff] }
0x1756   : > { %v3596_v26 = vmul.f32 0.01, %v3588_v21  ;;  %vm3592_vm14 = vcmp.ge.f32.partialorder %v3588_v21, 0.0 }
0x1758   : > { %v3600_v30 = vsel %vm3592_vm14, %v3588_v21, %v3596_v26  ;;  %v3744_v21 = vld [vmem:[#allocation14 + $0x240] sm:$0xff]  ;;  %v5777_v26 = vld [vmem:[#allocation11 + $0x4f8] sm:$0xff] }
0x1759   : > { %v3569_v60 = vpop.f32.mrf.mxu2  ;;  %v3604_v15 = vadd.f32 %v3600_v30, %v6745_v48  ;;  %3877 = vmatpush.bf16.msra.mxu2 %v5777_v26 }
0x175a   : > { %v3585_v28 = vmul.f32 %v3576_v24, %v3569_v60 }
0x175b   : > { %v6769_v49 = vadd.f32 %v3604_v15, %v6614_v57  ;;  %v5764_v57 = vld [vmem:[#allocation11 + $0x4a0] sm:$0xff] }
0x175c   : > { %v3589_v31 = vadd.f32 %v3585_v28, %v3581_v27  ;;  %3722 = vmatpush.bf16.msrb.mxu3 %v5764_v57  ;;  %v5776_v28 = vld [vmem:[#allocation11 + $0x4f0] sm:$0xff]  ;;  %v5771_v57 = vld [vmem:[#allocation11 + $0x4c8] sm:$0xff] }
0x175d   : > { %3878 = vmatpush.bf16.msra.mxu2 %v5776_v28 }
0x175e   : > { %vm3593_vm1 = vcmp.ge.f32.partialorder %v3589_v31, 0.0  ;;  %v3597_v35 = vmul.f32 0.01, %v3589_v31 }
0x1760   : > { %v3601_v38 = vsel %vm3593_vm1, %v3589_v31, %v3597_v35  ;;  %3723 = vmatpush.bf16.msrb.mxu3 %v5763_v34 }
0x1761   : > { %v3605_v23 = vadd.f32 %v3601_v38, %v6748_v45  ;;  %v6781_v45 = vadd.f32 %v3602_v33, %v6625_v63  ;;  %v5760_v63 = vld [vmem:[#allocation11 + $0x480] sm:$0xff]  ;;  %3879 = vmatpush.bf16.msra.mxu2 %v5775_v36  ;;  %v5773_v33 = vld [vmem:[#allocation11 + $0x4d8] sm:$0xff] }
0x1763   : > { %v6772_v52 = vadd.f32 %v3605_v23, %v6617_v58  ;;  %v3632_v58 = vpack.c.bf16 %v6778_v44, %v6781_v45 }
0x1764   : > { %3724 = vmatpush.bf16.msrb.mxu3 %v5762_v62 }
0x1765   : > { %v3633_v48 = vpack.c.bf16 %v6772_v52, %v6769_v49  ;;  %3880 = vmatpush.bf16.msra.mxu2 %v5774_v22  ;;  %v5779_v22 = vld [vmem:[#allocation10 + $0x148] sm:$0xff] }
0x1767   : > { %3656 = vmatpush.bf16.msrb.mxu0 %v3633_v48  ;;  %v5772_v48 = vld [vmem:[#allocation11 + $0x4d0] sm:$0xff] }
0x1768   : > { %3725 = vmatpush.bf16.msrb.mxu3 %v5761_v16 }
0x1769   : > { %3881 = vmatpush.bf16.msra.mxu2 %v5773_v33 }
0x176b   : > { %3657 = vmatpush.bf16.msrb.mxu0 %v3632_v58  ;;  %v5770_v58 = vld [vmem:[#allocation11 + $0x4c0] sm:$0xff] }
0x176c   : > { %3726 = vmatpush.bf16.msrb.mxu3 %v5760_v63 }
0x176d   : > { %3882 = vmatpush.bf16.msra.mxu2 %v5772_v48 }
0x176e   : > { %5365 = vmatmul.msk.bf16.vlgmr.msrb.gmra.mxu0 %vm749_vm5, %v5758_v55 }
0x1771   : > { %3883 = vmatpush.bf16.msra.mxu2 %v5771_v57 }
0x1775   : > { %3884 = vmatpush.bf16.msra.mxu2 %v5770_v58 }
0x177e   : > { %5366 = vmatmul.msk.bf16.gmra.mxu0 %vm749_vm5, %v5759_v39 }
0x17eb   : > { %v3659_v56 = vpop.f32.mrf.mxu0 }
0x17f3   : > { %v3661_v50 = vpop.f32.mrf.mxu0 }
0x17f4   : > { %v3669_v59 = vpack.c.bf16 %v3661_v50, %v3659_v56 }
0x17f6   : > { %3727 = vmatmul.bf16.vlgmr.msrb.gmra.mxu3 %v3669_v59  ;;  %v3898_v59 = vld [vmem:[#allocation13 + $0x268] sm:$0xff] }
0x17fb   : > { %v3664_v51 = vpop.f32.mrf.mxu0 }
0x1803   : > { %v3666_v0 = vpop.f32.mrf.mxu0 }
0x1804   : > { %v3670_v1 = vpack.c.bf16 %v3666_v0, %v3664_v51  ;;  %v3899_v51 = vld [vmem:[#allocation13 + $0x270] sm:$0xff]  ;;  %v3897_v0 = vld [vmem:[#allocation13 + $0x260] sm:$0xff] }
0x1806   : > { %3732 = vmatmul.bf16.gmra.mxu3 %v3670_v1 }
0x1879   : > { %v3728_v2 = vpop.f32.mrf.mxu3 }
0x187a   : > { %v3748_v17 = vmul.f32 %v3739_v8, %v3728_v2  ;;  %v3904_v2 = vld [vmem:[#allocation14 + $0x270] sm:$0xff]  ;;  %v3902_v8 = vld [vmem:[#allocation14 + $0x260] sm:$0xff] }
0x187c   : > { %v3752_v60 = vadd.f32 %v3748_v17, %v3744_v21 }
0x187e   : > { %v3760_v31 = vmul.f32 0.01, %v3752_v60  ;;  %vm3756_vm6 = vcmp.ge.f32.partialorder %v3752_v60, 0.0 }
0x1880   : > { %v3764_v38 = vsel %vm3756_vm6, %v3752_v60, %v3760_v31 }
0x1881   : > { %v3730_v3 = vpop.f32.mrf.mxu3 }
0x1882   : > { %v3749_v10 = vmul.f32 %v3740_v6, %v3730_v3 }
0x1884   : > { %v3753_v24 = vadd.f32 %v3749_v10, %v3745_v11  ;;  %v3900_v10 = vld [vmem:[#allocation13 + $0x278] sm:$0xff] }
0x1886   : > { %v3761_v29 = vmul.f32 0.01, %v3753_v24  ;;  %vm3757_vm4 = vcmp.ge.f32.partialorder %v3753_v24, 0.0 }
0x1888   : > { %v3765_v37 = vsel %vm3757_vm4, %v3753_v24, %v3761_v29 }
0x1889   : > { %v3733_v4 = vpop.f32.mrf.mxu3  ;;  %v3790_v23 = vpack.c.bf16 %v3765_v37, %v3764_v38  ;;  %v5785_v37 = vld [vmem:[#allocation11 + $0x528] sm:$0xff] }
0x188a   : > { %v3750_v7 = vmul.f32 %v3741_v5, %v3733_v4  ;;  %v3903_v5 = vld [vmem:[#allocation14 + $0x268] sm:$0xff] }
0x188c   : > { %v3754_v20 = vadd.f32 %v3750_v7, %v3746_v9 }
0x188e   : > { %v3762_v27 = vmul.f32 0.01, %v3754_v20  ;;  %vm3758_vm2 = vcmp.ge.f32.partialorder %v3754_v20, 0.0 }
0x1890   : > { %v3766_v32 = vsel %vm3758_vm2, %v3754_v20, %v3762_v27  ;;  %v3905_v20 = vld [vmem:[#allocation14 + $0x278] sm:$0xff] }
0x1891   : > { %v3735_v53 = vpop.f32.mrf.mxu3  ;;  %v5787_v27 = vld [vmem:[#allocation11 + $0x538] sm:$0xff] }
0x1892   : > { %v3751_v25 = vmul.f32 %v3742_v12, %v3735_v53  ;;  %4043 = vmatpush.bf16.msra.mxu3 %v5787_v27  ;;  %v5794_v27 = vld [vmem:[#allocation11 + $0x560] sm:$0xff] }
0x1894   : > { %v3755_v61 = vadd.f32 %v3751_v25, %v3747_v54 }
0x1896   : > { %vm3759_vm3 = vcmp.ge.f32.partialorder %v3755_v61, 0.0  ;;  %v3763_v30 = vmul.f32 0.01, %v3755_v61 }
0x1898   : > { %v3767_v35 = vsel %vm3759_vm3, %v3755_v61, %v3763_v30  ;;  %v5786_v30 = vld [vmem:[#allocation11 + $0x530] sm:$0xff] }
0x1899   : > { %v3791_v15 = vpack.c.bf16 %v3767_v35, %v3766_v32  ;;  %4044 = vmatpush.bf16.msra.mxu3 %v5786_v30  ;;  %v5789_v30 = vld [vmem:[#allocation10 + $0x158] sm:$0xff] }
0x189b   : > { %3814 = vmatpush.bf16.msra.mxu1 %v3791_v15 }
0x189d   : > { %4045 = vmatpush.bf16.msra.mxu3 %v5785_v37 }
0x189f   : > { %3815 = vmatpush.bf16.msra.mxu1 %v3790_v23  ;;  %v5781_v23 = vld [vmem:[#allocation11 + $0x508] sm:$0xff] }
0x18a2   : > { %5407 = vmatmul.msk.bf16.vlgmr.msra.gmra.mxu1 %vm749_vm5, %v5768_v40 }
0x18b2   : > { %5408 = vmatmul.msk.bf16.gmra.mxu1 %vm749_vm5, %v5769_v41 }
0x191f   : > { %v3817_v55 = vpop.f32.mrf.mxu1 }
0x1927   : > { %v3819_v34 = vpop.f32.mrf.mxu1 }
0x1928   : > { %v3827_v39 = vpack.c.bf16 %v3819_v34, %v3817_v55 }
0x192a   : > { %3885 = vmatmul.bf16.vlgmr.msra.gmra.mxu2 %v3827_v39 }
0x192f   : > { %v3822_v62 = vpop.f32.mrf.mxu1 }
0x1937   : > { %v3824_v16 = vpop.f32.mrf.mxu1 }
0x1938   : > { %v3828_v63 = vpack.c.bf16 %v3824_v16, %v3822_v62  ;;  %v4065_v62 = vld [vmem:[#allocation13 + $0x290] sm:$0xff]  ;;  %v4064_v16 = vld [vmem:[#allocation13 + $0x288] sm:$0xff] }
0x193a   : > { %3890 = vmatmul.bf16.gmra.mxu2 %v3828_v63 }
0x19ad   : > { %v3886_v56 = vpop.f32.mrf.mxu2 }
0x19ae   : > { %v3906_v6 = vmul.f32 %v3897_v0, %v3886_v56  ;;  %v4063_v56 = vld [vmem:[#allocation13 + $0x280] sm:$0xff]  ;;  %v4066_v0 = vld [vmem:[#allocation13 + $0x298] sm:$0xff] }
0x19b0   : > { %v3910_v11 = vadd.f32 %v3906_v6, %v3902_v8  ;;  %v5797_v8 = vld [vmem:[#allocation11 + $0x578] sm:$0xff] }
0x19b1   : > { %4201 = vmatpush.bf16.msrb.mxu2 %v5797_v8  ;;  %v5802_v8 = vld [vmem:[#allocation16 + $0x18] sm:$0xff] }
0x19b2   : > { %v3918_v54 = vmul.f32 0.01, %v3910_v11  ;;  %vm3914_vm9 = vcmp.ge.f32.partialorder %v3910_v11, 0.0 }
0x19b4   : > { %v3922_v28 = vsel %vm3914_vm9, %v3910_v11, %v3918_v54 }
0x19b5   : > { %v3888_v50 = vpop.f32.mrf.mxu2  ;;  %v3926_v15 = vadd.f32 %v3922_v28, %v6781_v45  ;;  %v5783_v45 = vld [vmem:[#allocation11 + $0x518] sm:$0xff]  ;;  %v5788_v28 = vld [vmem:[#allocation10 + $0x150] sm:$0xff] }
0x19b6   : > { %v3907_v3 = vmul.f32 %v3898_v59, %v3888_v50  ;;  %v4070_v50 = vld [vmem:[#allocation14 + $0x290] sm:$0xff] }
0x19b8   : > { %v3911_v9 = vadd.f32 %v3907_v3, %v3903_v5  ;;  %v4068_v3 = vld [vmem:[#allocation14 + $0x280] sm:$0xff]  ;;  %v4071_v5 = vld [vmem:[#allocation14 + $0x298] sm:$0xff] }
0x19ba   : > { %v3919_v21 = vmul.f32 0.01, %v3911_v9  ;;  %vm3915_vm8 = vcmp.ge.f32.partialorder %v3911_v9, 0.0 }
0x19bc   : > { %v3923_v26 = vsel %vm3915_vm8, %v3911_v9, %v3919_v21 }
0x19bd   : > { %v3891_v1 = vpop.f32.mrf.mxu2  ;;  %v3927_v32 = vadd.f32 %v3923_v26, %v6778_v44  ;;  %v5778_v44 = vld [vmem:[#allocation10 + $0x140] sm:$0xff] }
0x19be   : > { %v3908_v4 = vmul.f32 %v3899_v51, %v3891_v1  ;;  %v4069_v51 = vld [vmem:[#allocation14 + $0x288] sm:$0xff] }
0x19bf   : > { %v6802_v38 = vadd.f32 %v3927_v32, %v6602_v18  ;;  %v5782_v18 = vld [vmem:[#allocation11 + $0x510] sm:$0xff]  ;;  %v5791_v32 = vld [vmem:[#allocation11 + $0x548] sm:$0xff] }
0x19c0   : > { %v3912_v7 = vadd.f32 %v3908_v4, %v3904_v2 }
0x19c2   : > { %v3920_v12 = vmul.f32 0.01, %v3912_v7  ;;  %vm3916_vm7 = vcmp.ge.f32.partialorder %v3912_v7, 0.0 }
0x19c4   : > { %v3924_v24 = vsel %vm3916_vm7, %v3912_v7, %v3920_v12  ;;  %v5796_v12 = vld [vmem:[#allocation11 + $0x570] sm:$0xff] }
0x19c5   : > { %v3893_v17 = vpop.f32.mrf.mxu2  ;;  %v3928_v61 = vadd.f32 %v3924_v24, %v6769_v49  ;;  %4202 = vmatpush.bf16.msrb.mxu2 %v5796_v12  ;;  %v5795_v24 = vld [vmem:[#allocation11 + $0x568] sm:$0xff] }
0x19c6   : > { %v3909_v53 = vmul.f32 %v3900_v10, %v3893_v17 }
0x19c7   : > { %v6793_v35 = vadd.f32 %v3928_v61, %v6594_v13  ;;  %v5784_v13 = vld [vmem:[#allocation11 + $0x520] sm:$0xff] }
0x19c8   : > { %v3913_v25 = vadd.f32 %v3909_v53, %v3905_v20  ;;  %4046 = vmatpush.bf16.msra.mxu3 %v5784_v13 }
0x19c9   : > { %4203 = vmatpush.bf16.msrb.mxu2 %v5795_v24 }
0x19ca   : > { %vm3917_vm10 = vcmp.ge.f32.partialorder %v3913_v25, 0.0  ;;  %v3921_v60 = vmul.f32 0.01, %v3913_v25 }
0x19cc   : > { %v3925_v29 = vsel %vm3917_vm10, %v3913_v25, %v3921_v60  ;;  %4047 = vmatpush.bf16.msra.mxu3 %v5783_v45 }
0x19cd   : > { %v3929_v31 = vadd.f32 %v3925_v29, %v6772_v52  ;;  %v6805_v52 = vadd.f32 %v3926_v15, %v6605_v19  ;;  %v5780_v19 = vld [vmem:[#allocation11 + $0x500] sm:$0xff]  ;;  %4204 = vmatpush.bf16.msrb.mxu2 %v5794_v27  ;;  %v5793_v29 = vld [vmem:[#allocation11 + $0x558] sm:$0xff] }
0x19ce   : > { %v5790_v15 = vld [vmem:[#allocation11 + $0x540] sm:$0xff] }
0x19cf   : > { %v6796_v36 = vadd.f32 %v3929_v31, %v6597_v14  ;;  %v3956_v14 = vpack.c.bf16 %v6802_v38, %v6805_v52  ;;  %v5792_v31 = vld [vmem:[#allocation11 + $0x550] sm:$0xff]  ;;  %v5798_v27 = vld [vmem:[%s6877_s9] sm:$0xff] }
0x19d0   : > { %4048 = vmatpush.bf16.msra.mxu3 %v5782_v18 }
0x19d1   : > { %v3957_v49 = vpack.c.bf16 %v6796_v36, %v6793_v35  ;;  %4205 = vmatpush.bf16.msrb.mxu2 %v5793_v29  ;;  %v5941_v29 = vld [vmem:[%s6547_s4] sm:$0xff] }
0x19d3   : > { %3980 = vmatpush.bf16.msra.mxu0 %v3957_v49 }
0x19d4   : > { %4049 = vmatpush.bf16.msra.mxu3 %v5781_v23  ;;  %v5806_v23 = vld [vmem:[#allocation16 + $0x38] sm:$0xff] }
0x19d5   : > { %4206 = vmatpush.bf16.msrb.mxu2 %v5792_v31  ;;  %v4302_v31 = vld [vmem:[%s6906_s25 + $0x8] sm:$0xff] }
0x19d7   : > { %3981 = vmatpush.bf16.msra.mxu0 %v3956_v14 }
0x19d8   : > { %4050 = vmatpush.bf16.msra.mxu3 %v5780_v19  ;;  %v4222_v19 = vld [vmem:[#allocation13 + $0x2a8] sm:$0xff] }
0x19d9   : > { %4207 = vmatpush.bf16.msrb.mxu2 %v5791_v32 }
0x19da   : > { %5449 = vmatmul.msk.bf16.vlgmr.msra.gmra.mxu0 %vm749_vm5, %v5778_v44 }
0x19dc   : > { %4351 = vmatpush.bf16.msrb.mxu3 %v5806_v23 }
0x19dd   : > { %4208 = vmatpush.bf16.msrb.mxu2 %v5790_v15 }
0x19ea   : > { %5450 = vmatmul.msk.bf16.gmra.mxu0 %vm749_vm5, %v5779_v22 }
0x1a57   : > { %v3983_v40 = vpop.f32.mrf.mxu0 }
0x1a5f   : > { %v3985_v33 = vpop.f32.mrf.mxu0 }
0x1a60   : > { %v3993_v41 = vpack.c.bf16 %v3985_v33, %v3983_v40  ;;  %v4223_v40 = vld [vmem:[#allocation13 + $0x2b0] sm:$0xff] }
0x1a61   : > { %v5805_v33 = vld [vmem:[#allocation16 + $0x30] sm:$0xff] }
0x1a62   : > { %4051 = vmatmul.bf16.vlgmr.msra.gmra.mxu3 %v3993_v41  ;;  %v4221_v41 = vld [vmem:[#allocation13 + $0x2a0] sm:$0xff] }
0x1a63   : > { %4352 = vmatpush.bf16.msrb.mxu3 %v5805_v33 }
0x1a67   : > { %v3988_v48 = vpop.f32.mrf.mxu0 }
0x1a6f   : > { %v3990_v57 = vpop.f32.mrf.mxu0 }
0x1a70   : > { %v3994_v58 = vpack.c.bf16 %v3990_v57, %v3988_v48  ;;  %v4228_v57 = vld [vmem:[#allocation14 + $0x2b0] sm:$0xff] }
0x1a72   : > { %4056 = vmatmul.bf16.gmra.mxu3 %v3994_v58 }
0x1ae5   : > { %v4052_v55 = vpop.f32.mrf.mxu3 }
0x1ae6   : > { %v4072_v1 = vmul.f32 %v4063_v56, %v4052_v55 }
0x1ae8   : > { %v4076_v9 = vadd.f32 %v4072_v1, %v4068_v3 }
0x1aea   : > { %v4084_v21 = vmul.f32 0.01, %v4076_v9  ;;  %vm4080_vm14 = vcmp.ge.f32.partialorder %v4076_v9, 0.0 }
0x1aec   : > { %v4088_v60 = vsel %vm4080_vm14, %v4076_v9, %v4084_v21 }
0x1aed   : > { %v4054_v34 = vpop.f32.mrf.mxu3 }
0x1aee   : > { %v4073_v59 = vmul.f32 %v4064_v16, %v4054_v34  ;;  %v4227_v34 = vld [vmem:[#allocation14 + $0x2a8] sm:$0xff] }
0x1aef   : > { %v5804_v16 = vld [vmem:[#allocation16 + $0x28] sm:$0xff] }
0x1af0   : > { %v4077_v6 = vadd.f32 %v4073_v59, %v4069_v51  ;;  %4353 = vmatpush.bf16.msrb.mxu3 %v5804_v16 }
0x1af2   : > { %v4085_v17 = vmul.f32 0.01, %v4077_v6  ;;  %vm4081_vm13 = vcmp.ge.f32.partialorder %v4077_v6, 0.0 }
0x1af4   : > { %v4089_v26 = vsel %vm4081_vm13, %v4077_v6, %v4085_v17 }
0x1af5   : > { %v4057_v39 = vpop.f32.mrf.mxu3  ;;  %v4114_v61 = vpack.c.bf16 %v4089_v26, %v4088_v60 }
0x1af6   : > { %v4074_v63 = vmul.f32 %v4065_v62, %v4057_v39 }
0x1af8   : > { %v4078_v2 = vadd.f32 %v4074_v63, %v4070_v50  ;;  %v4226_v63 = vld [vmem:[#allocation14 + $0x2a0] sm:$0xff]  ;;  %v4224_v50 = vld [vmem:[#allocation13 + $0x2b8] sm:$0xff] }
0x1afa   : > { %v4086_v10 = vmul.f32 0.01, %v4078_v2  ;;  %vm4082_vm11 = vcmp.ge.f32.partialorder %v4078_v2, 0.0 }
0x1afc   : > { %v4090_v53 = vsel %vm4082_vm11, %v4078_v2, %v4086_v10  ;;  %v4229_v2 = vld [vmem:[#allocation14 + $0x2b8] sm:$0xff] }
0x1afd   : > { %v4059_v4 = vpop.f32.mrf.mxu3 }
0x1afe   : > { %v4075_v7 = vmul.f32 %v4066_v0, %v4059_v4  ;;  %v5803_v0 = vld [vmem:[#allocation16 + $0x20] sm:$0xff] }
0x1aff   : > { %4354 = vmatpush.bf16.msrb.mxu3 %v5803_v0 }
0x1b00   : > { %v4079_v11 = vadd.f32 %v4075_v7, %v4071_v5 }
0x1b02   : > { %vm4083_vm12 = vcmp.ge.f32.partialorder %v4079_v11, 0.0  ;;  %v4087_v20 = vmul.f32 0.01, %v4079_v11 }
0x1b03   : > { %4355 = vmatpush.bf16.msrb.mxu3 %v5802_v8 }
0x1b04   : > { %v4091_v54 = vsel %vm4083_vm12, %v4079_v11, %v4087_v20 }
0x1b05   : > { %v4115_v25 = vpack.c.bf16 %v4091_v54, %v4090_v53 }
0x1b07   : > { %4138 = vmatpush.bf16.msrb.mxu1 %v4115_v25 }
0x1b0b   : > { %4139 = vmatpush.bf16.msrb.mxu1 %v4114_v61 }
0x1b0e   : > { %5491 = vmatmul.msk.bf16.vlgmr.msrb.gmra.mxu1 %vm749_vm5, %v5788_v28 }
0x1b1e   : > { %5492 = vmatmul.msk.bf16.gmra.mxu1 %vm749_vm5, %v5789_v30 }
0x1b8b   : > { %v4141_v37 = vpop.f32.mrf.mxu1 }
0x1b93   : > { %v4143_v49 = vpop.f32.mrf.mxu1 }
0x1b94   : > { %v4151_v13 = vpack.c.bf16 %v4143_v49, %v4141_v37  ;;  %v5942_v37 = vld [vmem:[%s6547_s4 + $0x8] sm:$0xff] }
0x1b96   : > { %4209 = vmatmul.bf16.vlgmr.msrb.gmra.mxu2 %v4151_v13 }
0x1b9b   : > { %v4146_v14 = vpop.f32.mrf.mxu1 }
0x1ba3   : > { %v4148_v44 = vpop.f32.mrf.mxu1 }
0x1ba4   : > { %v4152_v45 = vpack.c.bf16 %v4148_v44, %v4146_v14 }
0x1ba6   : > { %4214 = vmatmul.bf16.gmra.mxu2 %v4152_v45 }
0x1c19   : > { %v4210_v22 = vpop.f32.mrf.mxu2 }
0x1c1a   : > { %v4230_v39 = vmul.f32 %v4221_v41, %v4210_v22 }
0x1c1c   : > { %v4234_v59 = vadd.f32 %v4230_v39, %v4226_v63 }
0x1c1e   : > { %v4242_v5 = vmul.f32 0.01, %v4234_v59  ;;  %vm4238_vm1 = vcmp.ge.f32.partialorder %v4234_v59, 0.0 }
0x1c20   : > { %v4246_v12 = vsel %vm4238_vm1, %v4234_v59, %v4242_v5 }
0x1c21   : > { %v4212_v18 = vpop.f32.mrf.mxu2  ;;  %v4250_v24 = vadd.f32 %v4246_v12, %v6805_v52  ;;  %v4301_v52 = vld [vmem:[%s6906_s25] sm:$0xff] }
0x1c22   : > { %v4231_v58 = vmul.f32 %v4222_v19, %v4212_v18 }
0x1c23   : > { %v4254_v60 = vadd.f32 %v4250_v24, %v6585_v47 }
0x1c24   : > { %v4235_v56 = vadd.f32 %v4231_v58, %v4227_v34 }
0x1c26   : > { %v4243_v3 = vmul.f32 0.01, %v4235_v56  ;;  %vm4239_vm0 = vcmp.ge.f32.partialorder %v4235_v56, 0.0 }
0x1c28   : > { %v4247_v9 = vsel %vm4239_vm0, %v4235_v56, %v4243_v3 }
0x1c29   : > { %v4215_v48 = vpop.f32.mrf.mxu2  ;;  %v4251_v21 = vadd.f32 %v4247_v9, %v6802_v38 }
0x1c2a   : > { %v4232_v55 = vmul.f32 %v4223_v40, %v4215_v48 }
0x1c2b   : > { %v4255_v26 = vadd.f32 %v4251_v21, %v6583_v46 }
0x1c2c   : > { %v4236_v62 = vadd.f32 %v4232_v55, %v4228_v57 }
0x1c2e   : > { %v4244_v51 = vmul.f32 0.01, %v4236_v62  ;;  %vm4240_vm15 = vcmp.ge.f32.partialorder %v4236_v62, 0.0 }
0x1c30   : > { %v4248_v6 = vsel %vm4240_vm15, %v4236_v62, %v4244_v51 }
0x1c31   : > { %v4217_v1 = vpop.f32.mrf.mxu2  ;;  %v4252_v11 = vadd.f32 %v4248_v6, %v6793_v35  ;;  %v4276_v35 = vpack.c.bf16 %v4255_v26, %v4254_v60 }
0x1c32   : > { %v4233_v4 = vmul.f32 %v4224_v50, %v4217_v1 }
0x1c33   : > { %v4256_v53 = vadd.f32 %v4252_v11, %v6577_v42  ;;  %v5801_v42 = vld [vmem:[#allocation16 + $0x10] sm:$0xff] }
0x1c34   : > { %v4237_v7 = vadd.f32 %v4233_v4, %v4229_v2  ;;  %4356 = vmatpush.bf16.msrb.mxu3 %v5801_v42 }
0x1c36   : > { %vm4241_vm2 = vcmp.ge.f32.partialorder %v4237_v7, 0.0  ;;  %v4245_v10 = vmul.f32 0.01, %v4237_v7 }
0x1c38   : > { %v4249_v17 = vsel %vm4241_vm2, %v4237_v7, %v4245_v10 }
0x1c39   : > { %v4253_v20 = vadd.f32 %v4249_v17, %v6796_v36  ;;  %v5799_v36 = vld [vmem:[#allocation16] sm:$0xff] }
0x1c3b   : > { %v4257_v54 = vadd.f32 %v4253_v20, %v6579_v43  ;;  %v5800_v43 = vld [vmem:[#allocation16 + $0x8] sm:$0xff] }
0x1c3c   : > { %4357 = vmatpush.bf16.msrb.mxu3 %v5800_v43 }
0x1c3d   : > { %v4277_v25 = vpack.c.bf16 %v4257_v54, %v4256_v53 }
0x1c3f   : > { %4292 = vmatpush.bf16.msrb.mxu0 %v4277_v25 }
0x1c40   : > { %4358 = vmatpush.bf16.msrb.mxu3 %v5799_v36 }
0x1c43   : > { %4293 = vmatpush.bf16.msrb.mxu0 %v4276_v35 }
0x1c46   : > { %5529 = vmatmul.msk.bf16.vlgmr.msrb.gmra.mxu0 %vm749_vm5, %v5798_v27 }
0x1cc3   : > { %v4295_v46 = vpop.f32.mrf.mxu0 }
0x1ccb   : > { %v4297_v38 = vpop.f32.mrf.mxu0 }
0x1ccc   : > { %v4300_v47 = vpack.c.bf16 %v4297_v38, %v4295_v46 }
0x1cce   : > { %4359 = vmatmul.bf16.vlgmr.msrb.gmra.mxu3 %v4300_v47 }
0x1d51   : > { %v4360_v61 = vpop.f32.mrf.mxu3 }
0x1d52   : > { %v4361_v28 = vadd.f32 %v4360_v61, %v4301_v52 }
0x1d54   : > { %v4365_v30 = vadd.f32 %v5941_v29, %v4361_v28 }
0x1d56   : > { %4367 = vst [vmem:[%s565_s15] sm:$0xff] %v4365_v30 }
0x1d59   : > { %v4362_v32 = vpop.f32.mrf.mxu3 }
0x1d5a   : > { %v4363_v15 = vadd.f32 %v4362_v32, %v4302_v31 }
0x1d5c   : > { %v4366_v49 = vadd.f32 %v5942_v37, %v4363_v15 }
0x1d5e   : > { %4368 = vst [vmem:[%s565_s15 + $0x8] sm:$0xff] %v4366_v49 }
0x1d5f   : > { %6240 = shalt.err (!%p6237_p9)
}
0x1d60   : > { %s6309_s20 = smov 128   ;;  %s6310_s4 = smov 8  }
0x1d61   : > { %5842 = dma.vmem_to_hbm [thread:$0]  (%p6507_p4), %s4383_s16, 256, %s4385_s6, %s4370_s28, %s6309_s20, %s6309_s20, %s6310_s4  }
0x1d62 PF: > { %s4399_s15 = sand.u32 1, %s6283_s21   ;;  %p6908_p10 = scmp.ge.s32.totalorder %s6295_s24, 2 }
0x1d63   : > { %s4400_s18 = scalar_lea.sflag [#allocation4], %s4399_s15 }
0x1d64   : > { %p5874_p13 = pnand %p6908_p10, %p6511_p6 }
0x1d66   : > { %p5875_p11 = pneg %p5874_p13 }
0x1d68   : > { %6278 = dma.done.wait (%p5875_p11), %s4400_s18, 256  }
0x1d69   : > { %6280 = vsyncadd (%p5875_p11), %s4400_s18, 4294967040  ;;  %p29_p0 = scmp.ge.s32.totalorder %s6481_s11, 4   ;;  %s6909_s21 = smov %s6287_s22 }
0x1d6a   : > { %s6910_s22 = smov %s6291_s23  ;;  %s6911_s23 = smov %s6492_s26 }
0x1d6b   : > { %s6912_s24 = smov %s6481_s11  ;;  %31 = sbr.rel (!%p29_p0) target bundleno = 17 (0x11), region = 229 }
0x1d70   :  { %4406 = vsyncpa [#allocation3], 1 }
0x1d71   :  { %4408 = vsyncpa [#allocation3 + $0x1], 1 }
0x1d72   :  { %4409 = vsyncpa [#allocation6], 1 }
0x1d73   :  { %4410 = vsyncpa [#allocation9], 1 }
0x1d74   :  { %4411 = vsyncpa [#allocation12], 1 }
0x1d75   :  { %4412 = vsyncpa [#allocation15], 1 }
0x1d76   :  { %4413 = vsyncpa [#allocation4], 1 }
0x1d77   :  { %4415 = vsyncpa [#allocation4 + $0x1], 1 }

</bundles_post_ra>
